<compile_context>
chip_gen: v7x
topology: tpu7x:2x2x1
jax: 0.10.0
libtpu: 0.0.40
codegen_flags: <defaults>
</compile_context>

<pallas_src>
import functools
import math

import jax
import jax.numpy as jnp
from jax.experimental import pallas as pl
from jax.experimental.pallas import tpu as pltpu


CFG = dict(vocab=100, max_pos=16, type_vocab=2,
           hidden=32, heads=4, layers=2, intermediate=64, num_labels=6)


# ----------------------------------------------------------------------------
# Fused forward kernel: embeddings-LN -> encoder layers -> pooler -> l3 -> loss
# ----------------------------------------------------------------------------
def _bert_forward_kernel(
    # inputs
    x_ref, mask_ref, labels_ref, lemb_ref,
    emb_g_ref, emb_b_ref,
    qkv_w_ref, qkv_b_ref, ao_w_ref, ao_b_ref, ln1_g_ref, ln1_b_ref,
    ffn_wi_ref, ffn_bi_ref, ffn_wo_ref, ffn_bo_ref, ln2_g_ref, ln2_b_ref,
    pool_w_ref, pool_b_ref, l3_w_ref, l3_b_ref,
    # outputs (order matches out_shape: loss first, logits second)
    loss_ref, logits_ref,
    # scratch
    ctx_scr, cls_scr,
    *, num_layers, batch, seq, heads, head_dim, hidden, kappa):
  f32 = jnp.float32
  bf16 = jnp.bfloat16
  H = hidden
  dh = head_dim
  scale = f32(1.0 / math.sqrt(dh))

  def layer_norm(v, g, b, eps=1e-12):
    mu = jnp.mean(v, axis=-1, keepdims=True)
    c = v - mu
    var = jnp.mean(c * c, axis=-1, keepdims=True)
    return c * jax.lax.rsqrt(var + eps) * g + b

  def gelu(v):  # tanh-approx GELU (HF 'gelu' is the erf form; tiny drift)
    k0 = f32(0.7978845608028654)
    return 0.5 * v * (1.0 + jnp.tanh(k0 * (v + 0.044715 * v * v * v)))

  # ---- embedding LayerNorm (no residual) ----
  x = layer_norm(x_ref[...], emb_g_ref[...], emb_b_ref[...])      # (M, H) f32
  mask = mask_ref[...]                                            # (B, S) additive

  # ---- transformer encoder ----
  for l in range(num_layers):
    # fused Q|K|V projection: (M, H) @ (H, 3H), bf16 MXU, f32 accumulate
    qkv = jnp.dot(x.astype(bf16), qkv_w_ref[l],
                  preferred_element_type=f32) + qkv_b_ref[l]      # (M, 3H)

    # per-(batch, head) attention; context assembled in VMEM scratch
    for b in range(batch):
      row0 = b * seq
      m_b = mask[b:b + 1, :]                                      # (1, S)
      for h in range(heads):
        c0 = h * dh
        q_bh = qkv[row0:row0 + seq, c0:c0 + dh]
        k_bh = qkv[row0:row0 + seq, H + c0:H + c0 + dh]
        v_bh = qkv[row0:row0 + seq, 2 * H + c0:2 * H + c0 + dh]
        s = jax.lax.dot_general(
            q_bh.astype(bf16), k_bh.astype(bf16),
            (((1,), (1,)), ((), ())),
            preferred_element_type=f32) * scale + m_b             # (S, S)
        s_max = jnp.max(s, axis=-1, keepdims=True)
        p = jnp.exp(s - s_max)
        p = p * pl.reciprocal(jnp.sum(p, axis=-1, keepdims=True), approx=True)
        ctx_scr[row0:row0 + seq, c0:c0 + dh] = jnp.dot(
            p.astype(bf16), v_bh.astype(bf16), preferred_element_type=f32)

    ctx = ctx_scr[...]                                            # (M, H)
    # attention output projection + residual + LayerNorm (fused)
    attn = jnp.dot(ctx.astype(bf16), ao_w_ref[l],
                   preferred_element_type=f32) + ao_b_ref[l]
    x = layer_norm(attn + x, ln1_g_ref[l], ln1_b_ref[l])
    # FFN + residual + LayerNorm (fused)
    ff = gelu(jnp.dot(x.astype(bf16), ffn_wi_ref[l],
                      preferred_element_type=f32) + ffn_bi_ref[l])
    ff = jnp.dot(ff.astype(bf16), ffn_wo_ref[l],
                 preferred_element_type=f32) + ffn_bo_ref[l]
    x = layer_norm(ff + x, ln2_g_ref[l], ln2_b_ref[l])

  # ---- pooler (tanh dense on CLS); l2 Dropout(0.3) is eval-mode identity ----
  for b in range(batch):
    cls_scr[b:b + 1, :] = x[b * seq:b * seq + 1, :]
  cls = cls_scr[...]                                              # (B, H)
  pooled = jnp.tanh(jnp.dot(cls, pool_w_ref[...],
                            preferred_element_type=f32) + pool_b_ref[...])

  # ---- l3: near-identity Linear ----
  proj = jnp.dot(pooled, l3_w_ref[...],
                 preferred_element_type=f32) + l3_b_ref[...]      # (B, H)

  # ---- contrastiveNLLvMF_self: kappa-scaled cosine-sim cross entropy ----
  e = lemb_ref[...]                                               # (NL, H)
  xn = proj * jax.lax.rsqrt(jnp.sum(proj * proj, axis=-1, keepdims=True) + 1e-12)
  en = e * jax.lax.rsqrt(jnp.sum(e * e, axis=-1, keepdims=True) + 1e-12)
  logits = kappa * jax.lax.dot_general(
      xn, en, (((1,), (1,)), ((), ())), preferred_element_type=f32)  # (B, NL)
  m = jnp.max(logits, axis=-1, keepdims=True)
  lse = m + jnp.log(jnp.sum(jnp.exp(logits - m), axis=-1, keepdims=True))
  labels = labels_ref[...]                                        # (B, 1) int32
  onehot = (jax.lax.broadcasted_iota(jnp.int32, logits.shape, 1)
            == labels).astype(f32)
  nll = lse - jnp.sum(onehot * logits, axis=-1, keepdims=True)    # (B, 1)

  loss_ref[...] = jnp.mean(nll, axis=0, keepdims=True)            # (1, 1)
  logits_ref[...] = logits                                        # (B, NL)


# ----------------------------------------------------------------------------
# Parameters (random small BERT, layer weights stacked; matmul weights bf16)
# ----------------------------------------------------------------------------
def init_params(key, cfg):
  H, I, L = cfg["hidden"], cfg["intermediate"], cfg["layers"]
  keys = iter(jax.random.split(key, 16))

  def w(k, shape):
    return 0.02 * jax.random.normal(k, shape, jnp.float32)

  p = {
      "word_emb": w(next(keys), (cfg["vocab"], H)),
      "pos_emb": w(next(keys), (cfg["max_pos"], H)),
      "type_emb": w(next(keys), (cfg["type_vocab"], H)),
      "emb_ln_g": jnp.ones((1, H), jnp.float32),
      "emb_ln_b": jnp.zeros((1, H), jnp.float32),
      # stacked per-layer weights; MXU operands stored as bf16
      "qkv_w": w(next(keys), (L, H, 3 * H)).astype(jnp.bfloat16),
      "qkv_b": jnp.zeros((L, 1, 3 * H), jnp.float32),
      "ao_w": w(next(keys), (L, H, H)).astype(jnp.bfloat16),
      "ao_b": jnp.zeros((L, 1, H), jnp.float32),
      "ln1_g": jnp.ones((L, 1, H), jnp.float32),
      "ln1_b": jnp.zeros((L, 1, H), jnp.float32),
      "ffn_wi": w(next(keys), (L, H, I)).astype(jnp.bfloat16),
      "ffn_bi": jnp.zeros((L, 1, I), jnp.float32),
      "ffn_wo": w(next(keys), (L, I, H)).astype(jnp.bfloat16),
      "ffn_bo": jnp.zeros((L, 1, H), jnp.float32),
      "ln2_g": jnp.ones((L, 1, H), jnp.float32),
      "ln2_b": jnp.zeros((L, 1, H), jnp.float32),
      "pool_w": w(next(keys), (H, H)),
      "pool_b": jnp.zeros((1, H), jnp.float32),
      # l3 = Linear(H, H) with weight = eye + 1e-6*rand, bias = 0
      "l3_w": jnp.eye(H, dtype=jnp.float32) + 1e-6 * w(next(keys), (H, H)),
      "l3_b": jnp.zeros((1, H), jnp.float32),
  }
  return p


# ----------------------------------------------------------------------------
# Forward wrapper: embedding gathers in XLA glue, everything else in one kernel
# ----------------------------------------------------------------------------
def bert_class_forward(params, ids, label_embeddings, attention_mask,
                       token_type_ids, labels, additional_args):
  cfg = CFG
  B, S = ids.shape
  H, nH, L, NL = cfg["hidden"], cfg["heads"], cfg["layers"], cfg["num_labels"]
  dh = H // nH

  # embedding gathers (data-dependent; kept in XLA glue)
  x_emb = (params["word_emb"][ids]
           + params["pos_emb"][:S][None, :, :]
           + params["type_emb"][token_type_ids]).reshape(B * S, H)
  x_emb = x_emb.astype(jnp.float32)

  # additive attention mask (B, S)
  add_mask = (1.0 - attention_mask.astype(jnp.float32)) * -10000.0
  labels2d = labels.reshape(B, 1).astype(jnp.int32)
  kappa = float(additional_args.get("kappa", 10.0))

  kernel = functools.partial(
      _bert_forward_kernel, num_layers=L, batch=B, seq=S,
      heads=nH, head_dim=dh, hidden=H, kappa=kappa)

  loss, logits = pl.pallas_call(
      kernel,
      out_shape=(jax.ShapeDtypeStruct((1, 1), jnp.float32),
                 jax.ShapeDtypeStruct((B, NL), jnp.float32)),
      scratch_shapes=[pltpu.VMEM((B * S, H), jnp.float32),   # attention context
                      pltpu.VMEM((B, H), jnp.float32)],      # CLS rows
  )(x_emb, add_mask, labels2d, label_embeddings.astype(jnp.float32),
    params["emb_ln_g"], params["emb_ln_b"],
    params["qkv_w"], params["qkv_b"],
    params["ao_w"], params["ao_b"],
    params["ln1_g"], params["ln1_b"],
    params["ffn_wi"], params["ffn_bi"],
    params["ffn_wo"], params["ffn_bo"],
    params["ln2_g"], params["ln2_b"],
    params["pool_w"], params["pool_b"],
    params["l3_w"], params["l3_b"])

  return loss[0, 0], logits


# ----------------------------------------------------------------------------
if __name__ == "__main__":
  cfg = CFG
  B, S = 2, 8
  key = jax.random.PRNGKey(0)
  k_params, k_ids, k_type, k_lab, k_lemb = jax.random.split(key, 5)

  params = init_params(k_params, cfg)

  ids = jax.random.randint(k_ids, (B, S), 0, cfg["vocab"], dtype=jnp.int32)
  attention_mask = jnp.ones((B, S), jnp.int32)
  token_type_ids = jax.random.randint(k_type, (B, S), 0, cfg["type_vocab"],
                                      dtype=jnp.int32)
  labels = jax.random.randint(k_lab, (B,), 0, cfg["num_labels"],
                              dtype=jnp.int32)
  label_embeddings = 0.5 * jax.random.normal(
      k_lemb, (cfg["num_labels"], cfg["hidden"]), jnp.float32)
  additional_args = {"kappa": 10.0}

  loss, logits = bert_class_forward(params, ids, label_embeddings,
                                    attention_mask, token_type_ids,
                                    labels, additional_args)
  jax.block_until_ready((loss, logits))
  assert logits.shape == (B, cfg["num_labels"])
  assert bool(jnp.isfinite(loss))
  print("KERNEL_OK")
</pallas_src>

<mosaic_0001>
module attributes {stable_mosaic.version = 11 : i64} {
  func.func @_bert_forward_kernel(%arg0: memref<16x32xf32, #tpu.memory_space<vmem>>, %arg1: memref<2x8xf32, #tpu.memory_space<vmem>>, %arg2: memref<2x1xi32, #tpu.memory_space<vmem>>, %arg3: memref<6x32xf32, #tpu.memory_space<vmem>>, %arg4: memref<1x32xf32, #tpu.memory_space<vmem>>, %arg5: memref<1x32xf32, #tpu.memory_space<vmem>>, %arg6: memref<2x32x96xbf16, #tpu.memory_space<vmem>>, %arg7: memref<2x1x96xf32, #tpu.memory_space<vmem>>, %arg8: memref<2x32x32xbf16, #tpu.memory_space<vmem>>, %arg9: memref<2x1x32xf32, #tpu.memory_space<vmem>>, %arg10: memref<2x1x32xf32, #tpu.memory_space<vmem>>, %arg11: memref<2x1x32xf32, #tpu.memory_space<vmem>>, %arg12: memref<2x32x64xbf16, #tpu.memory_space<vmem>>, %arg13: memref<2x1x64xf32, #tpu.memory_space<vmem>>, %arg14: memref<2x64x32xbf16, #tpu.memory_space<vmem>>, %arg15: memref<2x1x32xf32, #tpu.memory_space<vmem>>, %arg16: memref<2x1x32xf32, #tpu.memory_space<vmem>>, %arg17: memref<2x1x32xf32, #tpu.memory_space<vmem>>, %arg18: memref<32x32xf32, #tpu.memory_space<vmem>>, %arg19: memref<1x32xf32, #tpu.memory_space<vmem>>, %arg20: memref<32x32xf32, #tpu.memory_space<vmem>>, %arg21: memref<1x32xf32, #tpu.memory_space<vmem>>, %arg22: memref<1x1xf32, #tpu.memory_space<vmem>>, %arg23: memref<2x6xf32, #tpu.memory_space<vmem>>, %arg24: memref<16x32xf32, #tpu.memory_space<vmem>>, %arg25: memref<2x32xf32, #tpu.memory_space<vmem>>) attributes {dimension_semantics = [], scalar_prefetch = 0 : i64, scratch_operands = 2 : i64, tpu.core_type = #tpu.core_type<tc>} {
    %c0 = arith.constant 0 : index
    %c0_0 = arith.constant 0 : index
    %0 = vector.load %arg0[%c0, %c0_0] : memref<16x32xf32, #tpu.memory_space<vmem>>, vector<16x32xf32>
    %c0_1 = arith.constant 0 : index
    %c0_2 = arith.constant 0 : index
    %1 = vector.load %arg4[%c0_1, %c0_2] : memref<1x32xf32, #tpu.memory_space<vmem>>, vector<1x32xf32>
    %c0_3 = arith.constant 0 : index
    %c0_4 = arith.constant 0 : index
    %2 = vector.load %arg5[%c0_3, %c0_4] : memref<1x32xf32, #tpu.memory_space<vmem>>, vector<1x32xf32>
    %cst = arith.constant dense<0.000000e+00> : vector<16xf32>
    %3 = vector.multi_reduction <add>, %0, %cst [1] : vector<16x32xf32> to vector<16xf32>
    %4 = vector.shape_cast %3 : vector<16xf32> to vector<16x1xf32>
    %cst_5 = arith.constant 3.200000e+01 : f32
    %5 = vector.broadcast %cst_5 : f32 to vector<16x1xf32>
    %6 = arith.divf %4, %5 : vector<16x1xf32>
    %7 = vector.broadcast %6 : vector<16x1xf32> to vector<16x32xf32>
    %8 = arith.subf %0, %7 : vector<16x32xf32>
    %9 = arith.mulf %8, %8 : vector<16x32xf32>
    %cst_6 = arith.constant dense<0.000000e+00> : vector<16xf32>
    %10 = vector.multi_reduction <add>, %9, %cst_6 [1] : vector<16x32xf32> to vector<16xf32>
    %11 = vector.shape_cast %10 : vector<16xf32> to vector<16x1xf32>
    %cst_7 = arith.constant 3.200000e+01 : f32
    %12 = vector.broadcast %cst_7 : f32 to vector<16x1xf32>
    %13 = arith.divf %11, %12 : vector<16x1xf32>
    %cst_8 = arith.constant 9.99999996E-13 : f32
    %14 = vector.broadcast %cst_8 : f32 to vector<16x1xf32>
    %15 = arith.addf %13, %14 : vector<16x1xf32>
    %16 = math.rsqrt %15 : vector<16x1xf32>
    %17 = vector.broadcast %16 : vector<16x1xf32> to vector<16x32xf32>
    %18 = arith.mulf %8, %17 : vector<16x32xf32>
    %19 = vector.broadcast %1 : vector<1x32xf32> to vector<16x32xf32>
    %20 = arith.mulf %18, %19 : vector<16x32xf32>
    %21 = vector.broadcast %2 : vector<1x32xf32> to vector<16x32xf32>
    %22 = arith.addf %20, %21 : vector<16x32xf32>
    %c0_9 = arith.constant 0 : index
    %c0_10 = arith.constant 0 : index
    %23 = vector.load %arg1[%c0_9, %c0_10] : memref<2x8xf32, #tpu.memory_space<vmem>>, vector<2x8xf32>
    %24 = arith.truncf %22 : vector<16x32xf32> to vector<16x32xbf16>
    %c0_11 = arith.constant 0 : index
    %c0_12 = arith.constant 0 : index
    %c0_13 = arith.constant 0 : index
    %25 = vector.load %arg6[%c0_11, %c0_12, %c0_13] : memref<2x32x96xbf16, #tpu.memory_space<vmem>>, vector<1x32x96xbf16>
    %26 = vector.shape_cast %25 : vector<1x32x96xbf16> to vector<32x96xbf16>
    %cst_14 = arith.constant dense<0.000000e+00> : vector<16x96xf32>
    %27 = tpu.matmul %24, %26, %cst_14 {dimension_numbers = #tpu.dot_dimension_numbers<[1], [0], [0], [1], [0, 0, 1, 1], [], []>} : vector<16x32xbf16>, vector<32x96xbf16>, vector<16x96xf32> -> vector<16x96xf32>
    %c0_15 = arith.constant 0 : index
    %c0_16 = arith.constant 0 : index
    %c0_17 = arith.constant 0 : index
    %28 = vector.load %arg7[%c0_15, %c0_16, %c0_17] : memref<2x1x96xf32, #tpu.memory_space<vmem>>, vector<1x1x96xf32>
    %29 = vector.shape_cast %28 : vector<1x1x96xf32> to vector<1x96xf32>
    %30 = vector.broadcast %29 : vector<1x96xf32> to vector<16x96xf32>
    %31 = arith.addf %27, %30 : vector<16x96xf32>
    %32 = vector.extract_strided_slice %23 {offsets = [0, 0], sizes = [1, 8], strides = [1, 1]} : vector<2x8xf32> to vector<1x8xf32>
    %33 = vector.extract_strided_slice %31 {offsets = [0, 0], sizes = [8, 8], strides = [1, 1]} : vector<16x96xf32> to vector<8x8xf32>
    %34 = vector.extract_strided_slice %31 {offsets = [0, 32], sizes = [8, 8], strides = [1, 1]} : vector<16x96xf32> to vector<8x8xf32>
    %35 = vector.extract_strided_slice %31 {offsets = [0, 64], sizes = [8, 8], strides = [1, 1]} : vector<16x96xf32> to vector<8x8xf32>
    %36 = arith.truncf %33 : vector<8x8xf32> to vector<8x8xbf16>
    %37 = arith.truncf %34 : vector<8x8xf32> to vector<8x8xbf16>
    %cst_18 = arith.constant dense<0.000000e+00> : vector<8x8xf32>
    %38 = tpu.matmul %36, %37, %cst_18 {dimension_numbers = #tpu.dot_dimension_numbers<[1], [1], [0], [0], [0, 0, 1, 0], [], []>} : vector<8x8xbf16>, vector<8x8xbf16>, vector<8x8xf32> -> vector<8x8xf32>
    %cst_19 = arith.constant 0.353553385 : f32
    %39 = vector.broadcast %cst_19 : f32 to vector<8x8xf32>
    %40 = arith.mulf %38, %39 : vector<8x8xf32>
    %41 = vector.broadcast %32 : vector<1x8xf32> to vector<8x8xf32>
    %42 = arith.addf %40, %41 : vector<8x8xf32>
    %cst_20 = arith.constant dense<0xFF800000> : vector<8xf32>
    %43 = vector.multi_reduction <maximumf>, %42, %cst_20 [1] : vector<8x8xf32> to vector<8xf32>
    %44 = vector.shape_cast %43 : vector<8xf32> to vector<8x1xf32>
    %45 = vector.broadcast %44 : vector<8x1xf32> to vector<8x8xf32>
    %46 = arith.subf %42, %45 : vector<8x8xf32>
    %47 = math.exp %46 : vector<8x8xf32>
    %cst_21 = arith.constant dense<0.000000e+00> : vector<8xf32>
    %48 = vector.multi_reduction <add>, %47, %cst_21 [1] : vector<8x8xf32> to vector<8xf32>
    %49 = vector.shape_cast %48 : vector<8xf32> to vector<8x1xf32>
    %50 = tpu.reciprocal %49 {approx = true} : vector<8x1xf32> -> vector<8x1xf32>
    %51 = vector.broadcast %50 : vector<8x1xf32> to vector<8x8xf32>
    %52 = arith.mulf %47, %51 : vector<8x8xf32>
    %53 = arith.truncf %52 : vector<8x8xf32> to vector<8x8xbf16>
    %54 = arith.truncf %35 : vector<8x8xf32> to vector<8x8xbf16>
    %cst_22 = arith.constant dense<0.000000e+00> : vector<8x8xf32>
    %55 = tpu.matmul %53, %54, %cst_22 {dimension_numbers = #tpu.dot_dimension_numbers<[1], [0], [0], [1], [0, 0, 1, 1], [], []>} : vector<8x8xbf16>, vector<8x8xbf16>, vector<8x8xf32> -> vector<8x8xf32>
    %c0_23 = arith.constant 0 : index
    %c0_24 = arith.constant 0 : index
    %56 = vector.load %arg24[%c0_23, %c0_24] : memref<16x32xf32, #tpu.memory_space<vmem>>, vector<8x8xf32>
    tpu.vector_store %arg24[%c0_23, %c0_24], %55 {strides = array<i32>} : memref<16x32xf32, #tpu.memory_space<vmem>>, vector<8x8xf32>,
    %57 = vector.extract_strided_slice %31 {offsets = [0, 8], sizes = [8, 8], strides = [1, 1]} : vector<16x96xf32> to vector<8x8xf32>
    %58 = vector.extract_strided_slice %31 {offsets = [0, 40], sizes = [8, 8], strides = [1, 1]} : vector<16x96xf32> to vector<8x8xf32>
    %59 = vector.extract_strided_slice %31 {offsets = [0, 72], sizes = [8, 8], strides = [1, 1]} : vector<16x96xf32> to vector<8x8xf32>
    %60 = arith.truncf %57 : vector<8x8xf32> to vector<8x8xbf16>
    %61 = arith.truncf %58 : vector<8x8xf32> to vector<8x8xbf16>
    %cst_25 = arith.constant dense<0.000000e+00> : vector<8x8xf32>
    %62 = tpu.matmul %60, %61, %cst_25 {dimension_numbers = #tpu.dot_dimension_numbers<[1], [1], [0], [0], [0, 0, 1, 0], [], []>} : vector<8x8xbf16>, vector<8x8xbf16>, vector<8x8xf32> -> vector<8x8xf32>
    %cst_26 = arith.constant 0.353553385 : f32
    %63 = vector.broadcast %cst_26 : f32 to vector<8x8xf32>
    %64 = arith.mulf %62, %63 : vector<8x8xf32>
    %65 = vector.broadcast %32 : vector<1x8xf32> to vector<8x8xf32>
    %66 = arith.addf %64, %65 : vector<8x8xf32>
    %cst_27 = arith.constant dense<0xFF800000> : vector<8xf32>
    %67 = vector.multi_reduction <maximumf>, %66, %cst_27 [1] : vector<8x8xf32> to vector<8xf32>
    %68 = vector.shape_cast %67 : vector<8xf32> to vector<8x1xf32>
    %69 = vector.broadcast %68 : vector<8x1xf32> to vector<8x8xf32>
    %70 = arith.subf %66, %69 : vector<8x8xf32>
    %71 = math.exp %70 : vector<8x8xf32>
    %cst_28 = arith.constant dense<0.000000e+00> : vector<8xf32>
    %72 = vector.multi_reduction <add>, %71, %cst_28 [1] : vector<8x8xf32> to vector<8xf32>
    %73 = vector.shape_cast %72 : vector<8xf32> to vector<8x1xf32>
    %74 = tpu.reciprocal %73 {approx = true} : vector<8x1xf32> -> vector<8x1xf32>
    %75 = vector.broadcast %74 : vector<8x1xf32> to vector<8x8xf32>
    %76 = arith.mulf %71, %75 : vector<8x8xf32>
    %77 = arith.truncf %76 : vector<8x8xf32> to vector<8x8xbf16>
    %78 = arith.truncf %59 : vector<8x8xf32> to vector<8x8xbf16>
    %cst_29 = arith.constant dense<0.000000e+00> : vector<8x8xf32>
    %79 = tpu.matmul %77, %78, %cst_29 {dimension_numbers = #tpu.dot_dimension_numbers<[1], [0], [0], [1], [0, 0, 1, 1], [], []>} : vector<8x8xbf16>, vector<8x8xbf16>, vector<8x8xf32> -> vector<8x8xf32>
    %c0_30 = arith.constant 0 : index
    %c8 = arith.constant 8 : index
    %80 = vector.load %arg24[%c0_30, %c8] : memref<16x32xf32, #tpu.memory_space<vmem>>, vector<8x8xf32>
    tpu.vector_store %arg24[%c0_30, %c8], %79 {strides = array<i32>} : memref<16x32xf32, #tpu.memory_space<vmem>>, vector<8x8xf32>,
    %81 = vector.extract_strided_slice %31 {offsets = [0, 16], sizes = [8, 8], strides = [1, 1]} : vector<16x96xf32> to vector<8x8xf32>
    %82 = vector.extract_strided_slice %31 {offsets = [0, 48], sizes = [8, 8], strides = [1, 1]} : vector<16x96xf32> to vector<8x8xf32>
    %83 = vector.extract_strided_slice %31 {offsets = [0, 80], sizes = [8, 8], strides = [1, 1]} : vector<16x96xf32> to vector<8x8xf32>
    %84 = arith.truncf %81 : vector<8x8xf32> to vector<8x8xbf16>
    %85 = arith.truncf %82 : vector<8x8xf32> to vector<8x8xbf16>
    %cst_31 = arith.constant dense<0.000000e+00> : vector<8x8xf32>
    %86 = tpu.matmul %84, %85, %cst_31 {dimension_numbers = #tpu.dot_dimension_numbers<[1], [1], [0], [0], [0, 0, 1, 0], [], []>} : vector<8x8xbf16>, vector<8x8xbf16>, vector<8x8xf32> -> vector<8x8xf32>
    %cst_32 = arith.constant 0.353553385 : f32
    %87 = vector.broadcast %cst_32 : f32 to vector<8x8xf32>
    %88 = arith.mulf %86, %87 : vector<8x8xf32>
    %89 = vector.broadcast %32 : vector<1x8xf32> to vector<8x8xf32>
    %90 = arith.addf %88, %89 : vector<8x8xf32>
    %cst_33 = arith.constant dense<0xFF800000> : vector<8xf32>
    %91 = vector.multi_reduction <maximumf>, %90, %cst_33 [1] : vector<8x8xf32> to vector<8xf32>
    %92 = vector.shape_cast %91 : vector<8xf32> to vector<8x1xf32>
    %93 = vector.broadcast %92 : vector<8x1xf32> to vector<8x8xf32>
    %94 = arith.subf %90, %93 : vector<8x8xf32>
    %95 = math.exp %94 : vector<8x8xf32>
    %cst_34 = arith.constant dense<0.000000e+00> : vector<8xf32>
    %96 = vector.multi_reduction <add>, %95, %cst_34 [1] : vector<8x8xf32> to vector<8xf32>
    %97 = vector.shape_cast %96 : vector<8xf32> to vector<8x1xf32>
    %98 = tpu.reciprocal %97 {approx = true} : vector<8x1xf32> -> vector<8x1xf32>
    %99 = vector.broadcast %98 : vector<8x1xf32> to vector<8x8xf32>
    %100 = arith.mulf %95, %99 : vector<8x8xf32>
    %101 = arith.truncf %100 : vector<8x8xf32> to vector<8x8xbf16>
    %102 = arith.truncf %83 : vector<8x8xf32> to vector<8x8xbf16>
    %cst_35 = arith.constant dense<0.000000e+00> : vector<8x8xf32>
    %103 = tpu.matmul %101, %102, %cst_35 {dimension_numbers = #tpu.dot_dimension_numbers<[1], [0], [0], [1], [0, 0, 1, 1], [], []>} : vector<8x8xbf16>, vector<8x8xbf16>, vector<8x8xf32> -> vector<8x8xf32>
    %c0_36 = arith.constant 0 : index
    %c16 = arith.constant 16 : index
    %104 = vector.load %arg24[%c0_36, %c16] : memref<16x32xf32, #tpu.memory_space<vmem>>, vector<8x8xf32>
    tpu.vector_store %arg24[%c0_36, %c16], %103 {strides = array<i32>} : memref<16x32xf32, #tpu.memory_space<vmem>>, vector<8x8xf32>,
    %105 = vector.extract_strided_slice %31 {offsets = [0, 24], sizes = [8, 8], strides = [1, 1]} : vector<16x96xf32> to vector<8x8xf32>
    %106 = vector.extract_strided_slice %31 {offsets = [0, 56], sizes = [8, 8], strides = [1, 1]} : vector<16x96xf32> to vector<8x8xf32>
    %107 = vector.extract_strided_slice %31 {offsets = [0, 88], sizes = [8, 8], strides = [1, 1]} : vector<16x96xf32> to vector<8x8xf32>
    %108 = arith.truncf %105 : vector<8x8xf32> to vector<8x8xbf16>
    %109 = arith.truncf %106 : vector<8x8xf32> to vector<8x8xbf16>
    %cst_37 = arith.constant dense<0.000000e+00> : vector<8x8xf32>
    %110 = tpu.matmul %108, %109, %cst_37 {dimension_numbers = #tpu.dot_dimension_numbers<[1], [1], [0], [0], [0, 0, 1, 0], [], []>} : vector<8x8xbf16>, vector<8x8xbf16>, vector<8x8xf32> -> vector<8x8xf32>
    %cst_38 = arith.constant 0.353553385 : f32
    %111 = vector.broadcast %cst_38 : f32 to vector<8x8xf32>
    %112 = arith.mulf %110, %111 : vector<8x8xf32>
    %113 = vector.broadcast %32 : vector<1x8xf32> to vector<8x8xf32>
    %114 = arith.addf %112, %113 : vector<8x8xf32>
    %cst_39 = arith.constant dense<0xFF800000> : vector<8xf32>
    %115 = vector.multi_reduction <maximumf>, %114, %cst_39 [1] : vector<8x8xf32> to vector<8xf32>
    %116 = vector.shape_cast %115 : vector<8xf32> to vector<8x1xf32>
    %117 = vector.broadcast %116 : vector<8x1xf32> to vector<8x8xf32>
    %118 = arith.subf %114, %117 : vector<8x8xf32>
    %119 = math.exp %118 : vector<8x8xf32>
    %cst_40 = arith.constant dense<0.000000e+00> : vector<8xf32>
    %120 = vector.multi_reduction <add>, %119, %cst_40 [1] : vector<8x8xf32> to vector<8xf32>
    %121 = vector.shape_cast %120 : vector<8xf32> to vector<8x1xf32>
    %122 = tpu.reciprocal %121 {approx = true} : vector<8x1xf32> -> vector<8x1xf32>
    %123 = vector.broadcast %122 : vector<8x1xf32> to vector<8x8xf32>
    %124 = arith.mulf %119, %123 : vector<8x8xf32>
    %125 = arith.truncf %124 : vector<8x8xf32> to vector<8x8xbf16>
    %126 = arith.truncf %107 : vector<8x8xf32> to vector<8x8xbf16>
    %cst_41 = arith.constant dense<0.000000e+00> : vector<8x8xf32>
    %127 = tpu.matmul %125, %126, %cst_41 {dimension_numbers = #tpu.dot_dimension_numbers<[1], [0], [0], [1], [0, 0, 1, 1], [], []>} : vector<8x8xbf16>, vector<8x8xbf16>, vector<8x8xf32> -> vector<8x8xf32>
    %c0_42 = arith.constant 0 : index
    %c24 = arith.constant 24 : index
    %128 = vector.load %arg24[%c0_42, %c24] : memref<16x32xf32, #tpu.memory_space<vmem>>, vector<8x8xf32>
    tpu.vector_store %arg24[%c0_42, %c24], %127 {strides = array<i32>} : memref<16x32xf32, #tpu.memory_space<vmem>>, vector<8x8xf32>,
    %129 = vector.extract_strided_slice %23 {offsets = [1, 0], sizes = [1, 8], strides = [1, 1]} : vector<2x8xf32> to vector<1x8xf32>
    %130 = vector.extract_strided_slice %31 {offsets = [8, 0], sizes = [8, 8], strides = [1, 1]} : vector<16x96xf32> to vector<8x8xf32>
    %131 = vector.extract_strided_slice %31 {offsets = [8, 32], sizes = [8, 8], strides = [1, 1]} : vector<16x96xf32> to vector<8x8xf32>
    %132 = vector.extract_strided_slice %31 {offsets = [8, 64], sizes = [8, 8], strides = [1, 1]} : vector<16x96xf32> to vector<8x8xf32>
    %133 = arith.truncf %130 : vector<8x8xf32> to vector<8x8xbf16>
    %134 = arith.truncf %131 : vector<8x8xf32> to vector<8x8xbf16>
    %cst_43 = arith.constant dense<0.000000e+00> : vector<8x8xf32>
    %135 = tpu.matmul %133, %134, %cst_43 {dimension_numbers = #tpu.dot_dimension_numbers<[1], [1], [0], [0], [0, 0, 1, 0], [], []>} : vector<8x8xbf16>, vector<8x8xbf16>, vector<8x8xf32> -> vector<8x8xf32>
    %cst_44 = arith.constant 0.353553385 : f32
    %136 = vector.broadcast %cst_44 : f32 to vector<8x8xf32>
    %137 = arith.mulf %135, %136 : vector<8x8xf32>
    %138 = vector.broadcast %129 : vector<1x8xf32> to vector<8x8xf32>
    %139 = arith.addf %137, %138 : vector<8x8xf32>
    %cst_45 = arith.constant dense<0xFF800000> : vector<8xf32>
    %140 = vector.multi_reduction <maximumf>, %139, %cst_45 [1] : vector<8x8xf32> to vector<8xf32>
    %141 = vector.shape_cast %140 : vector<8xf32> to vector<8x1xf32>
    %142 = vector.broadcast %141 : vector<8x1xf32> to vector<8x8xf32>
    %143 = arith.subf %139, %142 : vector<8x8xf32>
    %144 = math.exp %143 : vector<8x8xf32>
    %cst_46 = arith.constant dense<0.000000e+00> : vector<8xf32>
    %145 = vector.multi_reduction <add>, %144, %cst_46 [1] : vector<8x8xf32> to vector<8xf32>
    %146 = vector.shape_cast %145 : vector<8xf32> to vector<8x1xf32>
    %147 = tpu.reciprocal %146 {approx = true} : vector<8x1xf32> -> vector<8x1xf32>
    %148 = vector.broadcast %147 : vector<8x1xf32> to vector<8x8xf32>
    %149 = arith.mulf %144, %148 : vector<8x8xf32>
    %150 = arith.truncf %149 : vector<8x8xf32> to vector<8x8xbf16>
    %151 = arith.truncf %132 : vector<8x8xf32> to vector<8x8xbf16>
    %cst_47 = arith.constant dense<0.000000e+00> : vector<8x8xf32>
    %152 = tpu.matmul %150, %151, %cst_47 {dimension_numbers = #tpu.dot_dimension_numbers<[1], [0], [0], [1], [0, 0, 1, 1], [], []>} : vector<8x8xbf16>, vector<8x8xbf16>, vector<8x8xf32> -> vector<8x8xf32>
    %c8_48 = arith.constant 8 : index
    %c0_49 = arith.constant 0 : index
    %153 = vector.load %arg24[%c8_48, %c0_49] : memref<16x32xf32, #tpu.memory_space<vmem>>, vector<8x8xf32>
    tpu.vector_store %arg24[%c8_48, %c0_49], %152 {strides = array<i32>} : memref<16x32xf32, #tpu.memory_space<vmem>>, vector<8x8xf32>,
    %154 = vector.extract_strided_slice %31 {offsets = [8, 8], sizes = [8, 8], strides = [1, 1]} : vector<16x96xf32> to vector<8x8xf32>
    %155 = vector.extract_strided_slice %31 {offsets = [8, 40], sizes = [8, 8], strides = [1, 1]} : vector<16x96xf32> to vector<8x8xf32>
    %156 = vector.extract_strided_slice %31 {offsets = [8, 72], sizes = [8, 8], strides = [1, 1]} : vector<16x96xf32> to vector<8x8xf32>
    %157 = arith.truncf %154 : vector<8x8xf32> to vector<8x8xbf16>
    %158 = arith.truncf %155 : vector<8x8xf32> to vector<8x8xbf16>
    %cst_50 = arith.constant dense<0.000000e+00> : vector<8x8xf32>
    %159 = tpu.matmul %157, %158, %cst_50 {dimension_numbers = #tpu.dot_dimension_numbers<[1], [1], [0], [0], [0, 0, 1, 0], [], []>} : vector<8x8xbf16>, vector<8x8xbf16>, vector<8x8xf32> -> vector<8x8xf32>
    %cst_51 = arith.constant 0.353553385 : f32
    %160 = vector.broadcast %cst_51 : f32 to vector<8x8xf32>
    %161 = arith.mulf %159, %160 : vector<8x8xf32>
    %162 = vector.broadcast %129 : vector<1x8xf32> to vector<8x8xf32>
    %163 = arith.addf %161, %162 : vector<8x8xf32>
    %cst_52 = arith.constant dense<0xFF800000> : vector<8xf32>
    %164 = vector.multi_reduction <maximumf>, %163, %cst_52 [1] : vector<8x8xf32> to vector<8xf32>
    %165 = vector.shape_cast %164 : vector<8xf32> to vector<8x1xf32>
    %166 = vector.broadcast %165 : vector<8x1xf32> to vector<8x8xf32>
    %167 = arith.subf %163, %166 : vector<8x8xf32>
    %168 = math.exp %167 : vector<8x8xf32>
    %cst_53 = arith.constant dense<0.000000e+00> : vector<8xf32>
    %169 = vector.multi_reduction <add>, %168, %cst_53 [1] : vector<8x8xf32> to vector<8xf32>
    %170 = vector.shape_cast %169 : vector<8xf32> to vector<8x1xf32>
    %171 = tpu.reciprocal %170 {approx = true} : vector<8x1xf32> -> vector<8x1xf32>
    %172 = vector.broadcast %171 : vector<8x1xf32> to vector<8x8xf32>
    %173 = arith.mulf %168, %172 : vector<8x8xf32>
    %174 = arith.truncf %173 : vector<8x8xf32> to vector<8x8xbf16>
    %175 = arith.truncf %156 : vector<8x8xf32> to vector<8x8xbf16>
    %cst_54 = arith.constant dense<0.000000e+00> : vector<8x8xf32>
    %176 = tpu.matmul %174, %175, %cst_54 {dimension_numbers = #tpu.dot_dimension_numbers<[1], [0], [0], [1], [0, 0, 1, 1], [], []>} : vector<8x8xbf16>, vector<8x8xbf16>, vector<8x8xf32> -> vector<8x8xf32>
    %c8_55 = arith.constant 8 : index
    %c8_56 = arith.constant 8 : index
    %177 = vector.load %arg24[%c8_55, %c8_56] : memref<16x32xf32, #tpu.memory_space<vmem>>, vector<8x8xf32>
    tpu.vector_store %arg24[%c8_55, %c8_56], %176 {strides = array<i32>} : memref<16x32xf32, #tpu.memory_space<vmem>>, vector<8x8xf32>,
    %178 = vector.extract_strided_slice %31 {offsets = [8, 16], sizes = [8, 8], strides = [1, 1]} : vector<16x96xf32> to vector<8x8xf32>
    %179 = vector.extract_strided_slice %31 {offsets = [8, 48], sizes = [8, 8], strides = [1, 1]} : vector<16x96xf32> to vector<8x8xf32>
    %180 = vector.extract_strided_slice %31 {offsets = [8, 80], sizes = [8, 8], strides = [1, 1]} : vector<16x96xf32> to vector<8x8xf32>
    %181 = arith.truncf %178 : vector<8x8xf32> to vector<8x8xbf16>
    %182 = arith.truncf %179 : vector<8x8xf32> to vector<8x8xbf16>
    %cst_57 = arith.constant dense<0.000000e+00> : vector<8x8xf32>
    %183 = tpu.matmul %181, %182, %cst_57 {dimension_numbers = #tpu.dot_dimension_numbers<[1], [1], [0], [0], [0, 0, 1, 0], [], []>} : vector<8x8xbf16>, vector<8x8xbf16>, vector<8x8xf32> -> vector<8x8xf32>
    %cst_58 = arith.constant 0.353553385 : f32
    %184 = vector.broadcast %cst_58 : f32 to vector<8x8xf32>
    %185 = arith.mulf %183, %184 : vector<8x8xf32>
    %186 = vector.broadcast %129 : vector<1x8xf32> to vector<8x8xf32>
    %187 = arith.addf %185, %186 : vector<8x8xf32>
    %cst_59 = arith.constant dense<0xFF800000> : vector<8xf32>
    %188 = vector.multi_reduction <maximumf>, %187, %cst_59 [1] : vector<8x8xf32> to vector<8xf32>
    %189 = vector.shape_cast %188 : vector<8xf32> to vector<8x1xf32>
    %190 = vector.broadcast %189 : vector<8x1xf32> to vector<8x8xf32>
    %191 = arith.subf %187, %190 : vector<8x8xf32>
    %192 = math.exp %191 : vector<8x8xf32>
    %cst_60 = arith.constant dense<0.000000e+00> : vector<8xf32>
    %193 = vector.multi_reduction <add>, %192, %cst_60 [1] : vector<8x8xf32> to vector<8xf32>
    %194 = vector.shape_cast %193 : vector<8xf32> to vector<8x1xf32>
    %195 = tpu.reciprocal %194 {approx = true} : vector<8x1xf32> -> vector<8x1xf32>
    %196 = vector.broadcast %195 : vector<8x1xf32> to vector<8x8xf32>
    %197 = arith.mulf %192, %196 : vector<8x8xf32>
    %198 = arith.truncf %197 : vector<8x8xf32> to vector<8x8xbf16>
    %199 = arith.truncf %180 : vector<8x8xf32> to vector<8x8xbf16>
    %cst_61 = arith.constant dense<0.000000e+00> : vector<8x8xf32>
    %200 = tpu.matmul %198, %199, %cst_61 {dimension_numbers = #tpu.dot_dimension_numbers<[1], [0], [0], [1], [0, 0, 1, 1], [], []>} : vector<8x8xbf16>, vector<8x8xbf16>, vector<8x8xf32> -> vector<8x8xf32>
    %c8_62 = arith.constant 8 : index
    %c16_63 = arith.constant 16 : index
    %201 = vector.load %arg24[%c8_62, %c16_63] : memref<16x32xf32, #tpu.memory_space<vmem>>, vector<8x8xf32>
    tpu.vector_store %arg24[%c8_62, %c16_63], %200 {strides = array<i32>} : memref<16x32xf32, #tpu.memory_space<vmem>>, vector<8x8xf32>,
    %202 = vector.extract_strided_slice %31 {offsets = [8, 24], sizes = [8, 8], strides = [1, 1]} : vector<16x96xf32> to vector<8x8xf32>
    %203 = vector.extract_strided_slice %31 {offsets = [8, 56], sizes = [8, 8], strides = [1, 1]} : vector<16x96xf32> to vector<8x8xf32>
    %204 = vector.extract_strided_slice %31 {offsets = [8, 88], sizes = [8, 8], strides = [1, 1]} : vector<16x96xf32> to vector<8x8xf32>
    %205 = arith.truncf %202 : vector<8x8xf32> to vector<8x8xbf16>
    %206 = arith.truncf %203 : vector<8x8xf32> to vector<8x8xbf16>
    %cst_64 = arith.constant dense<0.000000e+00> : vector<8x8xf32>
    %207 = tpu.matmul %205, %206, %cst_64 {dimension_numbers = #tpu.dot_dimension_numbers<[1], [1], [0], [0], [0, 0, 1, 0], [], []>} : vector<8x8xbf16>, vector<8x8xbf16>, vector<8x8xf32> -> vector<8x8xf32>
    %cst_65 = arith.constant 0.353553385 : f32
    %208 = vector.broadcast %cst_65 : f32 to vector<8x8xf32>
    %209 = arith.mulf %207, %208 : vector<8x8xf32>
    %210 = vector.broadcast %129 : vector<1x8xf32> to vector<8x8xf32>
    %211 = arith.addf %209, %210 : vector<8x8xf32>
    %cst_66 = arith.constant dense<0xFF800000> : vector<8xf32>
    %212 = vector.multi_reduction <maximumf>, %211, %cst_66 [1] : vector<8x8xf32> to vector<8xf32>
    %213 = vector.shape_cast %212 : vector<8xf32> to vector<8x1xf32>
    %214 = vector.broadcast %213 : vector<8x1xf32> to vector<8x8xf32>
    %215 = arith.subf %211, %214 : vector<8x8xf32>
    %216 = math.exp %215 : vector<8x8xf32>
    %cst_67 = arith.constant dense<0.000000e+00> : vector<8xf32>
    %217 = vector.multi_reduction <add>, %216, %cst_67 [1] : vector<8x8xf32> to vector<8xf32>
    %218 = vector.shape_cast %217 : vector<8xf32> to vector<8x1xf32>
    %219 = tpu.reciprocal %218 {approx = true} : vector<8x1xf32> -> vector<8x1xf32>
    %220 = vector.broadcast %219 : vector<8x1xf32> to vector<8x8xf32>
    %221 = arith.mulf %216, %220 : vector<8x8xf32>
    %222 = arith.truncf %221 : vector<8x8xf32> to vector<8x8xbf16>
    %223 = arith.truncf %204 : vector<8x8xf32> to vector<8x8xbf16>
    %cst_68 = arith.constant dense<0.000000e+00> : vector<8x8xf32>
    %224 = tpu.matmul %222, %223, %cst_68 {dimension_numbers = #tpu.dot_dimension_numbers<[1], [0], [0], [1], [0, 0, 1, 1], [], []>} : vector<8x8xbf16>, vector<8x8xbf16>, vector<8x8xf32> -> vector<8x8xf32>
    %c8_69 = arith.constant 8 : index
    %c24_70 = arith.constant 24 : index
    %225 = vector.load %arg24[%c8_69, %c24_70] : memref<16x32xf32, #tpu.memory_space<vmem>>, vector<8x8xf32>
    tpu.vector_store %arg24[%c8_69, %c24_70], %224 {strides = array<i32>} : memref<16x32xf32, #tpu.memory_space<vmem>>, vector<8x8xf32>,
    %c0_71 = arith.constant 0 : index
    %c0_72 = arith.constant 0 : index
    %226 = vector.load %arg24[%c0_71, %c0_72] : memref<16x32xf32, #tpu.memory_space<vmem>>, vector<16x32xf32>
    %227 = arith.truncf %226 : vector<16x32xf32> to vector<16x32xbf16>
    %c0_73 = arith.constant 0 : index
    %c0_74 = arith.constant 0 : index
    %c0_75 = arith.constant 0 : index
    %228 = vector.load %arg8[%c0_73, %c0_74, %c0_75] : memref<2x32x32xbf16, #tpu.memory_space<vmem>>, vector<1x32x32xbf16>
    %229 = vector.shape_cast %228 : vector<1x32x32xbf16> to vector<32x32xbf16>
    %cst_76 = arith.constant dense<0.000000e+00> : vector<16x32xf32>
    %230 = tpu.matmul %227, %229, %cst_76 {dimension_numbers = #tpu.dot_dimension_numbers<[1], [0], [0], [1], [0, 0, 1, 1], [], []>} : vector<16x32xbf16>, vector<32x32xbf16>, vector<16x32xf32> -> vector<16x32xf32>
    %c0_77 = arith.constant 0 : index
    %c0_78 = arith.constant 0 : index
    %c0_79 = arith.constant 0 : index
    %231 = vector.load %arg9[%c0_77, %c0_78, %c0_79] : memref<2x1x32xf32, #tpu.memory_space<vmem>>, vector<1x1x32xf32>
    %232 = vector.shape_cast %231 : vector<1x1x32xf32> to vector<1x32xf32>
    %233 = vector.broadcast %232 : vector<1x32xf32> to vector<16x32xf32>
    %234 = arith.addf %230, %233 : vector<16x32xf32>
    %235 = arith.addf %234, %22 : vector<16x32xf32>
    %c0_80 = arith.constant 0 : index
    %c0_81 = arith.constant 0 : index
    %c0_82 = arith.constant 0 : index
    %236 = vector.load %arg10[%c0_80, %c0_81, %c0_82] : memref<2x1x32xf32, #tpu.memory_space<vmem>>, vector<1x1x32xf32>
    %237 = vector.shape_cast %236 : vector<1x1x32xf32> to vector<1x32xf32>
    %c0_83 = arith.constant 0 : index
    %c0_84 = arith.constant 0 : index
    %c0_85 = arith.constant 0 : index
    %238 = vector.load %arg11[%c0_83, %c0_84, %c0_85] : memref<2x1x32xf32, #tpu.memory_space<vmem>>, vector<1x1x32xf32>
    %239 = vector.shape_cast %238 : vector<1x1x32xf32> to vector<1x32xf32>
    %cst_86 = arith.constant dense<0.000000e+00> : vector<16xf32>
    %240 = vector.multi_reduction <add>, %235, %cst_86 [1] : vector<16x32xf32> to vector<16xf32>
    %241 = vector.shape_cast %240 : vector<16xf32> to vector<16x1xf32>
    %cst_87 = arith.constant 3.200000e+01 : f32
    %242 = vector.broadcast %cst_87 : f32 to vector<16x1xf32>
    %243 = arith.divf %241, %242 : vector<16x1xf32>
    %244 = vector.broadcast %243 : vector<16x1xf32> to vector<16x32xf32>
    %245 = arith.subf %235, %244 : vector<16x32xf32>
    %246 = arith.mulf %245, %245 : vector<16x32xf32>
    %cst_88 = arith.constant dense<0.000000e+00> : vector<16xf32>
    %247 = vector.multi_reduction <add>, %246, %cst_88 [1] : vector<16x32xf32> to vector<16xf32>
    %248 = vector.shape_cast %247 : vector<16xf32> to vector<16x1xf32>
    %cst_89 = arith.constant 3.200000e+01 : f32
    %249 = vector.broadcast %cst_89 : f32 to vector<16x1xf32>
    %250 = arith.divf %248, %249 : vector<16x1xf32>
    %cst_90 = arith.constant 9.99999996E-13 : f32
    %251 = vector.broadcast %cst_90 : f32 to vector<16x1xf32>
    %252 = arith.addf %250, %251 : vector<16x1xf32>
    %253 = math.rsqrt %252 : vector<16x1xf32>
    %254 = vector.broadcast %253 : vector<16x1xf32> to vector<16x32xf32>
    %255 = arith.mulf %245, %254 : vector<16x32xf32>
    %256 = vector.broadcast %237 : vector<1x32xf32> to vector<16x32xf32>
    %257 = arith.mulf %255, %256 : vector<16x32xf32>
    %258 = vector.broadcast %239 : vector<1x32xf32> to vector<16x32xf32>
    %259 = arith.addf %257, %258 : vector<16x32xf32>
    %260 = arith.truncf %259 : vector<16x32xf32> to vector<16x32xbf16>
    %c0_91 = arith.constant 0 : index
    %c0_92 = arith.constant 0 : index
    %c0_93 = arith.constant 0 : index
    %261 = vector.load %arg12[%c0_91, %c0_92, %c0_93] : memref<2x32x64xbf16, #tpu.memory_space<vmem>>, vector<1x32x64xbf16>
    %262 = vector.shape_cast %261 : vector<1x32x64xbf16> to vector<32x64xbf16>
    %cst_94 = arith.constant dense<0.000000e+00> : vector<16x64xf32>
    %263 = tpu.matmul %260, %262, %cst_94 {dimension_numbers = #tpu.dot_dimension_numbers<[1], [0], [0], [1], [0, 0, 1, 1], [], []>} : vector<16x32xbf16>, vector<32x64xbf16>, vector<16x64xf32> -> vector<16x64xf32>
    %c0_95 = arith.constant 0 : index
    %c0_96 = arith.constant 0 : index
    %c0_97 = arith.constant 0 : index
    %264 = vector.load %arg13[%c0_95, %c0_96, %c0_97] : memref<2x1x64xf32, #tpu.memory_space<vmem>>, vector<1x1x64xf32>
    %265 = vector.shape_cast %264 : vector<1x1x64xf32> to vector<1x64xf32>
    %266 = vector.broadcast %265 : vector<1x64xf32> to vector<16x64xf32>
    %267 = arith.addf %263, %266 : vector<16x64xf32>
    %cst_98 = arith.constant 5.000000e-01 : f32
    %268 = vector.broadcast %cst_98 : f32 to vector<16x64xf32>
    %269 = arith.mulf %268, %267 : vector<16x64xf32>
    %cst_99 = arith.constant 4.471500e-02 : f32
    %270 = vector.broadcast %cst_99 : f32 to vector<16x64xf32>
    %271 = arith.mulf %270, %267 : vector<16x64xf32>
    %272 = arith.mulf %271, %267 : vector<16x64xf32>
    %273 = arith.mulf %272, %267 : vector<16x64xf32>
    %274 = arith.addf %267, %273 : vector<16x64xf32>
    %cst_100 = arith.constant 0.797884583 : f32
    %275 = vector.broadcast %cst_100 : f32 to vector<16x64xf32>
    %276 = arith.mulf %275, %274 : vector<16x64xf32>
    %277 = math.tanh %276 : vector<16x64xf32>
    %cst_101 = arith.constant 1.000000e+00 : f32
    %278 = vector.broadcast %cst_101 : f32 to vector<16x64xf32>
    %279 = arith.addf %278, %277 : vector<16x64xf32>
    %280 = arith.mulf %269, %279 : vector<16x64xf32>
    %281 = arith.truncf %280 : vector<16x64xf32> to vector<16x64xbf16>
    %c0_102 = arith.constant 0 : index
    %c0_103 = arith.constant 0 : index
    %c0_104 = arith.constant 0 : index
    %282 = vector.load %arg14[%c0_102, %c0_103, %c0_104] : memref<2x64x32xbf16, #tpu.memory_space<vmem>>, vector<1x64x32xbf16>
    %283 = vector.shape_cast %282 : vector<1x64x32xbf16> to vector<64x32xbf16>
    %cst_105 = arith.constant dense<0.000000e+00> : vector<16x32xf32>
    %284 = tpu.matmul %281, %283, %cst_105 {dimension_numbers = #tpu.dot_dimension_numbers<[1], [0], [0], [1], [0, 0, 1, 1], [], []>} : vector<16x64xbf16>, vector<64x32xbf16>, vector<16x32xf32> -> vector<16x32xf32>
    %c0_106 = arith.constant 0 : index
    %c0_107 = arith.constant 0 : index
    %c0_108 = arith.constant 0 : index
    %285 = vector.load %arg15[%c0_106, %c0_107, %c0_108] : memref<2x1x32xf32, #tpu.memory_space<vmem>>, vector<1x1x32xf32>
    %286 = vector.shape_cast %285 : vector<1x1x32xf32> to vector<1x32xf32>
    %287 = vector.broadcast %286 : vector<1x32xf32> to vector<16x32xf32>
    %288 = arith.addf %284, %287 : vector<16x32xf32>
    %289 = arith.addf %288, %259 : vector<16x32xf32>
    %c0_109 = arith.constant 0 : index
    %c0_110 = arith.constant 0 : index
    %c0_111 = arith.constant 0 : index
    %290 = vector.load %arg16[%c0_109, %c0_110, %c0_111] : memref<2x1x32xf32, #tpu.memory_space<vmem>>, vector<1x1x32xf32>
    %291 = vector.shape_cast %290 : vector<1x1x32xf32> to vector<1x32xf32>
    %c0_112 = arith.constant 0 : index
    %c0_113 = arith.constant 0 : index
    %c0_114 = arith.constant 0 : index
    %292 = vector.load %arg17[%c0_112, %c0_113, %c0_114] : memref<2x1x32xf32, #tpu.memory_space<vmem>>, vector<1x1x32xf32>
    %293 = vector.shape_cast %292 : vector<1x1x32xf32> to vector<1x32xf32>
    %cst_115 = arith.constant dense<0.000000e+00> : vector<16xf32>
    %294 = vector.multi_reduction <add>, %289, %cst_115 [1] : vector<16x32xf32> to vector<16xf32>
    %295 = vector.shape_cast %294 : vector<16xf32> to vector<16x1xf32>
    %cst_116 = arith.constant 3.200000e+01 : f32
    %296 = vector.broadcast %cst_116 : f32 to vector<16x1xf32>
    %297 = arith.divf %295, %296 : vector<16x1xf32>
    %298 = vector.broadcast %297 : vector<16x1xf32> to vector<16x32xf32>
    %299 = arith.subf %289, %298 : vector<16x32xf32>
    %300 = arith.mulf %299, %299 : vector<16x32xf32>
    %cst_117 = arith.constant dense<0.000000e+00> : vector<16xf32>
    %301 = vector.multi_reduction <add>, %300, %cst_117 [1] : vector<16x32xf32> to vector<16xf32>
    %302 = vector.shape_cast %301 : vector<16xf32> to vector<16x1xf32>
    %cst_118 = arith.constant 3.200000e+01 : f32
    %303 = vector.broadcast %cst_118 : f32 to vector<16x1xf32>
    %304 = arith.divf %302, %303 : vector<16x1xf32>
    %cst_119 = arith.constant 9.99999996E-13 : f32
    %305 = vector.broadcast %cst_119 : f32 to vector<16x1xf32>
    %306 = arith.addf %304, %305 : vector<16x1xf32>
    %307 = math.rsqrt %306 : vector<16x1xf32>
    %308 = vector.broadcast %307 : vector<16x1xf32> to vector<16x32xf32>
    %309 = arith.mulf %299, %308 : vector<16x32xf32>
    %310 = vector.broadcast %291 : vector<1x32xf32> to vector<16x32xf32>
    %311 = arith.mulf %309, %310 : vector<16x32xf32>
    %312 = vector.broadcast %293 : vector<1x32xf32> to vector<16x32xf32>
    %313 = arith.addf %311, %312 : vector<16x32xf32>
    %314 = arith.truncf %313 : vector<16x32xf32> to vector<16x32xbf16>
    %c1 = arith.constant 1 : index
    %c0_120 = arith.constant 0 : index
    %c0_121 = arith.constant 0 : index
    %315 = vector.load %arg6[%c1, %c0_120, %c0_121] : memref<2x32x96xbf16, #tpu.memory_space<vmem>>, vector<1x32x96xbf16>
    %316 = vector.shape_cast %315 : vector<1x32x96xbf16> to vector<32x96xbf16>
    %cst_122 = arith.constant dense<0.000000e+00> : vector<16x96xf32>
    %317 = tpu.matmul %314, %316, %cst_122 {dimension_numbers = #tpu.dot_dimension_numbers<[1], [0], [0], [1], [0, 0, 1, 1], [], []>} : vector<16x32xbf16>, vector<32x96xbf16>, vector<16x96xf32> -> vector<16x96xf32>
    %c1_123 = arith.constant 1 : index
    %c0_124 = arith.constant 0 : index
    %c0_125 = arith.constant 0 : index
    %318 = vector.load %arg7[%c1_123, %c0_124, %c0_125] : memref<2x1x96xf32, #tpu.memory_space<vmem>>, vector<1x1x96xf32>
    %319 = vector.shape_cast %318 : vector<1x1x96xf32> to vector<1x96xf32>
    %320 = vector.broadcast %319 : vector<1x96xf32> to vector<16x96xf32>
    %321 = arith.addf %317, %320 : vector<16x96xf32>
    %322 = vector.extract_strided_slice %23 {offsets = [0, 0], sizes = [1, 8], strides = [1, 1]} : vector<2x8xf32> to vector<1x8xf32>
    %323 = vector.extract_strided_slice %321 {offsets = [0, 0], sizes = [8, 8], strides = [1, 1]} : vector<16x96xf32> to vector<8x8xf32>
    %324 = vector.extract_strided_slice %321 {offsets = [0, 32], sizes = [8, 8], strides = [1, 1]} : vector<16x96xf32> to vector<8x8xf32>
    %325 = vector.extract_strided_slice %321 {offsets = [0, 64], sizes = [8, 8], strides = [1, 1]} : vector<16x96xf32> to vector<8x8xf32>
    %326 = arith.truncf %323 : vector<8x8xf32> to vector<8x8xbf16>
    %327 = arith.truncf %324 : vector<8x8xf32> to vector<8x8xbf16>
    %cst_126 = arith.constant dense<0.000000e+00> : vector<8x8xf32>
    %328 = tpu.matmul %326, %327, %cst_126 {dimension_numbers = #tpu.dot_dimension_numbers<[1], [1], [0], [0], [0, 0, 1, 0], [], []>} : vector<8x8xbf16>, vector<8x8xbf16>, vector<8x8xf32> -> vector<8x8xf32>
    %cst_127 = arith.constant 0.353553385 : f32
    %329 = vector.broadcast %cst_127 : f32 to vector<8x8xf32>
    %330 = arith.mulf %328, %329 : vector<8x8xf32>
    %331 = vector.broadcast %322 : vector<1x8xf32> to vector<8x8xf32>
    %332 = arith.addf %330, %331 : vector<8x8xf32>
    %cst_128 = arith.constant dense<0xFF800000> : vector<8xf32>
    %333 = vector.multi_reduction <maximumf>, %332, %cst_128 [1] : vector<8x8xf32> to vector<8xf32>
    %334 = vector.shape_cast %333 : vector<8xf32> to vector<8x1xf32>
    %335 = vector.broadcast %334 : vector<8x1xf32> to vector<8x8xf32>
    %336 = arith.subf %332, %335 : vector<8x8xf32>
    %337 = math.exp %336 : vector<8x8xf32>
    %cst_129 = arith.constant dense<0.000000e+00> : vector<8xf32>
    %338 = vector.multi_reduction <add>, %337, %cst_129 [1] : vector<8x8xf32> to vector<8xf32>
    %339 = vector.shape_cast %338 : vector<8xf32> to vector<8x1xf32>
    %340 = tpu.reciprocal %339 {approx = true} : vector<8x1xf32> -> vector<8x1xf32>
    %341 = vector.broadcast %340 : vector<8x1xf32> to vector<8x8xf32>
    %342 = arith.mulf %337, %341 : vector<8x8xf32>
    %343 = arith.truncf %342 : vector<8x8xf32> to vector<8x8xbf16>
    %344 = arith.truncf %325 : vector<8x8xf32> to vector<8x8xbf16>
    %cst_130 = arith.constant dense<0.000000e+00> : vector<8x8xf32>
    %345 = tpu.matmul %343, %344, %cst_130 {dimension_numbers = #tpu.dot_dimension_numbers<[1], [0], [0], [1], [0, 0, 1, 1], [], []>} : vector<8x8xbf16>, vector<8x8xbf16>, vector<8x8xf32> -> vector<8x8xf32>
    %c0_131 = arith.constant 0 : index
    %c0_132 = arith.constant 0 : index
    %346 = vector.load %arg24[%c0_131, %c0_132] : memref<16x32xf32, #tpu.memory_space<vmem>>, vector<8x8xf32>
    tpu.vector_store %arg24[%c0_131, %c0_132], %345 {strides = array<i32>} : memref<16x32xf32, #tpu.memory_space<vmem>>, vector<8x8xf32>,
    %347 = vector.extract_strided_slice %321 {offsets = [0, 8], sizes = [8, 8], strides = [1, 1]} : vector<16x96xf32> to vector<8x8xf32>
    %348 = vector.extract_strided_slice %321 {offsets = [0, 40], sizes = [8, 8], strides = [1, 1]} : vector<16x96xf32> to vector<8x8xf32>
    %349 = vector.extract_strided_slice %321 {offsets = [0, 72], sizes = [8, 8], strides = [1, 1]} : vector<16x96xf32> to vector<8x8xf32>
    %350 = arith.truncf %347 : vector<8x8xf32> to vector<8x8xbf16>
    %351 = arith.truncf %348 : vector<8x8xf32> to vector<8x8xbf16>
    %cst_133 = arith.constant dense<0.000000e+00> : vector<8x8xf32>
    %352 = tpu.matmul %350, %351, %cst_133 {dimension_numbers = #tpu.dot_dimension_numbers<[1], [1], [0], [0], [0, 0, 1, 0], [], []>} : vector<8x8xbf16>, vector<8x8xbf16>, vector<8x8xf32> -> vector<8x8xf32>
    %cst_134 = arith.constant 0.353553385 : f32
    %353 = vector.broadcast %cst_134 : f32 to vector<8x8xf32>
    %354 = arith.mulf %352, %353 : vector<8x8xf32>
    %355 = vector.broadcast %322 : vector<1x8xf32> to vector<8x8xf32>
    %356 = arith.addf %354, %355 : vector<8x8xf32>
    %cst_135 = arith.constant dense<0xFF800000> : vector<8xf32>
    %357 = vector.multi_reduction <maximumf>, %356, %cst_135 [1] : vector<8x8xf32> to vector<8xf32>
    %358 = vector.shape_cast %357 : vector<8xf32> to vector<8x1xf32>
    %359 = vector.broadcast %358 : vector<8x1xf32> to vector<8x8xf32>
    %360 = arith.subf %356, %359 : vector<8x8xf32>
    %361 = math.exp %360 : vector<8x8xf32>
    %cst_136 = arith.constant dense<0.000000e+00> : vector<8xf32>
    %362 = vector.multi_reduction <add>, %361, %cst_136 [1] : vector<8x8xf32> to vector<8xf32>
    %363 = vector.shape_cast %362 : vector<8xf32> to vector<8x1xf32>
    %364 = tpu.reciprocal %363 {approx = true} : vector<8x1xf32> -> vector<8x1xf32>
    %365 = vector.broadcast %364 : vector<8x1xf32> to vector<8x8xf32>
    %366 = arith.mulf %361, %365 : vector<8x8xf32>
    %367 = arith.truncf %366 : vector<8x8xf32> to vector<8x8xbf16>
    %368 = arith.truncf %349 : vector<8x8xf32> to vector<8x8xbf16>
    %cst_137 = arith.constant dense<0.000000e+00> : vector<8x8xf32>
    %369 = tpu.matmul %367, %368, %cst_137 {dimension_numbers = #tpu.dot_dimension_numbers<[1], [0], [0], [1], [0, 0, 1, 1], [], []>} : vector<8x8xbf16>, vector<8x8xbf16>, vector<8x8xf32> -> vector<8x8xf32>
    %c0_138 = arith.constant 0 : index
    %c8_139 = arith.constant 8 : index
    %370 = vector.load %arg24[%c0_138, %c8_139] : memref<16x32xf32, #tpu.memory_space<vmem>>, vector<8x8xf32>
    tpu.vector_store %arg24[%c0_138, %c8_139], %369 {strides = array<i32>} : memref<16x32xf32, #tpu.memory_space<vmem>>, vector<8x8xf32>,
    %371 = vector.extract_strided_slice %321 {offsets = [0, 16], sizes = [8, 8], strides = [1, 1]} : vector<16x96xf32> to vector<8x8xf32>
    %372 = vector.extract_strided_slice %321 {offsets = [0, 48], sizes = [8, 8], strides = [1, 1]} : vector<16x96xf32> to vector<8x8xf32>
    %373 = vector.extract_strided_slice %321 {offsets = [0, 80], sizes = [8, 8], strides = [1, 1]} : vector<16x96xf32> to vector<8x8xf32>
    %374 = arith.truncf %371 : vector<8x8xf32> to vector<8x8xbf16>
    %375 = arith.truncf %372 : vector<8x8xf32> to vector<8x8xbf16>
    %cst_140 = arith.constant dense<0.000000e+00> : vector<8x8xf32>
    %376 = tpu.matmul %374, %375, %cst_140 {dimension_numbers = #tpu.dot_dimension_numbers<[1], [1], [0], [0], [0, 0, 1, 0], [], []>} : vector<8x8xbf16>, vector<8x8xbf16>, vector<8x8xf32> -> vector<8x8xf32>
    %cst_141 = arith.constant 0.353553385 : f32
    %377 = vector.broadcast %cst_141 : f32 to vector<8x8xf32>
    %378 = arith.mulf %376, %377 : vector<8x8xf32>
    %379 = vector.broadcast %322 : vector<1x8xf32> to vector<8x8xf32>
    %380 = arith.addf %378, %379 : vector<8x8xf32>
    %cst_142 = arith.constant dense<0xFF800000> : vector<8xf32>
    %381 = vector.multi_reduction <maximumf>, %380, %cst_142 [1] : vector<8x8xf32> to vector<8xf32>
    %382 = vector.shape_cast %381 : vector<8xf32> to vector<8x1xf32>
    %383 = vector.broadcast %382 : vector<8x1xf32> to vector<8x8xf32>
    %384 = arith.subf %380, %383 : vector<8x8xf32>
    %385 = math.exp %384 : vector<8x8xf32>
    %cst_143 = arith.constant dense<0.000000e+00> : vector<8xf32>
    %386 = vector.multi_reduction <add>, %385, %cst_143 [1] : vector<8x8xf32> to vector<8xf32>
    %387 = vector.shape_cast %386 : vector<8xf32> to vector<8x1xf32>
    %388 = tpu.reciprocal %387 {approx = true} : vector<8x1xf32> -> vector<8x1xf32>
    %389 = vector.broadcast %388 : vector<8x1xf32> to vector<8x8xf32>
    %390 = arith.mulf %385, %389 : vector<8x8xf32>
    %391 = arith.truncf %390 : vector<8x8xf32> to vector<8x8xbf16>
    %392 = arith.truncf %373 : vector<8x8xf32> to vector<8x8xbf16>
    %cst_144 = arith.constant dense<0.000000e+00> : vector<8x8xf32>
    %393 = tpu.matmul %391, %392, %cst_144 {dimension_numbers = #tpu.dot_dimension_numbers<[1], [0], [0], [1], [0, 0, 1, 1], [], []>} : vector<8x8xbf16>, vector<8x8xbf16>, vector<8x8xf32> -> vector<8x8xf32>
    %c0_145 = arith.constant 0 : index
    %c16_146 = arith.constant 16 : index
    %394 = vector.load %arg24[%c0_145, %c16_146] : memref<16x32xf32, #tpu.memory_space<vmem>>, vector<8x8xf32>
    tpu.vector_store %arg24[%c0_145, %c16_146], %393 {strides = array<i32>} : memref<16x32xf32, #tpu.memory_space<vmem>>, vector<8x8xf32>,
    %395 = vector.extract_strided_slice %321 {offsets = [0, 24], sizes = [8, 8], strides = [1, 1]} : vector<16x96xf32> to vector<8x8xf32>
    %396 = vector.extract_strided_slice %321 {offsets = [0, 56], sizes = [8, 8], strides = [1, 1]} : vector<16x96xf32> to vector<8x8xf32>
    %397 = vector.extract_strided_slice %321 {offsets = [0, 88], sizes = [8, 8], strides = [1, 1]} : vector<16x96xf32> to vector<8x8xf32>
    %398 = arith.truncf %395 : vector<8x8xf32> to vector<8x8xbf16>
    %399 = arith.truncf %396 : vector<8x8xf32> to vector<8x8xbf16>
    %cst_147 = arith.constant dense<0.000000e+00> : vector<8x8xf32>
    %400 = tpu.matmul %398, %399, %cst_147 {dimension_numbers = #tpu.dot_dimension_numbers<[1], [1], [0], [0], [0, 0, 1, 0], [], []>} : vector<8x8xbf16>, vector<8x8xbf16>, vector<8x8xf32> -> vector<8x8xf32>
    %cst_148 = arith.constant 0.353553385 : f32
    %401 = vector.broadcast %cst_148 : f32 to vector<8x8xf32>
    %402 = arith.mulf %400, %401 : vector<8x8xf32>
    %403 = vector.broadcast %322 : vector<1x8xf32> to vector<8x8xf32>
    %404 = arith.addf %402, %403 : vector<8x8xf32>
    %cst_149 = arith.constant dense<0xFF800000> : vector<8xf32>
    %405 = vector.multi_reduction <maximumf>, %404, %cst_149 [1] : vector<8x8xf32> to vector<8xf32>
    %406 = vector.shape_cast %405 : vector<8xf32> to vector<8x1xf32>
    %407 = vector.broadcast %406 : vector<8x1xf32> to vector<8x8xf32>
    %408 = arith.subf %404, %407 : vector<8x8xf32>
    %409 = math.exp %408 : vector<8x8xf32>
    %cst_150 = arith.constant dense<0.000000e+00> : vector<8xf32>
    %410 = vector.multi_reduction <add>, %409, %cst_150 [1] : vector<8x8xf32> to vector<8xf32>
    %411 = vector.shape_cast %410 : vector<8xf32> to vector<8x1xf32>
    %412 = tpu.reciprocal %411 {approx = true} : vector<8x1xf32> -> vector<8x1xf32>
    %413 = vector.broadcast %412 : vector<8x1xf32> to vector<8x8xf32>
    %414 = arith.mulf %409, %413 : vector<8x8xf32>
    %415 = arith.truncf %414 : vector<8x8xf32> to vector<8x8xbf16>
    %416 = arith.truncf %397 : vector<8x8xf32> to vector<8x8xbf16>
    %cst_151 = arith.constant dense<0.000000e+00> : vector<8x8xf32>
    %417 = tpu.matmul %415, %416, %cst_151 {dimension_numbers = #tpu.dot_dimension_numbers<[1], [0], [0], [1], [0, 0, 1, 1], [], []>} : vector<8x8xbf16>, vector<8x8xbf16>, vector<8x8xf32> -> vector<8x8xf32>
    %c0_152 = arith.constant 0 : index
    %c24_153 = arith.constant 24 : index
    %418 = vector.load %arg24[%c0_152, %c24_153] : memref<16x32xf32, #tpu.memory_space<vmem>>, vector<8x8xf32>
    tpu.vector_store %arg24[%c0_152, %c24_153], %417 {strides = array<i32>} : memref<16x32xf32, #tpu.memory_space<vmem>>, vector<8x8xf32>,
    %419 = vector.extract_strided_slice %23 {offsets = [1, 0], sizes = [1, 8], strides = [1, 1]} : vector<2x8xf32> to vector<1x8xf32>
    %420 = vector.extract_strided_slice %321 {offsets = [8, 0], sizes = [8, 8], strides = [1, 1]} : vector<16x96xf32> to vector<8x8xf32>
    %421 = vector.extract_strided_slice %321 {offsets = [8, 32], sizes = [8, 8], strides = [1, 1]} : vector<16x96xf32> to vector<8x8xf32>
    %422 = vector.extract_strided_slice %321 {offsets = [8, 64], sizes = [8, 8], strides = [1, 1]} : vector<16x96xf32> to vector<8x8xf32>
    %423 = arith.truncf %420 : vector<8x8xf32> to vector<8x8xbf16>
    %424 = arith.truncf %421 : vector<8x8xf32> to vector<8x8xbf16>
    %cst_154 = arith.constant dense<0.000000e+00> : vector<8x8xf32>
    %425 = tpu.matmul %423, %424, %cst_154 {dimension_numbers = #tpu.dot_dimension_numbers<[1], [1], [0], [0], [0, 0, 1, 0], [], []>} : vector<8x8xbf16>, vector<8x8xbf16>, vector<8x8xf32> -> vector<8x8xf32>
    %cst_155 = arith.constant 0.353553385 : f32
    %426 = vector.broadcast %cst_155 : f32 to vector<8x8xf32>
    %427 = arith.mulf %425, %426 : vector<8x8xf32>
    %428 = vector.broadcast %419 : vector<1x8xf32> to vector<8x8xf32>
    %429 = arith.addf %427, %428 : vector<8x8xf32>
    %cst_156 = arith.constant dense<0xFF800000> : vector<8xf32>
    %430 = vector.multi_reduction <maximumf>, %429, %cst_156 [1] : vector<8x8xf32> to vector<8xf32>
    %431 = vector.shape_cast %430 : vector<8xf32> to vector<8x1xf32>
    %432 = vector.broadcast %431 : vector<8x1xf32> to vector<8x8xf32>
    %433 = arith.subf %429, %432 : vector<8x8xf32>
    %434 = math.exp %433 : vector<8x8xf32>
    %cst_157 = arith.constant dense<0.000000e+00> : vector<8xf32>
    %435 = vector.multi_reduction <add>, %434, %cst_157 [1] : vector<8x8xf32> to vector<8xf32>
    %436 = vector.shape_cast %435 : vector<8xf32> to vector<8x1xf32>
    %437 = tpu.reciprocal %436 {approx = true} : vector<8x1xf32> -> vector<8x1xf32>
    %438 = vector.broadcast %437 : vector<8x1xf32> to vector<8x8xf32>
    %439 = arith.mulf %434, %438 : vector<8x8xf32>
    %440 = arith.truncf %439 : vector<8x8xf32> to vector<8x8xbf16>
    %441 = arith.truncf %422 : vector<8x8xf32> to vector<8x8xbf16>
    %cst_158 = arith.constant dense<0.000000e+00> : vector<8x8xf32>
    %442 = tpu.matmul %440, %441, %cst_158 {dimension_numbers = #tpu.dot_dimension_numbers<[1], [0], [0], [1], [0, 0, 1, 1], [], []>} : vector<8x8xbf16>, vector<8x8xbf16>, vector<8x8xf32> -> vector<8x8xf32>
    %c8_159 = arith.constant 8 : index
    %c0_160 = arith.constant 0 : index
    %443 = vector.load %arg24[%c8_159, %c0_160] : memref<16x32xf32, #tpu.memory_space<vmem>>, vector<8x8xf32>
    tpu.vector_store %arg24[%c8_159, %c0_160], %442 {strides = array<i32>} : memref<16x32xf32, #tpu.memory_space<vmem>>, vector<8x8xf32>,
    %444 = vector.extract_strided_slice %321 {offsets = [8, 8], sizes = [8, 8], strides = [1, 1]} : vector<16x96xf32> to vector<8x8xf32>
    %445 = vector.extract_strided_slice %321 {offsets = [8, 40], sizes = [8, 8], strides = [1, 1]} : vector<16x96xf32> to vector<8x8xf32>
    %446 = vector.extract_strided_slice %321 {offsets = [8, 72], sizes = [8, 8], strides = [1, 1]} : vector<16x96xf32> to vector<8x8xf32>
    %447 = arith.truncf %444 : vector<8x8xf32> to vector<8x8xbf16>
    %448 = arith.truncf %445 : vector<8x8xf32> to vector<8x8xbf16>
    %cst_161 = arith.constant dense<0.000000e+00> : vector<8x8xf32>
    %449 = tpu.matmul %447, %448, %cst_161 {dimension_numbers = #tpu.dot_dimension_numbers<[1], [1], [0], [0], [0, 0, 1, 0], [], []>} : vector<8x8xbf16>, vector<8x8xbf16>, vector<8x8xf32> -> vector<8x8xf32>
    %cst_162 = arith.constant 0.353553385 : f32
    %450 = vector.broadcast %cst_162 : f32 to vector<8x8xf32>
    %451 = arith.mulf %449, %450 : vector<8x8xf32>
    %452 = vector.broadcast %419 : vector<1x8xf32> to vector<8x8xf32>
    %453 = arith.addf %451, %452 : vector<8x8xf32>
    %cst_163 = arith.constant dense<0xFF800000> : vector<8xf32>
    %454 = vector.multi_reduction <maximumf>, %453, %cst_163 [1] : vector<8x8xf32> to vector<8xf32>
    %455 = vector.shape_cast %454 : vector<8xf32> to vector<8x1xf32>
    %456 = vector.broadcast %455 : vector<8x1xf32> to vector<8x8xf32>
    %457 = arith.subf %453, %456 : vector<8x8xf32>
    %458 = math.exp %457 : vector<8x8xf32>
    %cst_164 = arith.constant dense<0.000000e+00> : vector<8xf32>
    %459 = vector.multi_reduction <add>, %458, %cst_164 [1] : vector<8x8xf32> to vector<8xf32>
    %460 = vector.shape_cast %459 : vector<8xf32> to vector<8x1xf32>
    %461 = tpu.reciprocal %460 {approx = true} : vector<8x1xf32> -> vector<8x1xf32>
    %462 = vector.broadcast %461 : vector<8x1xf32> to vector<8x8xf32>
    %463 = arith.mulf %458, %462 : vector<8x8xf32>
    %464 = arith.truncf %463 : vector<8x8xf32> to vector<8x8xbf16>
    %465 = arith.truncf %446 : vector<8x8xf32> to vector<8x8xbf16>
    %cst_165 = arith.constant dense<0.000000e+00> : vector<8x8xf32>
    %466 = tpu.matmul %464, %465, %cst_165 {dimension_numbers = #tpu.dot_dimension_numbers<[1], [0], [0], [1], [0, 0, 1, 1], [], []>} : vector<8x8xbf16>, vector<8x8xbf16>, vector<8x8xf32> -> vector<8x8xf32>
    %c8_166 = arith.constant 8 : index
    %c8_167 = arith.constant 8 : index
    %467 = vector.load %arg24[%c8_166, %c8_167] : memref<16x32xf32, #tpu.memory_space<vmem>>, vector<8x8xf32>
    tpu.vector_store %arg24[%c8_166, %c8_167], %466 {strides = array<i32>} : memref<16x32xf32, #tpu.memory_space<vmem>>, vector<8x8xf32>,
    %468 = vector.extract_strided_slice %321 {offsets = [8, 16], sizes = [8, 8], strides = [1, 1]} : vector<16x96xf32> to vector<8x8xf32>
    %469 = vector.extract_strided_slice %321 {offsets = [8, 48], sizes = [8, 8], strides = [1, 1]} : vector<16x96xf32> to vector<8x8xf32>
    %470 = vector.extract_strided_slice %321 {offsets = [8, 80], sizes = [8, 8], strides = [1, 1]} : vector<16x96xf32> to vector<8x8xf32>
    %471 = arith.truncf %468 : vector<8x8xf32> to vector<8x8xbf16>
    %472 = arith.truncf %469 : vector<8x8xf32> to vector<8x8xbf16>
    %cst_168 = arith.constant dense<0.000000e+00> : vector<8x8xf32>
    %473 = tpu.matmul %471, %472, %cst_168 {dimension_numbers = #tpu.dot_dimension_numbers<[1], [1], [0], [0], [0, 0, 1, 0], [], []>} : vector<8x8xbf16>, vector<8x8xbf16>, vector<8x8xf32> -> vector<8x8xf32>
    %cst_169 = arith.constant 0.353553385 : f32
    %474 = vector.broadcast %cst_169 : f32 to vector<8x8xf32>
    %475 = arith.mulf %473, %474 : vector<8x8xf32>
    %476 = vector.broadcast %419 : vector<1x8xf32> to vector<8x8xf32>
    %477 = arith.addf %475, %476 : vector<8x8xf32>
    %cst_170 = arith.constant dense<0xFF800000> : vector<8xf32>
    %478 = vector.multi_reduction <maximumf>, %477, %cst_170 [1] : vector<8x8xf32> to vector<8xf32>
    %479 = vector.shape_cast %478 : vector<8xf32> to vector<8x1xf32>
    %480 = vector.broadcast %479 : vector<8x1xf32> to vector<8x8xf32>
    %481 = arith.subf %477, %480 : vector<8x8xf32>
    %482 = math.exp %481 : vector<8x8xf32>
    %cst_171 = arith.constant dense<0.000000e+00> : vector<8xf32>
    %483 = vector.multi_reduction <add>, %482, %cst_171 [1] : vector<8x8xf32> to vector<8xf32>
    %484 = vector.shape_cast %483 : vector<8xf32> to vector<8x1xf32>
    %485 = tpu.reciprocal %484 {approx = true} : vector<8x1xf32> -> vector<8x1xf32>
    %486 = vector.broadcast %485 : vector<8x1xf32> to vector<8x8xf32>
    %487 = arith.mulf %482, %486 : vector<8x8xf32>
    %488 = arith.truncf %487 : vector<8x8xf32> to vector<8x8xbf16>
    %489 = arith.truncf %470 : vector<8x8xf32> to vector<8x8xbf16>
    %cst_172 = arith.constant dense<0.000000e+00> : vector<8x8xf32>
    %490 = tpu.matmul %488, %489, %cst_172 {dimension_numbers = #tpu.dot_dimension_numbers<[1], [0], [0], [1], [0, 0, 1, 1], [], []>} : vector<8x8xbf16>, vector<8x8xbf16>, vector<8x8xf32> -> vector<8x8xf32>
    %c8_173 = arith.constant 8 : index
    %c16_174 = arith.constant 16 : index
    %491 = vector.load %arg24[%c8_173, %c16_174] : memref<16x32xf32, #tpu.memory_space<vmem>>, vector<8x8xf32>
    tpu.vector_store %arg24[%c8_173, %c16_174], %490 {strides = array<i32>} : memref<16x32xf32, #tpu.memory_space<vmem>>, vector<8x8xf32>,
    %492 = vector.extract_strided_slice %321 {offsets = [8, 24], sizes = [8, 8], strides = [1, 1]} : vector<16x96xf32> to vector<8x8xf32>
    %493 = vector.extract_strided_slice %321 {offsets = [8, 56], sizes = [8, 8], strides = [1, 1]} : vector<16x96xf32> to vector<8x8xf32>
    %494 = vector.extract_strided_slice %321 {offsets = [8, 88], sizes = [8, 8], strides = [1, 1]} : vector<16x96xf32> to vector<8x8xf32>
    %495 = arith.truncf %492 : vector<8x8xf32> to vector<8x8xbf16>
    %496 = arith.truncf %493 : vector<8x8xf32> to vector<8x8xbf16>
    %cst_175 = arith.constant dense<0.000000e+00> : vector<8x8xf32>
    %497 = tpu.matmul %495, %496, %cst_175 {dimension_numbers = #tpu.dot_dimension_numbers<[1], [1], [0], [0], [0, 0, 1, 0], [], []>} : vector<8x8xbf16>, vector<8x8xbf16>, vector<8x8xf32> -> vector<8x8xf32>
    %cst_176 = arith.constant 0.353553385 : f32
    %498 = vector.broadcast %cst_176 : f32 to vector<8x8xf32>
    %499 = arith.mulf %497, %498 : vector<8x8xf32>
    %500 = vector.broadcast %419 : vector<1x8xf32> to vector<8x8xf32>
    %501 = arith.addf %499, %500 : vector<8x8xf32>
    %cst_177 = arith.constant dense<0xFF800000> : vector<8xf32>
    %502 = vector.multi_reduction <maximumf>, %501, %cst_177 [1] : vector<8x8xf32> to vector<8xf32>
    %503 = vector.shape_cast %502 : vector<8xf32> to vector<8x1xf32>
    %504 = vector.broadcast %503 : vector<8x1xf32> to vector<8x8xf32>
    %505 = arith.subf %501, %504 : vector<8x8xf32>
    %506 = math.exp %505 : vector<8x8xf32>
    %cst_178 = arith.constant dense<0.000000e+00> : vector<8xf32>
    %507 = vector.multi_reduction <add>, %506, %cst_178 [1] : vector<8x8xf32> to vector<8xf32>
    %508 = vector.shape_cast %507 : vector<8xf32> to vector<8x1xf32>
    %509 = tpu.reciprocal %508 {approx = true} : vector<8x1xf32> -> vector<8x1xf32>
    %510 = vector.broadcast %509 : vector<8x1xf32> to vector<8x8xf32>
    %511 = arith.mulf %506, %510 : vector<8x8xf32>
    %512 = arith.truncf %511 : vector<8x8xf32> to vector<8x8xbf16>
    %513 = arith.truncf %494 : vector<8x8xf32> to vector<8x8xbf16>
    %cst_179 = arith.constant dense<0.000000e+00> : vector<8x8xf32>
    %514 = tpu.matmul %512, %513, %cst_179 {dimension_numbers = #tpu.dot_dimension_numbers<[1], [0], [0], [1], [0, 0, 1, 1], [], []>} : vector<8x8xbf16>, vector<8x8xbf16>, vector<8x8xf32> -> vector<8x8xf32>
    %c8_180 = arith.constant 8 : index
    %c24_181 = arith.constant 24 : index
    %515 = vector.load %arg24[%c8_180, %c24_181] : memref<16x32xf32, #tpu.memory_space<vmem>>, vector<8x8xf32>
    tpu.vector_store %arg24[%c8_180, %c24_181], %514 {strides = array<i32>} : memref<16x32xf32, #tpu.memory_space<vmem>>, vector<8x8xf32>,
    %c0_182 = arith.constant 0 : index
    %c0_183 = arith.constant 0 : index
    %516 = vector.load %arg24[%c0_182, %c0_183] : memref<16x32xf32, #tpu.memory_space<vmem>>, vector<16x32xf32>
    %517 = arith.truncf %516 : vector<16x32xf32> to vector<16x32xbf16>
    %c1_184 = arith.constant 1 : index
    %c0_185 = arith.constant 0 : index
    %c0_186 = arith.constant 0 : index
    %518 = vector.load %arg8[%c1_184, %c0_185, %c0_186] : memref<2x32x32xbf16, #tpu.memory_space<vmem>>, vector<1x32x32xbf16>
    %519 = vector.shape_cast %518 : vector<1x32x32xbf16> to vector<32x32xbf16>
    %cst_187 = arith.constant dense<0.000000e+00> : vector<16x32xf32>
    %520 = tpu.matmul %517, %519, %cst_187 {dimension_numbers = #tpu.dot_dimension_numbers<[1], [0], [0], [1], [0, 0, 1, 1], [], []>} : vector<16x32xbf16>, vector<32x32xbf16>, vector<16x32xf32> -> vector<16x32xf32>
    %c1_188 = arith.constant 1 : index
    %c0_189 = arith.constant 0 : index
    %c0_190 = arith.constant 0 : index
    %521 = vector.load %arg9[%c1_188, %c0_189, %c0_190] : memref<2x1x32xf32, #tpu.memory_space<vmem>>, vector<1x1x32xf32>
    %522 = vector.shape_cast %521 : vector<1x1x32xf32> to vector<1x32xf32>
    %523 = vector.broadcast %522 : vector<1x32xf32> to vector<16x32xf32>
    %524 = arith.addf %520, %523 : vector<16x32xf32>
    %525 = arith.addf %524, %313 : vector<16x32xf32>
    %c1_191 = arith.constant 1 : index
    %c0_192 = arith.constant 0 : index
    %c0_193 = arith.constant 0 : index
    %526 = vector.load %arg10[%c1_191, %c0_192, %c0_193] : memref<2x1x32xf32, #tpu.memory_space<vmem>>, vector<1x1x32xf32>
    %527 = vector.shape_cast %526 : vector<1x1x32xf32> to vector<1x32xf32>
    %c1_194 = arith.constant 1 : index
    %c0_195 = arith.constant 0 : index
    %c0_196 = arith.constant 0 : index
    %528 = vector.load %arg11[%c1_194, %c0_195, %c0_196] : memref<2x1x32xf32, #tpu.memory_space<vmem>>, vector<1x1x32xf32>
    %529 = vector.shape_cast %528 : vector<1x1x32xf32> to vector<1x32xf32>
    %cst_197 = arith.constant dense<0.000000e+00> : vector<16xf32>
    %530 = vector.multi_reduction <add>, %525, %cst_197 [1] : vector<16x32xf32> to vector<16xf32>
    %531 = vector.shape_cast %530 : vector<16xf32> to vector<16x1xf32>
    %cst_198 = arith.constant 3.200000e+01 : f32
    %532 = vector.broadcast %cst_198 : f32 to vector<16x1xf32>
    %533 = arith.divf %531, %532 : vector<16x1xf32>
    %534 = vector.broadcast %533 : vector<16x1xf32> to vector<16x32xf32>
    %535 = arith.subf %525, %534 : vector<16x32xf32>
    %536 = arith.mulf %535, %535 : vector<16x32xf32>
    %cst_199 = arith.constant dense<0.000000e+00> : vector<16xf32>
    %537 = vector.multi_reduction <add>, %536, %cst_199 [1] : vector<16x32xf32> to vector<16xf32>
    %538 = vector.shape_cast %537 : vector<16xf32> to vector<16x1xf32>
    %cst_200 = arith.constant 3.200000e+01 : f32
    %539 = vector.broadcast %cst_200 : f32 to vector<16x1xf32>
    %540 = arith.divf %538, %539 : vector<16x1xf32>
    %cst_201 = arith.constant 9.99999996E-13 : f32
    %541 = vector.broadcast %cst_201 : f32 to vector<16x1xf32>
    %542 = arith.addf %540, %541 : vector<16x1xf32>
    %543 = math.rsqrt %542 : vector<16x1xf32>
    %544 = vector.broadcast %543 : vector<16x1xf32> to vector<16x32xf32>
    %545 = arith.mulf %535, %544 : vector<16x32xf32>
    %546 = vector.broadcast %527 : vector<1x32xf32> to vector<16x32xf32>
    %547 = arith.mulf %545, %546 : vector<16x32xf32>
    %548 = vector.broadcast %529 : vector<1x32xf32> to vector<16x32xf32>
    %549 = arith.addf %547, %548 : vector<16x32xf32>
    %550 = arith.truncf %549 : vector<16x32xf32> to vector<16x32xbf16>
    %c1_202 = arith.constant 1 : index
    %c0_203 = arith.constant 0 : index
    %c0_204 = arith.constant 0 : index
    %551 = vector.load %arg12[%c1_202, %c0_203, %c0_204] : memref<2x32x64xbf16, #tpu.memory_space<vmem>>, vector<1x32x64xbf16>
    %552 = vector.shape_cast %551 : vector<1x32x64xbf16> to vector<32x64xbf16>
    %cst_205 = arith.constant dense<0.000000e+00> : vector<16x64xf32>
    %553 = tpu.matmul %550, %552, %cst_205 {dimension_numbers = #tpu.dot_dimension_numbers<[1], [0], [0], [1], [0, 0, 1, 1], [], []>} : vector<16x32xbf16>, vector<32x64xbf16>, vector<16x64xf32> -> vector<16x64xf32>
    %c1_206 = arith.constant 1 : index
    %c0_207 = arith.constant 0 : index
    %c0_208 = arith.constant 0 : index
    %554 = vector.load %arg13[%c1_206, %c0_207, %c0_208] : memref<2x1x64xf32, #tpu.memory_space<vmem>>, vector<1x1x64xf32>
    %555 = vector.shape_cast %554 : vector<1x1x64xf32> to vector<1x64xf32>
    %556 = vector.broadcast %555 : vector<1x64xf32> to vector<16x64xf32>
    %557 = arith.addf %553, %556 : vector<16x64xf32>
    %cst_209 = arith.constant 5.000000e-01 : f32
    %558 = vector.broadcast %cst_209 : f32 to vector<16x64xf32>
    %559 = arith.mulf %558, %557 : vector<16x64xf32>
    %cst_210 = arith.constant 4.471500e-02 : f32
    %560 = vector.broadcast %cst_210 : f32 to vector<16x64xf32>
    %561 = arith.mulf %560, %557 : vector<16x64xf32>
    %562 = arith.mulf %561, %557 : vector<16x64xf32>
    %563 = arith.mulf %562, %557 : vector<16x64xf32>
    %564 = arith.addf %557, %563 : vector<16x64xf32>
    %cst_211 = arith.constant 0.797884583 : f32
    %565 = vector.broadcast %cst_211 : f32 to vector<16x64xf32>
    %566 = arith.mulf %565, %564 : vector<16x64xf32>
    %567 = math.tanh %566 : vector<16x64xf32>
    %cst_212 = arith.constant 1.000000e+00 : f32
    %568 = vector.broadcast %cst_212 : f32 to vector<16x64xf32>
    %569 = arith.addf %568, %567 : vector<16x64xf32>
    %570 = arith.mulf %559, %569 : vector<16x64xf32>
    %571 = arith.truncf %570 : vector<16x64xf32> to vector<16x64xbf16>
    %c1_213 = arith.constant 1 : index
    %c0_214 = arith.constant 0 : index
    %c0_215 = arith.constant 0 : index
    %572 = vector.load %arg14[%c1_213, %c0_214, %c0_215] : memref<2x64x32xbf16, #tpu.memory_space<vmem>>, vector<1x64x32xbf16>
    %573 = vector.shape_cast %572 : vector<1x64x32xbf16> to vector<64x32xbf16>
    %cst_216 = arith.constant dense<0.000000e+00> : vector<16x32xf32>
    %574 = tpu.matmul %571, %573, %cst_216 {dimension_numbers = #tpu.dot_dimension_numbers<[1], [0], [0], [1], [0, 0, 1, 1], [], []>} : vector<16x64xbf16>, vector<64x32xbf16>, vector<16x32xf32> -> vector<16x32xf32>
    %c1_217 = arith.constant 1 : index
    %c0_218 = arith.constant 0 : index
    %c0_219 = arith.constant 0 : index
    %575 = vector.load %arg15[%c1_217, %c0_218, %c0_219] : memref<2x1x32xf32, #tpu.memory_space<vmem>>, vector<1x1x32xf32>
    %576 = vector.shape_cast %575 : vector<1x1x32xf32> to vector<1x32xf32>
    %577 = vector.broadcast %576 : vector<1x32xf32> to vector<16x32xf32>
    %578 = arith.addf %574, %577 : vector<16x32xf32>
    %579 = arith.addf %578, %549 : vector<16x32xf32>
    %c1_220 = arith.constant 1 : index
    %c0_221 = arith.constant 0 : index
    %c0_222 = arith.constant 0 : index
    %580 = vector.load %arg16[%c1_220, %c0_221, %c0_222] : memref<2x1x32xf32, #tpu.memory_space<vmem>>, vector<1x1x32xf32>
    %581 = vector.shape_cast %580 : vector<1x1x32xf32> to vector<1x32xf32>
    %c1_223 = arith.constant 1 : index
    %c0_224 = arith.constant 0 : index
    %c0_225 = arith.constant 0 : index
    %582 = vector.load %arg17[%c1_223, %c0_224, %c0_225] : memref<2x1x32xf32, #tpu.memory_space<vmem>>, vector<1x1x32xf32>
    %583 = vector.shape_cast %582 : vector<1x1x32xf32> to vector<1x32xf32>
    %cst_226 = arith.constant dense<0.000000e+00> : vector<16xf32>
    %584 = vector.multi_reduction <add>, %579, %cst_226 [1] : vector<16x32xf32> to vector<16xf32>
    %585 = vector.shape_cast %584 : vector<16xf32> to vector<16x1xf32>
    %cst_227 = arith.constant 3.200000e+01 : f32
    %586 = vector.broadcast %cst_227 : f32 to vector<16x1xf32>
    %587 = arith.divf %585, %586 : vector<16x1xf32>
    %588 = vector.broadcast %587 : vector<16x1xf32> to vector<16x32xf32>
    %589 = arith.subf %579, %588 : vector<16x32xf32>
    %590 = arith.mulf %589, %589 : vector<16x32xf32>
    %cst_228 = arith.constant dense<0.000000e+00> : vector<16xf32>
    %591 = vector.multi_reduction <add>, %590, %cst_228 [1] : vector<16x32xf32> to vector<16xf32>
    %592 = vector.shape_cast %591 : vector<16xf32> to vector<16x1xf32>
    %cst_229 = arith.constant 3.200000e+01 : f32
    %593 = vector.broadcast %cst_229 : f32 to vector<16x1xf32>
    %594 = arith.divf %592, %593 : vector<16x1xf32>
    %cst_230 = arith.constant 9.99999996E-13 : f32
    %595 = vector.broadcast %cst_230 : f32 to vector<16x1xf32>
    %596 = arith.addf %594, %595 : vector<16x1xf32>
    %597 = math.rsqrt %596 : vector<16x1xf32>
    %598 = vector.broadcast %597 : vector<16x1xf32> to vector<16x32xf32>
    %599 = arith.mulf %589, %598 : vector<16x32xf32>
    %600 = vector.broadcast %581 : vector<1x32xf32> to vector<16x32xf32>
    %601 = arith.mulf %599, %600 : vector<16x32xf32>
    %602 = vector.broadcast %583 : vector<1x32xf32> to vector<16x32xf32>
    %603 = arith.addf %601, %602 : vector<16x32xf32>
    %604 = vector.extract_strided_slice %603 {offsets = [0, 0], sizes = [1, 32], strides = [1, 1]} : vector<16x32xf32> to vector<1x32xf32>
    %c0_231 = arith.constant 0 : index
    %c0_232 = arith.constant 0 : index
    %605 = vector.load %arg25[%c0_231, %c0_232] : memref<2x32xf32, #tpu.memory_space<vmem>>, vector<1x32xf32>
    tpu.vector_store %arg25[%c0_231, %c0_232], %604 {strides = array<i32>} : memref<2x32xf32, #tpu.memory_space<vmem>>, vector<1x32xf32>,
    %606 = vector.extract_strided_slice %603 {offsets = [8, 0], sizes = [1, 32], strides = [1, 1]} : vector<16x32xf32> to vector<1x32xf32>
    %c1_233 = arith.constant 1 : index
    %c0_234 = arith.constant 0 : index
    %607 = vector.load %arg25[%c1_233, %c0_234] : memref<2x32xf32, #tpu.memory_space<vmem>>, vector<1x32xf32>
    tpu.vector_store %arg25[%c1_233, %c0_234], %606 {strides = array<i32>} : memref<2x32xf32, #tpu.memory_space<vmem>>, vector<1x32xf32>,
    %c0_235 = arith.constant 0 : index
    %c0_236 = arith.constant 0 : index
    %608 = vector.load %arg25[%c0_235, %c0_236] : memref<2x32xf32, #tpu.memory_space<vmem>>, vector<2x32xf32>
    %c0_237 = arith.constant 0 : index
    %c0_238 = arith.constant 0 : index
    %609 = vector.load %arg18[%c0_237, %c0_238] : memref<32x32xf32, #tpu.memory_space<vmem>>, vector<32x32xf32>
    %cst_239 = arith.constant dense<0.000000e+00> : vector<2x32xf32>
    %610 = tpu.matmul %608, %609, %cst_239 {dimension_numbers = #tpu.dot_dimension_numbers<[1], [0], [0], [1], [0, 0, 1, 1], [], []>} : vector<2x32xf32>, vector<32x32xf32>, vector<2x32xf32> -> vector<2x32xf32>
    %c0_240 = arith.constant 0 : index
    %c0_241 = arith.constant 0 : index
    %611 = vector.load %arg19[%c0_240, %c0_241] : memref<1x32xf32, #tpu.memory_space<vmem>>, vector<1x32xf32>
    %612 = vector.broadcast %611 : vector<1x32xf32> to vector<2x32xf32>
    %613 = arith.addf %610, %612 : vector<2x32xf32>
    %614 = math.tanh %613 : vector<2x32xf32>
    %c0_242 = arith.constant 0 : index
    %c0_243 = arith.constant 0 : index
    %615 = vector.load %arg20[%c0_242, %c0_243] : memref<32x32xf32, #tpu.memory_space<vmem>>, vector<32x32xf32>
    %cst_244 = arith.constant dense<0.000000e+00> : vector<2x32xf32>
    %616 = tpu.matmul %614, %615, %cst_244 {dimension_numbers = #tpu.dot_dimension_numbers<[1], [0], [0], [1], [0, 0, 1, 1], [], []>} : vector<2x32xf32>, vector<32x32xf32>, vector<2x32xf32> -> vector<2x32xf32>
    %c0_245 = arith.constant 0 : index
    %c0_246 = arith.constant 0 : index
    %617 = vector.load %arg21[%c0_245, %c0_246] : memref<1x32xf32, #tpu.memory_space<vmem>>, vector<1x32xf32>
    %618 = vector.broadcast %617 : vector<1x32xf32> to vector<2x32xf32>
    %619 = arith.addf %616, %618 : vector<2x32xf32>
    %c0_247 = arith.constant 0 : index
    %c0_248 = arith.constant 0 : index
    %620 = vector.load %arg3[%c0_247, %c0_248] : memref<6x32xf32, #tpu.memory_space<vmem>>, vector<6x32xf32>
    %621 = arith.mulf %619, %619 : vector<2x32xf32>
    %cst_249 = arith.constant dense<0.000000e+00> : vector<2xf32>
    %622 = vector.multi_reduction <add>, %621, %cst_249 [1] : vector<2x32xf32> to vector<2xf32>
    %623 = vector.shape_cast %622 : vector<2xf32> to vector<2x1xf32>
    %cst_250 = arith.constant 9.99999996E-13 : f32
    %624 = vector.broadcast %cst_250 : f32 to vector<2x1xf32>
    %625 = arith.addf %623, %624 : vector<2x1xf32>
    %626 = math.rsqrt %625 : vector<2x1xf32>
    %627 = vector.broadcast %626 : vector<2x1xf32> to vector<2x32xf32>
    %628 = arith.mulf %619, %627 : vector<2x32xf32>
    %629 = arith.mulf %620, %620 : vector<6x32xf32>
    %cst_251 = arith.constant dense<0.000000e+00> : vector<6xf32>
    %630 = vector.multi_reduction <add>, %629, %cst_251 [1] : vector<6x32xf32> to vector<6xf32>
    %631 = vector.shape_cast %630 : vector<6xf32> to vector<6x1xf32>
    %cst_252 = arith.constant 9.99999996E-13 : f32
    %632 = vector.broadcast %cst_252 : f32 to vector<6x1xf32>
    %633 = arith.addf %631, %632 : vector<6x1xf32>
    %634 = math.rsqrt %633 : vector<6x1xf32>
    %635 = vector.broadcast %634 : vector<6x1xf32> to vector<6x32xf32>
    %636 = arith.mulf %620, %635 : vector<6x32xf32>
    %cst_253 = arith.constant dense<0.000000e+00> : vector<2x6xf32>
    %637 = tpu.matmul %628, %636, %cst_253 {dimension_numbers = #tpu.dot_dimension_numbers<[1], [1], [0], [0], [0, 0, 1, 0], [], []>} : vector<2x32xf32>, vector<6x32xf32>, vector<2x6xf32> -> vector<2x6xf32>
    %cst_254 = arith.constant 1.000000e+01 : f32
    %638 = vector.broadcast %cst_254 : f32 to vector<2x6xf32>
    %639 = arith.mulf %638, %637 : vector<2x6xf32>
    %cst_255 = arith.constant dense<0xFF800000> : vector<2xf32>
    %640 = vector.multi_reduction <maximumf>, %639, %cst_255 [1] : vector<2x6xf32> to vector<2xf32>
    %641 = vector.shape_cast %640 : vector<2xf32> to vector<2x1xf32>
    %642 = vector.broadcast %641 : vector<2x1xf32> to vector<2x6xf32>
    %643 = arith.subf %639, %642 : vector<2x6xf32>
    %644 = math.exp %643 : vector<2x6xf32>
    %cst_256 = arith.constant dense<0.000000e+00> : vector<2xf32>
    %645 = vector.multi_reduction <add>, %644, %cst_256 [1] : vector<2x6xf32> to vector<2xf32>
    %646 = vector.shape_cast %645 : vector<2xf32> to vector<2x1xf32>
    %647 = math.log %646 : vector<2x1xf32>
    %648 = arith.addf %641, %647 : vector<2x1xf32>
    %c0_257 = arith.constant 0 : index
    %c0_258 = arith.constant 0 : index
    %649 = vector.load %arg2[%c0_257, %c0_258] : memref<2x1xi32, #tpu.memory_space<vmem>>, vector<2x1xi32>
    %650 = tpu.iota {dimensions = array<i32: 1>} : vector<2x6xi32>
    %651 = vector.broadcast %649 : vector<2x1xi32> to vector<2x6xi32>
    %652 = arith.cmpi eq, %650, %651 : vector<2x6xi32>
    %653 = arith.extui %652 : vector<2x6xi1> to vector<2x6xi32>
    %654 = arith.sitofp %653 : vector<2x6xi32> to vector<2x6xf32>
    %655 = arith.mulf %654, %639 : vector<2x6xf32>
    %cst_259 = arith.constant dense<0.000000e+00> : vector<2xf32>
    %656 = vector.multi_reduction <add>, %655, %cst_259 [1] : vector<2x6xf32> to vector<2xf32>
    %657 = vector.shape_cast %656 : vector<2xf32> to vector<2x1xf32>
    %658 = arith.subf %648, %657 : vector<2x1xf32>
    %cst_260 = arith.constant dense<0.000000e+00> : vector<1xf32>
    %659 = vector.multi_reduction <add>, %658, %cst_260 [0] : vector<2x1xf32> to vector<1xf32>
    %660 = vector.shape_cast %659 : vector<1xf32> to vector<1x1xf32>
    %cst_261 = arith.constant 2.000000e+00 : f32
    %661 = vector.broadcast %cst_261 : f32 to vector<1x1xf32>
    %662 = arith.divf %660, %661 : vector<1x1xf32>
    %c0_262 = arith.constant 0 : index
    %c0_263 = arith.constant 0 : index
    %663 = vector.load %arg22[%c0_262, %c0_263] : memref<1x1xf32, #tpu.memory_space<vmem>>, vector<1x1xf32>
    tpu.vector_store %arg22[%c0_262, %c0_263], %662 {strides = array<i32>} : memref<1x1xf32, #tpu.memory_space<vmem>>, vector<1x1xf32>,
    %c0_264 = arith.constant 0 : index
    %c0_265 = arith.constant 0 : index
    %664 = vector.load %arg23[%c0_264, %c0_265] : memref<2x6xf32, #tpu.memory_space<vmem>>, vector<2x6xf32>
    tpu.vector_store %arg23[%c0_264, %c0_265], %639 {strides = array<i32>} : memref<2x6xf32, #tpu.memory_space<vmem>>, vector<2x6xf32>,
    return
  }
}

</mosaic_0001>

<bundles_post_ra>
// kernel: tpu_custom_call.1
= control target key start
LH: loop header
LB: loop body
LE: loop exit
PB: predicated region body
PF: predicated region fallthrough
CT: control target
= control target key end

     0   :  { %s5309_s0 = inlined_call_operand.hbm [shape: f32[16,32], index: 0, kind: input, shape index: {}]   ;;  %s5310_s1 = inlined_call_operand.hbm [shape: f32[2,8], index: 1, kind: input, shape index: {}]   ;;  %s5311_s2 = inlined_call_operand.vmem [shape: s32[2,1], index: 2, kind: input, shape index: {}]   ;;  %s5312_s3 = inlined_call_operand.hbm [shape: f32[6,32], index: 3, kind: input, shape index: {}]   ;;  %s5313_s4 = inlined_call_operand.hbm [shape: f32[1,32], index: 4, kind: input, shape index: {}]   ;;  %s5314_s5 = inlined_call_operand.hbm [shape: f32[1,32], index: 5, kind: input, shape index: {}]   ;;  %s5315_s6 = inlined_call_operand.vmem [shape: bf16[2,32,96], index: 6, kind: input, shape index: {}]   ;;  %s5316_s7 = inlined_call_operand.hbm [shape: f32[2,1,96], index: 7, kind: input, shape index: {}]   ;;  %s5317_s8 = inlined_call_operand.vmem [shape: bf16[2,32,32], index: 8, kind: input, shape index: {}]   ;;  %s5318_s9 = inlined_call_operand.hbm [shape: f32[2,1,32], index: 9, kind: input, shape index: {}]   ;;  %s5319_s10 = inlined_call_operand.hbm [shape: f32[2,1,32], index: 10, kind: input, shape index: {}]   ;;  %s5320_s11 = inlined_call_operand.hbm [shape: f32[2,1,32], index: 11, kind: input, shape index: {}]   ;;  %s5321_s12 = inlined_call_operand.vmem [shape: bf16[2,32,64], index: 12, kind: input, shape index: {}]   ;;  %s5322_s13 = inlined_call_operand.hbm [shape: f32[2,1,64], index: 13, kind: input, shape index: {}]   ;;  %s5323_s14 = inlined_call_operand.vmem [shape: bf16[2,64,32], index: 14, kind: input, shape index: {}]   ;;  %s5324_s15 = inlined_call_operand.hbm [shape: f32[2,1,32], index: 15, kind: input, shape index: {}]   ;;  %s5325_s16 = inlined_call_operand.hbm [shape: f32[2,1,32], index: 16, kind: input, shape index: {}]   ;;  %s5326_s17 = inlined_call_operand.vmem [shape: f32[2,1,32], index: 17, kind: input, shape index: {}]   ;;  %s5327_s18 = inlined_call_operand.vmem [shape: f32[32,32], index: 18, kind: input, shape index: {}]   ;;  %s5328_s19 = inlined_call_operand.vmem [shape: f32[1,32], index: 19, kind: input, shape index: {}]   ;;  %s5329_s20 = inlined_call_operand.hbm [shape: f32[32,32], index: 20, kind: input, shape index: {}]   ;;  %s5330_s21 = inlined_call_operand.vmem [shape: f32[1,32], index: 21, kind: input, shape index: {}]   ;;  %s5331_s22 = inlined_call_operand.hbm [shape: f32[1,1], index: 22, kind: output, shape index: {0}]   ;;  %s5332_s23 = inlined_call_operand.hbm [shape: f32[2,6], index: 23, kind: output, shape index: {1}]  }
   0x1   :  { %5342 = sst [smem:[#allocation37_spill]] %s5309_s0 }
   0x2   :  { %5343 = sst [smem:[#allocation38_spill]] %s5310_s1 }
   0x3   :  { %5344 = sst [smem:[#allocation39_spill]] %s5311_s2 }
   0x4   :  { %5345 = sst [smem:[#allocation40_spill]] %s5312_s3 }
   0x5   :  { %5346 = sst [smem:[#allocation41_spill]] %s5313_s4 }
   0x6   :  { %5347 = sst [smem:[#allocation42_spill]] %s5314_s5 }
   0x7   :  { %5348 = sst [smem:[#allocation43_spill]] %s5315_s6 }
   0x8   :  { %5349 = sst [smem:[#allocation44_spill]] %s5316_s7 }
   0x9   :  { %5350 = sst [smem:[#allocation45_spill]] %s5331_s22 }
   0xa   :  { %5351 = sst [smem:[#allocation46_spill]] %s5332_s23 }
   0xb   :  { %29 = vsyncpa [#allocation5], 0 }
   0xc   :  { %30 = vsyncpa [#allocation8], 0 }
   0xd   :  { %31 = vsyncpa [#allocation11], 0 }
   0xe   :  { %32 = vsyncpa [#allocation14], 0 }
   0xf   :  { %33 = vsyncpa [#allocation17], 0 }
  0x10   :  { %34 = vsyncpa [#allocation20], 0 }
  0x11   :  { %35 = vsyncpa [#allocation23], 0 }
  0x12   :  { %36 = vsyncpa [#allocation6], 0 }
  0x13   :  { %37 = vsyncpa [#allocation27], 0  ;;  %s4336_s4 = smov [#allocation7]   ;;  %s4337_s24 = smov [#allocation10]  }
  0x14   :  { %s56_s30 = sshll.u32 %s4336_s4, 4  ;;  %s78_s25 = sshll.u32 %s4337_s24, 4  ;;  %s57_s30 = int_to_ptr.vmem [resolvable:$true] %s56_s30  ;;  %s79_s25 = int_to_ptr.vmem [resolvable:$true] %s78_s25 }
  0x15   :  { %s5352_s26 = sld [smem:[#allocation38_spill]] }
  0x1b   :  { %s3988_s2 = scalar_lea.hbm %s5352_s26, 32 }
  0x1c   :  { %p3989_p0 = scmp.ne.s32.totalorder %s5352_s26, %s3988_s2  ;;  %p3992_p1 = scmp.lt.u32.totalorder %s3988_s2, %s5352_s26 }
  0x1e   :  { %p3994_p2 = pnand %p3992_p1, %p3989_p0 }
  0x20   :  { %3997 = shalt.err (!%p3994_p2)
}
  0x21   :  { %s3998_s29 = scalar_lea.vmem %s57_s30, 32  ;;  %p4003_p4 = scmp.lt.s32.totalorder %s57_s30, %s57_s30 }
  0x22   :  { %p3999_p3 = scmp.ne.s32.totalorder %s57_s30, %s3998_s29  ;;  %p4004_p5 = scmp.lt.s32.totalorder %s3998_s29, %s3998_s29 }
  0x24   :  { %p4005_p6 = por %p4004_p5, %p4003_p4 }
  0x26   :  { %p4006_p7 = pnand %p4005_p6, %p3999_p3 }
  0x28   :  { %4009 = shalt.err (!%p4006_p7)
}
  0x29   :  { %59 = dma.hbm_to_vmem [thread:$0]  %s5352_s26, 32, %s57_s30, [#allocation8]  }
  0x2a   :  { %s5353_s5 = sld [smem:[#allocation41_spill]] }
  0x30   :  { %s4010_s1 = scalar_lea.hbm %s5353_s5, 16 }
  0x31   :  { %p4011_p8 = scmp.ne.s32.totalorder %s5353_s5, %s4010_s1  ;;  %p4014_p9 = scmp.lt.u32.totalorder %s4010_s1, %s5353_s5 }
  0x33   :  { %p4016_p10 = pnand %p4014_p9, %p4011_p8 }
  0x35   :  { %4019 = shalt.err (!%p4016_p10)
}
  0x36   :  { %s4020_s28 = scalar_lea.vmem %s79_s25, 16  ;;  %s4024_s29 = scalar_lea.vmem %s79_s25, 32 }
  0x37   :  { %p4021_p11 = scmp.ne.s32.totalorder %s79_s25, %s4020_s28  ;;  %p4025_p12 = scmp.lt.s32.totalorder %s79_s25, %s79_s25 }
  0x38   :  { %p4026_p13 = scmp.lt.s32.totalorder %s4024_s29, %s4020_s28 }
  0x3a   :  { %p4027_p0 = por %p4026_p13, %p4025_p12 }
  0x3c   :  { %p4028_p1 = pnand %p4027_p0, %p4021_p11 }
  0x3e   :  { %4031 = shalt.err (!%p4028_p1)
}
  0x3f   :  { %81 = dma.hbm_to_vmem [thread:$0]  %s5353_s5, 16, %s79_s25, [#allocation11]  }
  0x40   :  { %s4338_s3 = smov [#allocation13]   ;;  %s5354_s1 = sld [smem:[#allocation44_spill]] }
  0x41   :  { %s99_s0 = sshll.u32 %s4338_s3, 4  ;;  %s100_s0 = int_to_ptr.vmem [resolvable:$true] %s99_s0 }
  0x46   :  { %s4032_s6 = scalar_lea.hbm %s5354_s1, 32 }
  0x47   :  { %p4033_p2 = scmp.ne.s32.totalorder %s5354_s1, %s4032_s6  ;;  %p4036_p3 = scmp.lt.u32.totalorder %s4032_s6, %s5354_s1 }
  0x49   :  { %p4038_p4 = pnand %p4036_p3, %p4033_p2 }
  0x4b   :  { %4041 = shalt.err (!%p4038_p4)
}
  0x4c   :  { %s4042_s29 = scalar_lea.vmem %s100_s0, 32  ;;  %p4047_p6 = scmp.lt.s32.totalorder %s100_s0, %s100_s0 }
  0x4d   :  { %p4043_p5 = scmp.ne.s32.totalorder %s100_s0, %s4042_s29  ;;  %p4048_p7 = scmp.lt.s32.totalorder %s4042_s29, %s4042_s29 }
  0x4f   :  { %p4049_p8 = por %p4048_p7, %p4047_p6 }
  0x51   :  { %p4050_p9 = pnand %p4049_p8, %p4043_p5 }
  0x53   :  { %4053 = shalt.err (!%p4050_p9)
}
  0x54   :  { %s4339_s25 = smov 16   ;;  %s4340_s5 = smov 1  }
  0x55   :  { %105 = dma.hbm_to_vmem [thread:$0]  %s5354_s1, 32, %s100_s0, [#allocation14], %s4339_s25, %s4339_s25, %s4340_s5  }
  0x56   :  { %s4341_s3 = smov [#allocation16]   ;;  %s4342_s24 = smov [#allocation19]  }
  0x57   :  { %s125_s4 = sshll.u32 %s4341_s3, 4  ;;  %s151_s6 = sshll.u32 %s4342_s24, 4  ;;  %s126_s4 = int_to_ptr.vmem [resolvable:$true] %s125_s4  ;;  %s152_s6 = int_to_ptr.vmem [resolvable:$true] %s151_s6 }
  0x58   :  { %s4054_s7 = scalar_lea.hbm %s5319_s10, 32 }
  0x59   :  { %p4055_p10 = scmp.ne.s32.totalorder %s5319_s10, %s4054_s7  ;;  %p4058_p11 = scmp.lt.u32.totalorder %s4054_s7, %s5319_s10 }
  0x5b   :  { %p4060_p12 = pnand %p4058_p11, %p4055_p10 }
  0x5d   :  { %4063 = shalt.err (!%p4060_p12)
}
  0x5e   :  { %s4064_s0 = scalar_lea.vmem %s126_s4, 32  ;;  %p4069_p0 = scmp.lt.s32.totalorder %s126_s4, %s126_s4 }
  0x5f   :  { %p4065_p13 = scmp.ne.s32.totalorder %s126_s4, %s4064_s0  ;;  %p4070_p1 = scmp.lt.s32.totalorder %s4064_s0, %s4064_s0 }
  0x61   :  { %p4071_p2 = por %p4070_p1, %p4069_p0 }
  0x63   :  { %p4072_p3 = pnand %p4071_p2, %p4065_p13 }
  0x65   :  { %4075 = shalt.err (!%p4072_p3)
}
  0x66   :  { %131 = dma.hbm_to_vmem [thread:$0]  %s5319_s10, 32, %s126_s4, [#allocation17], %s4339_s25, %s4339_s25, %s4340_s5  }
  0x67   :  { %s4076_s23 = scalar_lea.hbm %s5322_s13, 32 }
  0x68   :  { %p4077_p4 = scmp.ne.s32.totalorder %s5322_s13, %s4076_s23  ;;  %p4080_p5 = scmp.lt.u32.totalorder %s4076_s23, %s5322_s13 }
  0x6a   :  { %p4082_p6 = pnand %p4080_p5, %p4077_p4 }
  0x6c   :  { %4085 = shalt.err (!%p4082_p6)
}
  0x6d   :  { %s4086_s7 = scalar_lea.vmem %s152_s6, 32  ;;  %p4091_p8 = scmp.lt.s32.totalorder %s152_s6, %s152_s6 }
  0x6e   :  { %p4087_p7 = scmp.ne.s32.totalorder %s152_s6, %s4086_s7  ;;  %p4092_p9 = scmp.lt.s32.totalorder %s4086_s7, %s4086_s7 }
  0x70   :  { %p4093_p10 = por %p4092_p9, %p4091_p8 }
  0x72   :  { %p4094_p11 = pnand %p4093_p10, %p4087_p7 }
  0x74   :  { %4097 = shalt.err (!%p4094_p11)
}
  0x75   :  { %157 = dma.hbm_to_vmem [thread:$0]  %s5322_s13, 32, %s152_s6, [#allocation20], %s4339_s25, %s4339_s25, %s4340_s5  }
  0x76   :  { %s4343_s28 = smov [#allocation22]   ;;  %s4344_s0 = smov [#allocation4]  }
  0x77   :  { %s177_s29 = sshll.u32 %s4343_s28, 4  ;;  %s43_s1 = sshll.u32 %s4344_s0, 4  ;;  %s178_s29 = int_to_ptr.vmem [resolvable:$true] %s177_s29  ;;  %s44_s1 = int_to_ptr.vmem [resolvable:$true] %s43_s1 }
  0x78   :  { %s4098_s22 = scalar_lea.hbm %s5325_s16, 32 }
  0x79   :  { %p4099_p12 = scmp.ne.s32.totalorder %s5325_s16, %s4098_s22  ;;  %p4102_p13 = scmp.lt.u32.totalorder %s4098_s22, %s5325_s16 }
  0x7b   :  { %p4104_p0 = pnand %p4102_p13, %p4099_p12 }
  0x7d   :  { %4107 = shalt.err (!%p4104_p0)
}
  0x7e   :  { %s4108_s13 = scalar_lea.vmem %s178_s29, 32  ;;  %p4113_p2 = scmp.lt.s32.totalorder %s178_s29, %s178_s29 }
  0x7f   :  { %p4109_p1 = scmp.ne.s32.totalorder %s178_s29, %s4108_s13  ;;  %p4114_p3 = scmp.lt.s32.totalorder %s4108_s13, %s4108_s13 }
  0x81   :  { %p4115_p4 = por %p4114_p3, %p4113_p2 }
  0x83   :  { %p4116_p5 = pnand %p4115_p4, %p4109_p1 }
  0x85   :  { %4119 = shalt.err (!%p4116_p5)
}
  0x86   :  { %183 = dma.hbm_to_vmem [thread:$0]  %s5325_s16, 32, %s178_s29, [#allocation23], %s4339_s25, %s4339_s25, %s4340_s5  }
  0x87   :  { %s5355_s4 = sld [smem:[#allocation37_spill]] }
  0x8d   :  { %s4120_s28 = scalar_lea.hbm %s5355_s4, 256 }
  0x8e   :  { %p4121_p6 = scmp.ne.s32.totalorder %s5355_s4, %s4120_s28  ;;  %p4124_p7 = scmp.lt.u32.totalorder %s4120_s28, %s5355_s4 }
  0x90   :  { %p4126_p8 = pnand %p4124_p7, %p4121_p6 }
  0x92   :  { %4129 = shalt.err (!%p4126_p8)
}
  0x93   :  { %s4130_s23 = scalar_lea.vmem %s44_s1, 256  ;;  %p4135_p10 = scmp.lt.s32.totalorder %s44_s1, %s44_s1 }
  0x94   :  { %p4131_p9 = scmp.ne.s32.totalorder %s44_s1, %s4130_s23  ;;  %p4136_p11 = scmp.lt.s32.totalorder %s4130_s23, %s4130_s23 }
  0x96   :  { %p4137_p12 = por %p4136_p11, %p4135_p10 }
  0x98   :  { %p4138_p13 = pnand %p4137_p12, %p4131_p9 }
  0x9a   :  { %4141 = shalt.err (!%p4138_p13)
}
  0x9b   :  { %s4345_s16 = smov 128   ;;  %s4346_s29 = smov 8  }
  0x9c   :  { %49 = dma.hbm_to_vmem [thread:$0]  %s5355_s4, 256, %s44_s1, [#allocation5], %s4345_s16, %s4345_s16, %s4346_s29  }
  0x9d   :  { %s4347_s27 = smov [#allocation9]   ;;  %s4348_s6 = smov [#allocation12]  }
  0x9e   :  { %s68_s13 = sshll.u32 %s4347_s27, 4  ;;  %s88_s2 = sshll.u32 %s4348_s6, 4  ;;  %s69_s13 = int_to_ptr.vmem [resolvable:$true] %s68_s13  ;;  %s89_s2 = int_to_ptr.vmem [resolvable:$true] %s88_s2 }
  0x9f   :  { %s5356_s28 = sld [smem:[#allocation40_spill]] }
  0xa5   :  { %s4142_s0 = scalar_lea.hbm %s5356_s28, 128 }
  0xa6   :  { %p4143_p0 = scmp.ne.s32.totalorder %s5356_s28, %s4142_s0  ;;  %p4146_p1 = scmp.lt.u32.totalorder %s4142_s0, %s5356_s28 }
  0xa8   :  { %p4148_p2 = pnand %p4146_p1, %p4143_p0 }
  0xaa   :  { %4151 = shalt.err (!%p4148_p2)
}
  0xab   :  { %s4152_s1 = scalar_lea.vmem %s69_s13, 128  ;;  %p4157_p4 = scmp.lt.s32.totalorder %s69_s13, %s69_s13 }
  0xac   :  { %p4153_p3 = scmp.ne.s32.totalorder %s69_s13, %s4152_s1  ;;  %p4158_p5 = scmp.lt.s32.totalorder %s4152_s1, %s4152_s1 }
  0xae   :  { %p4159_p6 = por %p4158_p5, %p4157_p4 }
  0xb0   :  { %p4160_p7 = pnand %p4159_p6, %p4153_p3 }
  0xb2   :  { %4163 = shalt.err (!%p4160_p7)
}
  0xb3   :  { %71 = dma.hbm_to_vmem [thread:$0]  %s5356_s28, 128, %s69_s13, [#allocation8]  }
  0xb4   :  { %s5357_s6 = sld [smem:[#allocation42_spill]] }
  0xba   :  { %s4164_s7 = scalar_lea.hbm %s5357_s6, 16 }
  0xbb   :  { %p4165_p8 = scmp.ne.s32.totalorder %s5357_s6, %s4164_s7  ;;  %p4168_p9 = scmp.lt.u32.totalorder %s4164_s7, %s5357_s6 }
  0xbd   :  { %p4170_p10 = pnand %p4168_p9, %p4165_p8 }
  0xbf   :  { %4173 = shalt.err (!%p4170_p10)
}
  0xc0   :  { %s4174_s22 = scalar_lea.vmem %s89_s2, 16  ;;  %s4178_s23 = scalar_lea.vmem %s89_s2, 32 }
  0xc1   :  { %p4175_p11 = scmp.ne.s32.totalorder %s89_s2, %s4174_s22  ;;  %p4179_p12 = scmp.lt.s32.totalorder %s89_s2, %s89_s2 }
  0xc2   :  { %p4180_p13 = scmp.lt.s32.totalorder %s4178_s23, %s4174_s22 }
  0xc4   :  { %p4181_p0 = por %p4180_p13, %p4179_p12 }
  0xc6   :  { %p4182_p1 = pnand %p4181_p0, %p4175_p11 }
  0xc8   :  { %4185 = shalt.err (!%p4182_p1)
}
  0xc9   :  { %91 = dma.hbm_to_vmem [thread:$0]  %s5357_s6, 16, %s89_s2, [#allocation11]  }
  0xca   :  { %s4349_s1 = smov [#allocation15]   ;;  %s4350_s3 = smov [#allocation18]  }
  0xcb   :  { %s113_s4 = sshll.u32 %s4349_s1, 4  ;;  %s137_s24 = sshll.u32 %s4350_s3, 4  ;;  %s114_s4 = int_to_ptr.vmem [resolvable:$true] %s113_s4  ;;  %s138_s24 = int_to_ptr.vmem [resolvable:$true] %s137_s24 }
  0xcc   :  { %s4186_s10 = scalar_lea.hbm %s5318_s9, 32 }
  0xcd   :  { %p4187_p2 = scmp.ne.s32.totalorder %s5318_s9, %s4186_s10  ;;  %p4190_p3 = scmp.lt.u32.totalorder %s4186_s10, %s5318_s9 }
  0xcf   :  { %p4192_p4 = pnand %p4190_p3, %p4187_p2 }
  0xd1   :  { %4195 = shalt.err (!%p4192_p4)
}
  0xd2   :  { %s4196_s2 = scalar_lea.vmem %s114_s4, 32  ;;  %p4201_p6 = scmp.lt.s32.totalorder %s114_s4, %s114_s4 }
  0xd3   :  { %p4197_p5 = scmp.ne.s32.totalorder %s114_s4, %s4196_s2  ;;  %p4202_p7 = scmp.lt.s32.totalorder %s4196_s2, %s4196_s2 }
  0xd5   :  { %p4203_p8 = por %p4202_p7, %p4201_p6 }
  0xd7   :  { %p4204_p9 = pnand %p4203_p8, %p4197_p5 }
  0xd9   :  { %4207 = shalt.err (!%p4204_p9)
}
  0xda   :  { %119 = dma.hbm_to_vmem [thread:$0]  %s5318_s9, 32, %s114_s4, [#allocation14], %s4339_s25, %s4339_s25, %s4340_s5  }
  0xdb   :  { %s4208_s1 = scalar_lea.hbm %s5320_s11, 32 }
  0xdc   :  { %p4209_p10 = scmp.ne.s32.totalorder %s5320_s11, %s4208_s1  ;;  %p4212_p11 = scmp.lt.u32.totalorder %s4208_s1, %s5320_s11 }
  0xde   :  { %p4214_p12 = pnand %p4212_p11, %p4209_p10 }
  0xe0   :  { %4217 = shalt.err (!%p4214_p12)
}
  0xe1   :  { %s4218_s0 = scalar_lea.vmem %s138_s24, 32  ;;  %p4223_p0 = scmp.lt.s32.totalorder %s138_s24, %s138_s24 }
  0xe2   :  { %p4219_p13 = scmp.ne.s32.totalorder %s138_s24, %s4218_s0  ;;  %p4224_p1 = scmp.lt.s32.totalorder %s4218_s0, %s4218_s0 }
  0xe4   :  { %p4225_p2 = por %p4224_p1, %p4223_p0 }
  0xe6   :  { %p4226_p3 = pnand %p4225_p2, %p4219_p13 }
  0xe8   :  { %4229 = shalt.err (!%p4226_p3)
}
  0xe9   :  { %143 = dma.hbm_to_vmem [thread:$0]  %s5320_s11, 32, %s138_s24, [#allocation17], %s4339_s25, %s4339_s25, %s4340_s5  }
  0xea   :  { %s4351_s30 = smov [#allocation21]   ;;  %s4352_s22 = smov [#allocation24]  }
  0xeb   :  { %s165_s26 = sshll.u32 %s4351_s30, 4  ;;  %s195_s2 = sshll.u32 %s4352_s22, 4  ;;  %s166_s26 = int_to_ptr.vmem [resolvable:$true] %s165_s26  ;;  %s196_s2 = int_to_ptr.vmem [resolvable:$true] %s195_s2 }
  0xec   :  { %s4230_s13 = scalar_lea.hbm %s5324_s15, 32 }
  0xed   :  { %p4231_p4 = scmp.ne.s32.totalorder %s5324_s15, %s4230_s13  ;;  %p4234_p5 = scmp.lt.u32.totalorder %s4230_s13, %s5324_s15 }
  0xef   :  { %p4236_p6 = pnand %p4234_p5, %p4231_p4 }
  0xf1   :  { %4239 = shalt.err (!%p4236_p6)
}
  0xf2   :  { %s4240_s11 = scalar_lea.vmem %s166_s26, 32  ;;  %p4245_p8 = scmp.lt.s32.totalorder %s166_s26, %s166_s26 }
  0xf3   :  { %p4241_p7 = scmp.ne.s32.totalorder %s166_s26, %s4240_s11  ;;  %p4246_p9 = scmp.lt.s32.totalorder %s4240_s11, %s4240_s11 }
  0xf5   :  { %p4247_p10 = por %p4246_p9, %p4245_p8 }
  0xf7   :  { %p4248_p11 = pnand %p4247_p10, %p4241_p7 }
  0xf9   :  { %4251 = shalt.err (!%p4248_p11)
}
  0xfa   :  { %171 = dma.hbm_to_vmem [thread:$0]  %s5324_s15, 32, %s166_s26, [#allocation20], %s4339_s25, %s4339_s25, %s4340_s5  }
  0xfb   :  { %s4252_s9 = scalar_lea.hbm %s5329_s20, 512 }
  0xfc   :  { %p4253_p12 = scmp.ne.s32.totalorder %s5329_s20, %s4252_s9  ;;  %p4256_p13 = scmp.lt.u32.totalorder %s4252_s9, %s5329_s20 }
  0xfe   :  { %p4258_p0 = pnand %p4256_p13, %p4253_p12 }
 0x100   :  { %4261 = shalt.err (!%p4258_p0)
}
 0x101   :  { %s4262_s23 = scalar_lea.vmem %s196_s2, 512  ;;  %p4267_p2 = scmp.lt.s32.totalorder %s196_s2, %s196_s2 }
 0x102   :  { %p4263_p1 = scmp.ne.s32.totalorder %s196_s2, %s4262_s23  ;;  %p4268_p3 = scmp.lt.s32.totalorder %s4262_s23, %s4262_s23 }
 0x104   :  { %p4269_p4 = por %p4268_p3, %p4267_p2 }
 0x106   :  { %p4270_p5 = pnand %p4269_p4, %p4263_p1 }
 0x108   :  { %4273 = shalt.err (!%p4270_p5)
}
 0x109   :  { %201 = dma.hbm_to_vmem [thread:$0]  %s5329_s20, 512, %s196_s2, [#allocation23], %s4345_s16, %s4345_s16, %s4346_s29  }
 0x10a   :  { %4318 = dma.done.wait [#allocation5], 256  }
 0x10b   :  { %4319 = vsyncadd [#allocation5], 4294967040 }
 0x10c   :  { %4320 = dma.done.wait [#allocation8], 160  }
 0x10d   :  { %4321 = vsyncadd [#allocation8], 4294967136 }
 0x10e   :  { %4322 = dma.done.wait [#allocation11], 32  }
 0x10f   :  { %4323 = vsyncadd [#allocation11], 4294967264 }
 0x110   :  { %4324 = dma.done.wait [#allocation14], 64  }
 0x111   :  { %4325 = vsyncadd [#allocation14], 4294967232 }
 0x112   :  { %4326 = dma.done.wait [#allocation17], 64  }
 0x113   :  { %4327 = vsyncadd [#allocation17], 4294967232 }
 0x114   :  { %4328 = dma.done.wait [#allocation20], 64  }
 0x115   :  { %4329 = vsyncadd [#allocation20], 4294967232 }
 0x116   :  { %4330 = dma.done.wait [#allocation23], 544  }
 0x117   :  { %4331 = vsyncadd [#allocation23], 4294966752  ;;  %vm248_vm0 = vcmask 261120   ;;  %v244_v0 = vld [vmem:[#allocation4] sm:$0xff]  ;;  %v245_v1 = vld [vmem:[#allocation4 + $0x8] sm:$0xff]  ;;  %s5358_s26 = sld [smem:[#allocation43_spill]] }
 0x118   :  { %v249_v2 = vsel %vm248_vm0, %v244_v0, 0.0  ;;  %v252_v3 = vsel %vm248_vm0, %v245_v1, 0.0  ;;  %v4353_v15 = vmov 0.0   ;;  %vm4354_vm1 = vmmov 0   ;;  %v3317_v25 = vld [vmem:[#allocation10] ss:$0 sm:$0xff] }
 0x119   :  { %250 = vadd.xlane.f32.xlu0 %v249_v2  ;;  %3527 = vmatprep.subr.bf16.mxu0 %v4353_v15  ;;  %v3318_v29 = vld [vmem:[#allocation12] ss:$0 sm:$0xff]  ;;  %v3319_v34 = vld [vmem:[#allocation13] ss:$0 sm:$0xff]  ;;  %s4355_s28 = smov 88   ;;  %s4356_s1 = smov 96  }
 0x11a   :  { %3531 = vmatprep.mubr.msk.bf16.mxu0 %vm4354_vm1, %v4353_v15  ;;  %3535 = vmatprep.subr.bf16.mxu1 %v4353_v15  ;;  %s4357_s3 = smov 120   ;;  %s4358_s27 = smov 112   ;;  %vm365_vm2 = vcmask 64512   ;;  %vm435_vm3 = vcmask 1043456   ;;  %vm596_vm4 = vcmask 130112   ;;  %vm714_vm5 = vcmask 195712  }
 0x11b   :  { %3537 = vmatprep.mubr.msk.bf16.mxu1 %vm4354_vm1, %v4353_v15  ;;  %s4359_s11 = smov 80   ;;  %s4360_s24 = smov 104   ;;  %vm832_vm6 = vcmask 261312   ;;  %vm1544_vm7 = vcmask 523264   ;;  %vm2975_vm8 = vcmask 253952   ;;  %vm3158_vm9 = vcmask 259072  }
 0x11c   :  { %s4361_s7 = smov 72   ;;  %s4362_s10 = smov 56   ;;  %vm3150_vm10 = vcmask 254976   ;;  %vm3242_vm11 = vcmask 41984  }
 0x11d   :  { %253 = vadd.xlane.f32.xlu0 %v252_v3  ;;  %v3866_v14 = vld [vmem:[%s5358_s26] sm:$0xff]   ;;  %v3867_v16 = vld [vmem:[%s5358_s26 + $0x8] sm:$0xff]   ;;  %s4363_s0 = smov 64   ;;  %s4364_s9 = smov 48  }
 0x11e   :  { %3528 = vmatpush3.bf16.msra.mxu0 %v3866_v14  ;;  %s4365_s4 = smov 40   ;;  %s4366_s30 = smov 24  }
 0x11f   :  { %3529 = vmatprep.subr.bf16.mxu0 %v4353_v15 }
 0x122   :  { %3530 = vmatpush3.bf16.msra.mxu0 %v3867_v16 }
 0x123   :  { %3541 = vmatprep.subr.bf16.mxu0 %v4353_v15 }
 0x1a6   :  { %v251_v4 = vpop.xlane.xlu0 %250 }
 0x1a7   :  { %v256_v5 = vmul.f32 0.03125, %v251_v4  ;;  %v292_v4 = vld [vmem:[#allocation7] sm:$0x3] }
 0x1a9   :  { %v258_v6 = vsub.f32 %v244_v0, %v256_v5 }
 0x1aa   :  { %v254_v7 = vpop.xlane.xlu0 %253 }
 0x1ab   :  { %v257_v8 = vmul.f32 0.03125, %v254_v7  ;;  %v260_v9 = vmul.f32 %v258_v6, %v258_v6 }
 0x1ad   :  { %v259_v10 = vsub.f32 %v245_v1, %v257_v8  ;;  %v262_v11 = vsel %vm248_vm0, %v260_v9, 0.0  ;;  %v413_v1 = vlaneseq }
 0x1ae   :  { %263 = vadd.xlane.f32.xlu1 %v262_v11 }
 0x1af   :  { %v261_v12 = vmul.f32 %v259_v10, %v259_v10  ;;  %v414_v2 = vshrl.u32 %v413_v1, 7 }
 0x1b1   :  { %v265_v13 = vsel %vm248_vm0, %v261_v12, 0.0  ;;  %v415_v3 = vsub.s32 0, %v414_v2 }
 0x1b2   :  { %266 = vadd.xlane.f32.xlu1 %v265_v13 }
 0x1b3   :  { %v4778_v5 = vrot.slane %v292_v4, %v415_v3 }
 0x23b   :  { %v264_v17 = vpop.xlane.xlu1 %263 }
 0x23c   :  { %v268_v18 = vmul.f32 0.03125, %v264_v17 }
 0x23e   :  { %v270_v19 = vadd.f32 1e-12, %v268_v18 }
 0x23f   :  { %v267_v20 = vpop.xlane.xlu1 %266 }
 0x240   :  { %3886 = vrsqrt.f32 %v270_v19  ;;  %v269_v21 = vmul.f32 0.03125, %v267_v20 }
 0x242   :  { %v271_v22 = vadd.f32 1e-12, %v269_v21 }
 0x244   :  { %3888 = vrsqrt.f32 %v271_v22 }
 0x24a   :  { %v3887_v23 = vpop.eup %3886 }
 0x24b   :  { %v274_v24 = vmul.f32 %v3887_v23, %v258_v6 }
 0x24d   :  { %v282_v28 = vmul.f32 %v3317_v25, %v274_v24 }
 0x24e   :  { %v3889_v26 = vpop.eup %3888 }
 0x24f   :  { %v275_v27 = vmul.f32 %v3889_v26, %v259_v10  ;;  %v4692_v31 = vadd.f32 %v3318_v29, %v282_v28 }
 0x251   :  { %v283_v30 = vmul.f32 %v3317_v25, %v275_v27 }
 0x253   :  { %v4694_v32 = vadd.f32 %v3318_v29, %v283_v30 }
 0x255   :  { %v293_v33 = vpack.c.bf16 %v4694_v32, %v4692_v31 }
 0x257   :  { %3532 = vmatmul.mubr.msk.bf16.vlgmr.msra.gmra.mrb[0].mxu0 %vm248_vm0, %v293_v33 }
 0x258   :  { %3543 = vmatprep.mubr.msk.bf16.mxu0 %vm4354_vm1, %v4353_v15 }
 0x32a   :  { %v354_v35 = vpop.f32.mrb[0].mxu0 }
 0x32b   :  { %v355_v36 = vadd.f32 %v3319_v34, %v354_v35  ;;  %v3533_v37 = vpop.f32.mrb[1].mxu0  ;;  %v887_v35 = vsub.s32 1, %v414_v2 }
 0x32c   :  { %v357_v38 = vpop.f32.mrb[2].mxu0 }
 0x32d   :  { %v4701_v39 = vpack.c.bf16 %v355_v36, %v355_v36  ;;  %v3534_v40 = vpop.f32.mrb[3].mxu0  ;;  %v358_v41 = vadd.f32 %v3319_v34, %v357_v38 }
 0x32e   :  { %v4792_v40 = vrot.slane %v292_v4, %v887_v35 }
 0x32f   :  { %482 = vrot.lane.b32.xlu1 %v4701_v39, %s4355_s28  ;;  %363 = vrot.lane.b32.xlu0 %v4701_v39, %s4356_s1  ;;  %v4715_v42 = vpack.c.bf16 %v358_v41, %v358_v41 }
 0x333   :  { %480 = vrot.lane.b32.xlu1 %v4701_v39, %s4357_s3  ;;  %598 = vrot.lane.b32.xlu0 %v4701_v39, %s4358_s27 }
 0x337   :  { %600 = vrot.lane.b32.xlu1 %v4701_v39, %s4359_s11  ;;  %716 = vrot.lane.b32.xlu0 %v4701_v39, %s4360_s24 }
 0x33b   :  { %718 = vrot.lane.b32.xlu1 %v4701_v39, %s4361_s7  ;;  %953 = vrot.lane.b32.xlu0 %v4715_v42, %s4355_s28 }
 0x33f   :  { %1070 = vrot.lane.b32.xlu0 %v4715_v42, %s4359_s11  ;;  %836 = vrot.lane.b32.xlu1 %v4715_v42, %s4356_s1 }
 0x343   :  { %1187 = vrot.lane.b32.xlu0 %v4715_v42, %s4361_s7  ;;  %951 = vrot.lane.b32.xlu1 %v4715_v42, %s4357_s3 }
 0x347   :  { %1068 = vrot.lane.b32.xlu1 %v4715_v42, %s4358_s27 }
 0x34b   :  { %1185 = vrot.lane.b32.xlu1 %v4715_v42, %s4360_s24 }
 0x34f   :  { %544 = vrot.lane.b32.xlu1 %v4701_v39, %s4362_s10 }
 0x3a1   :  { %v364_v43 = vpop.permute.xlu0 %363  ;;  %v483_v45 = vpop.permute.xlu1 %482 }
 0x3a2   :  { %v370_v44 = vsel %vm365_vm2, %v364_v43, 0  ;;  %v488_v47 = vsel %vm365_vm2, %v483_v45, 0 }
 0x3a3   :  { %3536 = vmatpush3.bf16.xpose.msra.mxu1 %v370_v44 }
 0x3a4   :  { %3547 = vmatprep.subr.bf16.mxu1 %v4353_v15 }
 0x3a5   :  { %v481_v46 = vpop.permute.xlu1 %480  ;;  %v599_v51 = vpop.permute.xlu0 %598 }
 0x3a9   :  { %v601_v48 = vpop.permute.xlu1 %600  ;;  %v717_v54 = vpop.permute.xlu0 %716 }
 0x3aa   :  { %3538 = vmatmul.mubr.msk.bf16.vlgmr.msra.gmra.mrb[0].mxu1 %vm365_vm2, %v4701_v39  ;;  %v606_v49 = vsel %vm365_vm2, %v601_v48, 0 }
 0x3ab   :  { %3548 = vmatpush3.bf16.xpose.msra.mxu1 %v488_v47  ;;  %3549 = vmatprep.mubr.msk.bf16.mxu1 %vm4354_vm1, %v4353_v15 }
 0x3ac   :  { %3559 = vmatprep.subr.bf16.mxu1 %v4353_v15 }
 0x3ad   :  { %v719_v50 = vpop.permute.xlu1 %718  ;;  %v954_v56 = vpop.permute.xlu0 %953 }
 0x3ae   :  { %v724_v52 = vsel %vm365_vm2, %v719_v50, 0  ;;  %v959_v57 = vsel %vm365_vm2, %v954_v56, 0 }
 0x3b1   :  { %v837_v53 = vpop.permute.xlu1 %836  ;;  %v1071_v58 = vpop.permute.xlu0 %1070 }
 0x3b2   :  { %3550 = vmatmul.mubr.msk.bf16.vlgmr.msra.gmra.mrb[4].mxu1 %vm365_vm2, %v481_v46  ;;  %v842_v55 = vsel %vm365_vm2, %v837_v53, 0  ;;  %v1076_v60 = vsel %vm365_vm2, %v1071_v58, 0 }
 0x3b3   :  { %3560 = vmatpush3.bf16.xpose.msra.mxu1 %v606_v49  ;;  %3561 = vmatprep.mubr.msk.bf16.mxu1 %vm4354_vm1, %v4353_v15 }
 0x3b4   :  { %3571 = vmatprep.subr.bf16.mxu1 %v4353_v15 }
 0x3b5   :  { %v952_v59 = vpop.permute.xlu1 %951  ;;  %v1188_v61 = vpop.permute.xlu0 %1187 }
 0x3b6   :  { %v1193_v63 = vsel %vm365_vm2, %v1188_v61, 0 }
 0x3b9   :  { %v1069_v62 = vpop.permute.xlu1 %1068 }
 0x3ba   :  { %3562 = vmatmul.mubr.msk.bf16.vlgmr.msra.gmra.mrb[8].mxu1 %vm365_vm2, %v599_v51 }
 0x3bb   :  { %3572 = vmatpush3.bf16.xpose.msra.mxu1 %v724_v52  ;;  %3573 = vmatprep.mubr.msk.bf16.mxu1 %vm4354_vm1, %v4353_v15 }
 0x3bc   :  { %3583 = vmatprep.subr.bf16.mxu1 %v4353_v15 }
 0x3bd   :  { %v1186_v0 = vpop.permute.xlu1 %1185 }
 0x3c2   :  { %3574 = vmatmul.mubr.msk.bf16.vlgmr.msra.gmra.mrb[12].mxu1 %vm365_vm2, %v717_v54 }
 0x3c3   :  { %3584 = vmatpush3.bf16.xpose.msra.mxu1 %v842_v55  ;;  %3585 = vmatprep.mubr.msk.bf16.mxu1 %vm4354_vm1, %v4353_v15 }
 0x3c4   :  { %3595 = vmatprep.subr.bf16.mxu1 %v4353_v15 }
 0x3ca   :  { %3586 = vmatmul.mubr.msk.bf16.vlgmr.msra.gmra.mrb[16].mxu1 %vm365_vm2, %v4715_v42 }
 0x3cb   :  { %3596 = vmatpush3.bf16.xpose.msra.mxu1 %v959_v57  ;;  %3597 = vmatprep.mubr.msk.bf16.mxu1 %vm4354_vm1, %v4353_v15 }
 0x3cc   :  { %3607 = vmatprep.subr.bf16.mxu1 %v4353_v15 }
 0x3d2   :  { %3598 = vmatmul.mubr.msk.bf16.vlgmr.msra.gmra.mrb[20].mxu1 %vm365_vm2, %v952_v59 }
 0x3d3   :  { %3608 = vmatpush3.bf16.xpose.msra.mxu1 %v1076_v60  ;;  %3609 = vmatprep.mubr.msk.bf16.mxu1 %vm4354_vm1, %v4353_v15 }
 0x3d4   :  { %3619 = vmatprep.subr.bf16.mxu1 %v4353_v15 }
 0x3da   :  { %3610 = vmatmul.mubr.msk.bf16.vlgmr.msra.gmra.mrb[24].mxu1 %vm365_vm2, %v1069_v62 }
 0x3db   :  { %3620 = vmatpush3.bf16.xpose.msra.mxu1 %v1193_v63  ;;  %3621 = vmatprep.mubr.msk.bf16.mxu1 %vm4354_vm1, %v4353_v15 }
 0x3dc   :  { %3631 = vmatprep.subr.bf16.mxu1 %v4353_v15 }
 0x3e2   :  { %3622 = vmatmul.mubr.msk.bf16.vlgmr.msra.gmra.mrb[28].mxu1 %vm365_vm2, %v1186_v0 }
 0x3e3   :  { %3635 = vmatprep.mubr.msk.bf16.mxu1 %vm4354_vm1, %v4353_v15 }
 0x47d   :  { %v406_v6 = vpop.f32.mrb[0].mxu1 }
 0x47e   :  { %v412_v7 = vmul.f32 0.35355338, %v406_v6  ;;  %v3539_v8 = vpop.f32.mrb[1].mxu1 }
 0x47f   :  { %v409_v9 = vpop.f32.mrb[2].mxu1 }
 0x480   :  { %v3540_v10 = vpop.f32.mrb[3].mxu1  ;;  %v4781_v11 = vadd.f32 %v4778_v5, %v412_v7 }
 0x481   :  { %v4815_v10 = vpop.permute.xlu1 %544 }
 0x482   :  { %v418_v12 = vsel %vm365_vm2, %v4781_v11, -inf }
 0x483   :  { %419 = vmax.xlane.f32.xlu0 %v418_v12 }
 0x485   :  { %v524_v13 = vpop.f32.mrb[4].mxu1 }
 0x486   :  { %v530_v14 = vmul.f32 0.35355338, %v524_v13  ;;  %v3551_v16 = vpop.f32.mrb[5].mxu1 }
 0x487   :  { %v527_v17 = vpop.f32.mrb[6].mxu1 }
 0x488   :  { %v3552_v18 = vpop.f32.mrb[7].mxu1  ;;  %v4786_v19 = vadd.f32 %v530_v14, %v4778_v5 }
 0x48a   :  { %v532_v20 = vsel %vm365_vm2, %v4786_v19, -inf }
 0x48b   :  { %533 = vmax.xlane.f32.xlu1 %v532_v20 }
 0x48d   :  { %v642_v21 = vpop.f32.mrb[8].mxu1 }
 0x48e   :  { %v3563_v22 = vpop.f32.mrb[9].mxu1  ;;  %v648_v48 = vmul.f32 0.35355338, %v642_v21 }
 0x48f   :  { %v645_v23 = vpop.f32.mrb[10].mxu1 }
 0x490   :  { %v3564_v24 = vpop.f32.mrb[11].mxu1  ;;  %v649_v52 = vadd.f32 %v648_v48, %v4778_v5 }
 0x492   :  { %v650_v58 = vsel %vm365_vm2, %v649_v52, -inf }
 0x495   :  { %v760_v25 = vpop.f32.mrb[12].mxu1 }
 0x496   :  { %v3575_v26 = vpop.f32.mrb[13].mxu1  ;;  %v766_v51 = vmul.f32 0.35355338, %v760_v25 }
 0x497   :  { %v763_v27 = vpop.f32.mrb[14].mxu1 }
 0x498   :  { %v3576_v28 = vpop.f32.mrb[15].mxu1  ;;  %v767_v59 = vadd.f32 %v766_v51, %v4778_v5 }
 0x499   :  { %430 = vrot.lane.b32.xlu0 %v4701_v39, %s4363_s0 }
 0x49a   :  { %v768_v0 = vsel %vm365_vm2, %v767_v59, -inf }
 0x49d   :  { %v878_v29 = vpop.f32.mrb[16].mxu1 }
 0x49e   :  { %v3587_v30 = vpop.f32.mrb[17].mxu1  ;;  %v884_v56 = vmul.f32 0.35355338, %v878_v29 }
 0x49f   :  { %v881_v33 = vpop.f32.mrb[18].mxu1 }
 0x4a0   :  { %v3588_v34 = vpop.f32.mrb[19].mxu1  ;;  %v889_v2 = vadd.f32 %v4792_v40, %v884_v56 }
 0x4a2   :  { %v890_v3 = vsel %vm365_vm2, %v889_v2, -inf }
 0x4a5   :  { %v995_v36 = vpop.f32.mrb[20].mxu1 }
 0x4a6   :  { %v1001_v37 = vmul.f32 0.35355338, %v995_v36  ;;  %v3599_v38 = vpop.f32.mrb[21].mxu1 }
 0x4a7   :  { %v998_v41 = vpop.f32.mrb[22].mxu1 }
 0x4a8   :  { %v3600_v43 = vpop.f32.mrb[23].mxu1  ;;  %v4795_v44 = vadd.f32 %v1001_v37, %v4792_v40 }
 0x4aa   :  { %v1003_v45 = vsel %vm365_vm2, %v4795_v44, -inf }
 0x4ab   :  { %1004 = vmax.xlane.f32.xlu1 %v1003_v45 }
 0x4ad   :  { %v1112_v46 = vpop.f32.mrb[24].mxu1 }
 0x4ae   :  { %v3611_v47 = vpop.f32.mrb[25].mxu1  ;;  %v1118_v63 = vmul.f32 0.35355338, %v1112_v46 }
 0x4af   :  { %v1115_v49 = vpop.f32.mrb[26].mxu1 }
 0x4b0   :  { %v3612_v50 = vpop.f32.mrb[27].mxu1  ;;  %v1119_v4 = vadd.f32 %v1118_v63, %v4792_v40 }
 0x4b2   :  { %v1120_v6 = vsel %vm365_vm2, %v1119_v4, -inf }
 0x4b5   :  { %v1229_v53 = vpop.f32.mrb[28].mxu1 }
 0x4b6   :  { %v1235_v54 = vmul.f32 0.35355338, %v1229_v53  ;;  %v3623_v55 = vpop.f32.mrb[29].mxu1 }
 0x4b7   :  { %v1232_v57 = vpop.f32.mrb[30].mxu1 }
 0x4b8   :  { %651 = vmax.xlane.f32.xlu0 %v650_v58  ;;  %v3624_v60 = vpop.f32.mrb[31].mxu1  ;;  %v4803_v61 = vadd.f32 %v1235_v54, %v4792_v40 }
 0x4ba   :  { %v1237_v62 = vsel %vm365_vm2, %v4803_v61, -inf }
 0x4bb   :  { %1238 = vmax.xlane.f32.xlu1 %v1237_v62 }
 0x4bc   :  { %769 = vmax.xlane.f32.xlu0 %v768_v0 }
 0x4c0   :  { %891 = vmax.xlane.f32.xlu0 %v890_v3 }
 0x4c4   :  { %1121 = vmax.xlane.f32.xlu0 %v1120_v6 }
 0x4da   :  { %662 = vrot.lane.b32.xlu0 %v4701_v39, %s4364_s9 }
 0x510   :  { %v420_v7 = vpop.xlane.xlu0 %419 }
 0x511   :  { %v421_v8 = vsub.f32 %v4781_v11, %v420_v7 }
 0x513   :  { %v422_v9 = vmul.f32 1.442695, %v421_v8 }
 0x514   :  { %v431_v12 = vpop.permute.xlu0 %430 }
 0x515   :  { %3890 = vpow2.f32 %v422_v9  ;;  %v437_v13 = vsel %vm435_vm3, %v431_v12, 0 }
 0x516   :  { %3542 = vmatpush3.bf16.msra.mxu0 %v437_v13 }
 0x517   :  { %3553 = vmatprep.subr.bf16.mxu0 %v4353_v15 }
 0x518   :  { %v534_v14 = vpop.xlane.xlu1 %533 }
 0x519   :  { %v535_v16 = vsub.f32 %v4786_v19, %v534_v14 }
 0x51b   :  { %v536_v17 = vmul.f32 1.442695, %v535_v16 }
 0x51d   :  { %3892 = vpow2.f32 %v536_v17 }
 0x51f   :  { %v3891_v18 = vpop.eup %3890 }
 0x520   :  { %v424_v20 = vsel %vm365_vm2, %v3891_v18, 0.0 }
 0x521   :  { %425 = vadd.xlane.f32.xlu0 %v424_v20 }
 0x527   :  { %v4821_v11 = vpop.eup %3892 }
 0x528   :  { %v538_v21 = vsel %vm365_vm2, %v4821_v11, 0.0 }
 0x529   :  { %539 = vadd.xlane.f32.xlu1 %v538_v21 }
 0x538   :  { %v1005_v27 = vpop.xlane.xlu1 %1004 }
 0x539   :  { %v1006_v30 = vsub.f32 %v4795_v44, %v1005_v27 }
 0x53a   :  { %902 = vrot.lane.b32.xlu1 %v4715_v42, %s4363_s0 }
 0x53b   :  { %v1007_v35 = vmul.f32 1.442695, %v1006_v30 }
 0x545   :  { %v652_v22 = vpop.xlane.xlu0 %651 }
 0x546   :  { %v653_v23 = vsub.f32 %v649_v52, %v652_v22 }
 0x548   :  { %v654_v24 = vmul.f32 1.442695, %v653_v23  ;;  %v1239_v49 = vpop.xlane.xlu1 %1238 }
 0x549   :  { %v770_v25 = vpop.xlane.xlu0 %769  ;;  %v1240_v50 = vsub.f32 %v4803_v61, %v1239_v49  ;;  %v550_v61 = vsel %vm435_vm3, %v4815_v10, 0 }
 0x54a   :  { %3894 = vpow2.f32 %v654_v24  ;;  %v771_v19 = vsub.f32 %v767_v59, %v770_v25 }
 0x54b   :  { %v1241_v52 = vmul.f32 1.442695, %v1240_v50 }
 0x54c   :  { %v772_v26 = vmul.f32 1.442695, %v771_v19 }
 0x54d   :  { %v892_v28 = vpop.xlane.xlu0 %891 }
 0x54e   :  { %v893_v29 = vsub.f32 %v889_v2, %v892_v28  ;;  %3896 = vpow2.f32 %v772_v26 }
 0x550   :  { %v894_v33 = vmul.f32 1.442695, %v893_v29 }
 0x551   :  { %v1122_v46 = vpop.xlane.xlu0 %1121 }
 0x552   :  { %3898 = vpow2.f32 %v894_v33  ;;  %v1123_v47 = vsub.f32 %v1119_v4, %v1122_v46 }
 0x553   :  { %3900 = vpow2.f32 %v1007_v35 }
 0x554   :  { %v3895_v34 = vpop.eup %3894  ;;  %v1124_v48 = vmul.f32 1.442695, %v1123_v47 }
 0x555   :  { %v656_v36 = vsel %vm365_vm2, %v3895_v34, 0.0  ;;  %v663_v55 = vpop.permute.xlu0 %662 }
 0x556   :  { %657 = vadd.xlane.f32.xlu0 %v656_v36  ;;  %3902 = vpow2.f32 %v1124_v48  ;;  %v668_v0 = vsel %vm435_vm3, %v663_v55, 0 }
 0x557   :  { %3904 = vpow2.f32 %v1241_v52 }
 0x558   :  { %v4829_v37 = vpop.eup %3896 }
 0x559   :  { %v774_v38 = vsel %vm365_vm2, %v4829_v37, 0.0 }
 0x55c   :  { %v4833_v41 = vpop.eup %3898 }
 0x55d   :  { %v896_v43 = vsel %vm365_vm2, %v4833_v41, 0.0  ;;  %v4837_v44 = vpop.eup %3900 }
 0x55e   :  { %775 = vadd.xlane.f32.xlu1 %v774_v38  ;;  %v1009_v45 = vsel %vm365_vm2, %v4837_v44, 0.0 }
 0x560   :  { %v4846_v51 = vpop.eup %3902 }
 0x561   :  { %v1126_v53 = vsel %vm365_vm2, %v4846_v51, 0.0  ;;  %v4850_v54 = vpop.eup %3904 }
 0x562   :  { %897 = vadd.xlane.f32.xlu1 %v896_v43 }
 0x566   :  { %1010 = vadd.xlane.f32.xlu1 %v1009_v45 }
 0x56c   :  { %780 = vrot.lane.b32.xlu0 %v4701_v39, %s4365_s4  ;;  %v1243_v39 = vsel %vm365_vm2, %v4850_v54, 0.0 }
 0x577   :  { %1015 = vrot.lane.b32.xlu1 %v4715_v42, %s4362_s10 }
 0x58b   :  { %1127 = vadd.xlane.f32.xlu0 %v1126_v53 }
 0x59b   :  { %1244 = vadd.xlane.f32.xlu1 %v1243_v39 }
 0x5a1   :  { %1132 = vrot.lane.b32.xlu0 %v4715_v42, %s4364_s9 }
 0x5ac   :  { %1249 = vrot.lane.b32.xlu1 %v4715_v42, %s4365_s4 }
 0x5ae   :  { %v426_v56 = vpop.xlane.xlu0 %425 }
 0x5af   :  { %3906 = vrcp.f32 %v426_v56 }
 0x5b6   :  { %v540_v57 = vpop.xlane.xlu1 %539 }
 0x5b7   :  { %3908 = vrcp.f32 %v540_v57 }
 0x5b9   :  { %v3907_v58 = vpop.eup %3906 }
 0x5ba   :  { %v428_v59 = vmul.f32 %v3907_v58, %v3891_v18  ;;  %v903_v3 = vpop.permute.xlu1 %902 }
 0x5bb   :  { %v908_v20 = vsel %vm435_vm3, %v903_v3, 0 }
 0x5bc   :  { %v429_v60 = vpack.c.bf16 %v428_v59, %v428_v59 }
 0x5be   :  { %3544 = vmatmul.mubr.msk.bf16.vlgmr.msra.gmra.mrb[4].mxu0 %vm365_vm2, %v429_v60 }
 0x5bf   :  { %3554 = vmatpush3.bf16.msra.mxu0 %v550_v61  ;;  %3555 = vmatprep.mubr.msk.bf16.mxu0 %vm4354_vm1, %v4353_v15 }
 0x5c0   :  { %3565 = vmatprep.subr.bf16.mxu0 %v4353_v15 }
 0x5c1   :  { %v3909_v62 = vpop.eup %3908 }
 0x5c2   :  { %v542_v42 = vmul.f32 %v3909_v62, %v4821_v11 }
 0x5c4   :  { %v543_v63 = vpack.c.bf16 %v542_v42, %v542_v42 }
 0x5c6   :  { %3556 = vmatmul.mubr.msk.bf16.vlgmr.msra.gmra.mrb[8].mxu0 %vm365_vm2, %v543_v63 }
 0x5c7   :  { %3566 = vmatpush3.bf16.msra.mxu0 %v668_v0  ;;  %3567 = vmatprep.mubr.msk.bf16.mxu0 %vm4354_vm1, %v4353_v15 }
 0x5c8   :  { %3577 = vmatprep.subr.bf16.mxu0 %v4353_v15 }
 0x5e3   :  { %v658_v2 = vpop.xlane.xlu0 %657 }
 0x5e4   :  { %3910 = vrcp.f32 %v658_v2 }
 0x5e7   :  { %v781_v9 = vpop.permute.xlu0 %780 }
 0x5e8   :  { %v786_v12 = vsel %vm435_vm3, %v781_v9, 0 }
 0x5eb   :  { %v776_v4 = vpop.xlane.xlu1 %775 }
 0x5ec   :  { %3912 = vrcp.f32 %v776_v4 }
 0x5ee   :  { %v3911_v6 = vpop.eup %3910 }
 0x5ef   :  { %v660_v7 = vmul.f32 %v3911_v6, %v3895_v34  ;;  %v898_v8 = vpop.xlane.xlu1 %897 }
 0x5f0   :  { %3914 = vrcp.f32 %v898_v8  ;;  %v3869_v8 = vld [vmem:[%s5317_s8 + $0x8] sm:$0xff]  }
 0x5f1   :  { %v661_v10 = vpack.c.bf16 %v660_v7, %v660_v7  ;;  %v3868_v7 = vld [vmem:[%s5317_s8] sm:$0xff]  }
 0x5f2   :  { %3632 = vmatpush3.bf16.msra.mxu1 %v3868_v7 }
 0x5f3   :  { %3568 = vmatmul.mubr.msk.bf16.vlgmr.msra.gmra.mrb[12].mxu0 %vm365_vm2, %v661_v10  ;;  %v1011_v13 = vpop.xlane.xlu1 %1010  ;;  %3633 = vmatprep.subr.bf16.mxu1 %v4353_v15 }
 0x5f4   :  { %3578 = vmatpush3.bf16.msra.mxu0 %v786_v12  ;;  %3579 = vmatprep.mubr.msk.bf16.mxu0 %vm4354_vm1, %v4353_v15  ;;  %3916 = vrcp.f32 %v1011_v13 }
 0x5f5   :  { %3589 = vmatprep.subr.bf16.mxu0 %v4353_v15 }
 0x5f6   :  { %v3913_v14 = vpop.eup %3912  ;;  %3634 = vmatpush3.bf16.msra.mxu1 %v3869_v8 }
 0x5f7   :  { %v778_v16 = vmul.f32 %v3913_v14, %v4829_v37  ;;  %v1016_v21 = vpop.permute.xlu1 %1015  ;;  %3647 = vmatprep.subr.bf16.mxu1 %v4353_v15 }
 0x5f8   :  { %v1021_v24 = vsel %vm435_vm3, %v1016_v21, 0 }
 0x5f9   :  { %v779_v17 = vpack.c.bf16 %v778_v16, %v778_v16 }
 0x5fa   :  { %v3915_v18 = vpop.eup %3914 }
 0x5fb   :  { %3580 = vmatmul.mubr.msk.bf16.vlgmr.msra.gmra.mrb[16].mxu0 %vm365_vm2, %v779_v17  ;;  %v900_v11 = vmul.f32 %v3915_v18, %v4833_v41 }
 0x5fc   :  { %3590 = vmatpush3.bf16.msra.mxu0 %v908_v20  ;;  %3591 = vmatprep.mubr.msk.bf16.mxu0 %vm4354_vm1, %v4353_v15 }
 0x5fd   :  { %3601 = vmatprep.subr.bf16.mxu0 %v4353_v15  ;;  %v901_v22 = vpack.c.bf16 %v900_v11, %v900_v11 }
 0x5fe   :  { %v3917_v23 = vpop.eup %3916 }
 0x5ff   :  { %v1013_v25 = vmul.f32 %v3917_v23, %v4837_v44 }
 0x601   :  { %v1014_v19 = vpack.c.bf16 %v1013_v25, %v1013_v25 }
 0x603   :  { %3592 = vmatmul.mubr.msk.bf16.vlgmr.msra.gmra.mrb[20].mxu0 %vm365_vm2, %v901_v22 }
 0x604   :  { %3602 = vmatpush3.bf16.msra.mxu0 %v1021_v24  ;;  %3603 = vmatprep.mubr.msk.bf16.mxu0 %vm4354_vm1, %v4353_v15  ;;  %v3339_v24 = vld [vmem:[#allocation15] ss:$0 sm:$0xff] }
 0x605   :  { %3613 = vmatprep.subr.bf16.mxu0 %v4353_v15 }
 0x60b   :  { %3604 = vmatmul.mubr.msk.bf16.vlgmr.msra.gmra.mrb[24].mxu0 %vm365_vm2, %v1014_v19 }
 0x60c   :  { %3615 = vmatprep.mubr.msk.bf16.mxu0 %vm4354_vm1, %v4353_v15 }
 0x618   :  { %v1128_v26 = vpop.xlane.xlu0 %1127 }
 0x619   :  { %3918 = vrcp.f32 %v1128_v26 }
 0x61c   :  { %v1133_v27 = vpop.permute.xlu0 %1132 }
 0x61d   :  { %v1138_v28 = vsel %vm435_vm3, %v1133_v27, 0 }
 0x61e   :  { %3614 = vmatpush3.bf16.msra.mxu0 %v1138_v28 }
 0x61f   :  { %3625 = vmatprep.subr.bf16.mxu0 %v4353_v15 }
 0x623   :  { %v3919_v29 = vpop.eup %3918 }
 0x624   :  { %v1130_v30 = vmul.f32 %v3919_v29, %v4846_v51 }
 0x626   :  { %v1131_v33 = vpack.c.bf16 %v1130_v30, %v1130_v30 }
 0x628   :  { %3616 = vmatmul.mubr.msk.bf16.vlgmr.msra.gmra.mrb[28].mxu0 %vm365_vm2, %v1131_v33  ;;  %v1245_v34 = vpop.xlane.xlu1 %1244 }
 0x629   :  { %3920 = vrcp.f32 %v1245_v34  ;;  %3627 = vmatprep.mubr.msk.bf16.mxu0 %vm4354_vm1, %v4353_v15 }
 0x62c   :  { %v1250_v35 = vpop.permute.xlu1 %1249 }
 0x62d   :  { %v1255_v36 = vsel %vm435_vm3, %v1250_v35, 0 }
 0x62e   :  { %3626 = vmatpush3.bf16.msra.mxu0 %v1255_v36 }
 0x62f   :  { %3639 = vmatprep.subr.bf16.mxu0 %v4353_v15 }
 0x633   :  { %v3921_v37 = vpop.eup %3920 }
 0x634   :  { %v1247_v38 = vmul.f32 %v3921_v37, %v4850_v54 }
 0x636   :  { %v1248_v41 = vpack.c.bf16 %v1247_v38, %v1247_v38 }
 0x638   :  { %3628 = vmatmul.mubr.msk.bf16.vlgmr.msra.gmra.mrb[32].mxu0 %vm365_vm2, %v1248_v41 }
 0x639   :  { %3643 = vmatprep.mubr.msk.bf16.mxu0 %vm4354_vm1, %v4353_v15 }
 0x691   :  { %v473_v43 = vpop.f32.mrb[4].mxu0 }
 0x692   :  { %479 = vst.msk [vmem:[#allocation2] sm:$0xff] %vm365_vm2, %v473_v43  ;;  %v3545_v44 = vpop.f32.mrb[5].mxu0 }
 0x693   :  { %v476_v45 = vpop.f32.mrb[6].mxu0 }
 0x694   :  { %v3546_v46 = vpop.f32.mrb[7].mxu0 }
 0x699   :  { %v586_v47 = vpop.f32.mrb[8].mxu0 }
 0x69a   :  { %593 = vrot.lane.b32.xlu0 %v586_v47, %s4346_s29  ;;  %v3557_v48 = vpop.f32.mrb[9].mxu0 }
 0x69b   :  { %v589_v49 = vpop.f32.mrb[10].mxu0  ;;  %v3871_v48 = vld [vmem:[%s5321_s12 + $0x8] sm:$0xff]  }
 0x69c   :  { %v3558_v50 = vpop.f32.mrb[11].mxu0 }
 0x6c6   :  { %v704_v51 = vpop.f32.mrb[12].mxu0 }
 0x6c7   :  { %711 = vrot.lane.b32.xlu0 %v704_v51, %s4339_s25  ;;  %v3569_v52 = vpop.f32.mrb[13].mxu0 }
 0x6c8   :  { %v707_v53 = vpop.f32.mrb[14].mxu0 }
 0x6c9   :  { %v3570_v54 = vpop.f32.mrb[15].mxu0 }
 0x6ce   :  { %v822_v39 = vpop.f32.mrb[16].mxu0 }
 0x6cf   :  { %829 = vrot.lane.b32.xlu0 %v822_v39, %s4366_s30  ;;  %v3581_v55 = vpop.f32.mrb[17].mxu0 }
 0x6d0   :  { %v825_v56 = vpop.f32.mrb[18].mxu0 }
 0x6d1   :  { %v3582_v57 = vpop.f32.mrb[19].mxu0  ;;  %v3343_v56 = vld [vmem:[#allocation16] ss:$0 sm:$0xff] }
 0x6d6   :  { %v944_v58 = vpop.f32.mrb[20].mxu0 }
 0x6d7   :  { %950 = vst.msk [vmem:[#allocation2 + $0x8] sm:$0xff] %vm365_vm2, %v944_v58  ;;  %v3593_v59 = vpop.f32.mrb[21].mxu0 }
 0x6d8   :  { %v947_v60 = vpop.f32.mrb[22].mxu0 }
 0x6d9   :  { %v3594_v61 = vpop.f32.mrb[23].mxu0  ;;  %v3344_v60 = vld [vmem:[#allocation18] ss:$0 sm:$0xff] }
 0x6de   :  { %v1057_v62 = vpop.f32.mrb[24].mxu0 }
 0x6df   :  { %1064 = vrot.lane.b32.xlu1 %v1057_v62, %s4346_s29  ;;  %v3605_v42 = vpop.f32.mrb[25].mxu0 }
 0x6e0   :  { %v1060_v63 = vpop.f32.mrb[26].mxu0 }
 0x6e1   :  { %v3606_v0 = vpop.f32.mrb[27].mxu0 }
 0x6e2   :  { %v3872_v0 = vld [vmem:[%s5323_s14] sm:$0xff]  }
 0x6fb   :  { %v1174_v2 = vpop.f32.mrb[28].mxu0 }
 0x6fc   :  { %1181 = vrot.lane.b32.xlu1 %v1174_v2, %s4339_s25  ;;  %v3617_v3 = vpop.f32.mrb[29].mxu0  ;;  %v3873_v2 = vld [vmem:[%s5323_s14 + $0x8] sm:$0xff]  }
 0x6fd   :  { %v1177_v4 = vpop.f32.mrb[30].mxu0  ;;  %v3874_v3 = vld [vmem:[%s5323_s14 + $0x10] sm:$0xff]  }
 0x6fe   :  { %v3618_v6 = vpop.f32.mrb[31].mxu0  ;;  %v3875_v4 = vld [vmem:[%s5323_s14 + $0x18] sm:$0xff]  }
 0x6ff   :  { %v3345_v6 = vld [vmem:[#allocation19] ss:$0 sm:$0xff] }
 0x70b   :  { %v1291_v9 = vpop.f32.mrb[32].mxu0 }
 0x70c   :  { %v594_v10 = vpop.permute.xlu0 %593  ;;  %1298 = vrot.lane.b32.xlu1 %v1291_v9, %s4366_s30  ;;  %v3629_v12 = vpop.f32.mrb[33].mxu0 }
 0x70d   :  { %597 = vst.msk [vmem:[#allocation2] sm:$0xff] %vm596_vm4, %v594_v10  ;;  %v1294_v13 = vpop.f32.mrb[34].mxu0 }
 0x70e   :  { %v3630_v14 = vpop.f32.mrb[35].mxu0 }
 0x739   :  { %v712_v16 = vpop.permute.xlu0 %711 }
 0x73a   :  { %715 = vst.msk [vmem:[#allocation2] sm:$0xff] %vm714_vm5, %v712_v16 }
 0x741   :  { %v830_v17 = vpop.permute.xlu0 %829 }
 0x742   :  { %833 = vst.msk [vmem:[#allocation2] sm:$0xff] %vm832_vm6, %v830_v17 }
 0x749   :  { %v1302_v21 = vld [vmem:[#allocation2] sm:$0xff] }
 0x751   :  { %v1065_v18 = vpop.permute.xlu1 %1064 }
 0x752   :  { %1067 = vst.msk [vmem:[#allocation2 + $0x8] sm:$0xff] %vm596_vm4, %v1065_v18 }
 0x76e   :  { %v1182_v20 = vpop.permute.xlu1 %1181 }
 0x76f   :  { %1184 = vst.msk [vmem:[#allocation2 + $0x8] sm:$0xff] %vm714_vm5, %v1182_v20 }
 0x77e   :  { %v1299_v11 = vpop.permute.xlu1 %1298 }
 0x77f   :  { %1301 = vst.msk [vmem:[#allocation2 + $0x8] sm:$0xff] %vm832_vm6, %v1299_v11 }
 0x786   :  { %v1303_v22 = vld [vmem:[#allocation2 + $0x8] sm:$0xff] }
 0x787   :  { %v1304_v23 = vpack.c.bf16 %v1303_v22, %v1302_v21 }
 0x789   :  { %3636 = vmatmul.mubr.msk.bf16.vlgmr.msra.gmra.mrb[32].mxu1 %vm248_vm0, %v1304_v23 }
 0x78a   :  { %3655 = vmatprep.mubr.msk.bf16.mxu1 %vm4354_vm1, %v4353_v15  ;;  %3648 = vmatpush3.bf16.msra.mxu1 %v3872_v0  ;;  %v3355_v0 = vld [vmem:[#allocation22] ss:$0 sm:$0xff] }
 0x78b   :  { %3649 = vmatprep.subr.bf16.mxu1 %v4353_v15 }
 0x78e   :  { %3650 = vmatpush3.bf16.msra.mxu1 %v3873_v2 }
 0x78f   :  { %3651 = vmatprep.subr.bf16.mxu1 %v4353_v15 }
 0x792   :  { %3652 = vmatpush3.bf16.msra.mxu1 %v3874_v3 }
 0x793   :  { %3653 = vmatprep.subr.bf16.mxu1 %v4353_v15 }
 0x796   :  { %3654 = vmatpush3.bf16.msra.mxu1 %v3875_v4 }
 0x797   :  { %3673 = vmatprep.subr.bf16.mxu1 %v4353_v15 }
 0x85c   :  { %v1365_v25 = vpop.f32.mrb[32].mxu1 }
 0x85d   :  { %v1366_v19 = vadd.f32 %v3339_v24, %v1365_v25  ;;  %v3637_v26 = vpop.f32.mrb[33].mxu1 }
 0x85e   :  { %v1368_v27 = vpop.f32.mrb[34].mxu1 }
 0x85f   :  { %v1369_v28 = vadd.f32 %v3339_v24, %v1368_v27  ;;  %v3638_v29 = vpop.f32.mrb[35].mxu1  ;;  %v1372_v30 = vadd.f32 %v1366_v19, %v4692_v31 }
 0x861   :  { %v1376_v33 = vsel %vm248_vm0, %v1372_v30, 0.0  ;;  %v1373_v34 = vadd.f32 %v1369_v28, %v4694_v32  ;;  %v3870_v32 = vld [vmem:[%s5321_s12] sm:$0xff]  }
 0x862   :  { %1377 = vadd.xlane.f32.xlu0 %v1376_v33  ;;  %3640 = vmatpush3.bf16.msra.mxu0 %v3870_v32 }
 0x863   :  { %v1379_v35 = vsel %vm248_vm0, %v1373_v34, 0.0  ;;  %3641 = vmatprep.subr.bf16.mxu0 %v4353_v15 }
 0x864   :  { %1380 = vadd.xlane.f32.xlu1 %v1379_v35  ;;  %v3349_v35 = vld [vmem:[#allocation21] ss:$0 sm:$0xff] }
 0x866   :  { %3642 = vmatpush3.bf16.msra.mxu0 %v3871_v48 }
 0x867   :  { %3659 = vmatprep.subr.bf16.mxu0 %v4353_v15 }
 0x8ef   :  { %v1378_v36 = vpop.xlane.xlu0 %1377 }
 0x8f0   :  { %v1382_v37 = vmul.f32 0.03125, %v1378_v36 }
 0x8f1   :  { %v1381_v38 = vpop.xlane.xlu1 %1380 }
 0x8f2   :  { %v1384_v41 = vsub.f32 %v1372_v30, %v1382_v37  ;;  %v1383_v43 = vmul.f32 0.03125, %v1381_v38 }
 0x8f4   :  { %v1385_v44 = vsub.f32 %v1373_v34, %v1383_v43  ;;  %v1386_v45 = vmul.f32 %v1384_v41, %v1384_v41 }
 0x8f6   :  { %v1388_v46 = vsel %vm248_vm0, %v1386_v45, 0.0  ;;  %v1387_v47 = vmul.f32 %v1385_v44, %v1385_v44 }
 0x8f7   :  { %1389 = vadd.xlane.f32.xlu0 %v1388_v46 }
 0x8f8   :  { %v1391_v31 = vsel %vm248_vm0, %v1387_v47, 0.0 }
 0x8fb   :  { %1392 = vadd.xlane.f32.xlu0 %v1391_v31 }
 0x984   :  { %v1390_v49 = vpop.xlane.xlu0 %1389 }
 0x985   :  { %v1394_v50 = vmul.f32 0.03125, %v1390_v49 }
 0x987   :  { %v1396_v51 = vadd.f32 1e-12, %v1394_v50 }
 0x988   :  { %v1393_v52 = vpop.xlane.xlu0 %1392 }
 0x989   :  { %3922 = vrsqrt.f32 %v1396_v51  ;;  %v1395_v53 = vmul.f32 0.03125, %v1393_v52 }
 0x98b   :  { %v1397_v54 = vadd.f32 1e-12, %v1395_v53 }
 0x98d   :  { %3924 = vrsqrt.f32 %v1397_v54 }
 0x993   :  { %v3923_v39 = vpop.eup %3922 }
 0x994   :  { %v1400_v55 = vmul.f32 %v3923_v39, %v1384_v41 }
 0x996   :  { %v1408_v58 = vmul.f32 %v3343_v56, %v1400_v55 }
 0x997   :  { %v3925_v57 = vpop.eup %3924 }
 0x998   :  { %v1401_v59 = vmul.f32 %v3925_v57, %v1385_v44  ;;  %v1416_v62 = vadd.f32 %v3344_v60, %v1408_v58  ;;  %v3877_v57 = vld [vmem:[%s5358_s26 + $0x18] sm:$0xff]  }
 0x99a   :  { %v1409_v61 = vmul.f32 %v3343_v56, %v1401_v59  ;;  %v3876_v56 = vld [vmem:[%s5358_s26 + $0x10] sm:$0xff]  }
 0x99c   :  { %v1417_v42 = vadd.f32 %v3344_v60, %v1409_v61 }
 0x99e   :  { %v1418_v63 = vpack.c.bf16 %v1417_v42, %v1416_v62 }
 0x9a0   :  { %3644 = vmatmul.mubr.msk.bf16.vlgmr.msra.gmra.mrb[36].mxu0 %vm248_vm0, %v1418_v63 }
 0x9a1   :  { %3663 = vmatprep.mubr.msk.bf16.mxu0 %vm4354_vm1, %v4353_v15  ;;  %3660 = vmatpush3.bf16.msra.mxu0 %v3876_v56 }
 0x9a2   :  { %3661 = vmatprep.subr.bf16.mxu0 %v4353_v15 }
 0x9a5   :  { %3662 = vmatpush3.bf16.msra.mxu0 %v3877_v57 }
 0x9a6   :  { %3667 = vmatprep.subr.bf16.mxu0 %v4353_v15 }
 0xa73   :  { %v1479_v7 = vpop.f32.mrb[36].mxu0 }
 0xa74   :  { %v1480_v8 = vadd.f32 %v3345_v6, %v1479_v7  ;;  %v3645_v9 = vpop.f32.mrb[37].mxu0  ;;  %v3356_v7 = vld [vmem:[%s5326_s17] ss:$0 sm:$0xff] }
 0xa75   :  { %v1482_v10 = vpop.f32.mrb[38].mxu0 }
 0xa76   :  { %v1488_v12 = vmul.f32 0.044715, %v1480_v8  ;;  %v1483_v13 = vadd.f32 %v3345_v6, %v1482_v10  ;;  %v3646_v14 = vpop.f32.mrb[39].mxu0  ;;  %v1486_v27 = vmul.f32 0.5, %v1480_v8 }
 0xa78   :  { %v1490_v16 = vmul.f32 %v1488_v12, %v1480_v8  ;;  %v1489_v17 = vmul.f32 0.044715, %v1483_v13  ;;  %v1487_v28 = vmul.f32 0.5, %v1483_v13 }
 0xa7a   :  { %v1492_v18 = vmul.f32 %v1490_v16, %v1480_v8  ;;  %v1491_v20 = vmul.f32 %v1489_v17, %v1483_v13 }
 0xa7c   :  { %v1494_v11 = vadd.f32 %v1492_v18, %v1480_v8  ;;  %v1493_v21 = vmul.f32 %v1491_v20, %v1483_v13 }
 0xa7e   :  { %v1496_v22 = vmul.f32 0.7978846, %v1494_v11  ;;  %v1495_v23 = vadd.f32 %v1493_v21, %v1483_v13  ;;  %v3361_v13 = vld [vmem:[#allocation13 + $0x1] ss:$0 sm:$0xff] }
 0xa80   :  { %3926 = vtanh.f32 %v1496_v22  ;;  %v1497_v24 = vmul.f32 0.7978846, %v1495_v23 }
 0xa82   :  { %3928 = vtanh.f32 %v1497_v24 }
 0xa8a   :  { %v3927_v25 = vpop.eup %3926 }
 0xa8b   :  { %v1500_v19 = vadd.f32 1.0, %v3927_v25 }
 0xa8c   :  { %v3929_v26 = vpop.eup %3928 }
 0xa8d   :  { %v1501_v29 = vadd.f32 1.0, %v3929_v26  ;;  %v1502_v30 = vmul.f32 %v1500_v19, %v1486_v27 }
 0xa8f   :  { %v1503_v33 = vmul.f32 %v1501_v29, %v1487_v28 }
 0xa91   :  { %v1504_v34 = vpack.c.bf16 %v1503_v33, %v1502_v30 }
 0xa93   :  { %3656 = vmatmul.mubr.msk.bf16.vlgmr.msra.gmra.mrb[36].mxu1 %vm1544_vm7, %v1504_v34 }
 0xa94   :  { %3675 = vmatprep.mubr.msk.bf16.mxu1 %vm4354_vm1, %v4353_v15 }
 0xb66   :  { %v1582_v36 = vpop.f32.mrb[36].mxu1 }
 0xb67   :  { %v1583_v37 = vadd.f32 %v3349_v35, %v1582_v36  ;;  %v3657_v38 = vpop.f32.mrb[37].mxu1 }
 0xb68   :  { %v1585_v41 = vpop.f32.mrb[38].mxu1 }
 0xb69   :  { %v1586_v43 = vadd.f32 %v3349_v35, %v1585_v41  ;;  %v3658_v44 = vpop.f32.mrb[39].mxu1  ;;  %v1589_v45 = vadd.f32 %v1583_v37, %v1416_v62 }
 0xb6b   :  { %v1593_v46 = vsel %vm248_vm0, %v1589_v45, 0.0  ;;  %v1590_v47 = vadd.f32 %v1586_v43, %v1417_v42 }
 0xb6c   :  { %1594 = vadd.xlane.f32.xlu0 %v1593_v46 }
 0xb6d   :  { %v1596_v31 = vsel %vm248_vm0, %v1590_v47, 0.0 }
 0xb6e   :  { %1597 = vadd.xlane.f32.xlu1 %v1596_v31 }
 0xbf9   :  { %v1595_v32 = vpop.xlane.xlu0 %1594 }
 0xbfa   :  { %v1599_v48 = vmul.f32 0.03125, %v1595_v32 }
 0xbfb   :  { %v1598_v49 = vpop.xlane.xlu1 %1597 }
 0xbfc   :  { %v1601_v50 = vsub.f32 %v1589_v45, %v1599_v48  ;;  %v1600_v51 = vmul.f32 0.03125, %v1598_v49 }
 0xbfe   :  { %v1602_v52 = vsub.f32 %v1590_v47, %v1600_v51  ;;  %v1603_v53 = vmul.f32 %v1601_v50, %v1601_v50 }
 0xc00   :  { %v1605_v54 = vsel %vm248_vm0, %v1603_v53, 0.0  ;;  %v1604_v39 = vmul.f32 %v1602_v52, %v1602_v52 }
 0xc01   :  { %1606 = vadd.xlane.f32.xlu0 %v1605_v54 }
 0xc02   :  { %v1608_v55 = vsel %vm248_vm0, %v1604_v39, 0.0 }
 0xc03   :  { %1609 = vadd.xlane.f32.xlu1 %v1608_v55 }
 0xc8e   :  { %v1607_v58 = vpop.xlane.xlu0 %1606 }
 0xc8f   :  { %v1611_v59 = vmul.f32 0.03125, %v1607_v58 }
 0xc90   :  { %v1610_v60 = vpop.xlane.xlu1 %1609 }
 0xc91   :  { %v1613_v61 = vadd.f32 1e-12, %v1611_v59  ;;  %v1612_v62 = vmul.f32 0.03125, %v1610_v60 }
 0xc93   :  { %3930 = vrsqrt.f32 %v1613_v61  ;;  %v1614_v42 = vadd.f32 1e-12, %v1612_v62 }
 0xc95   :  { %3932 = vrsqrt.f32 %v1614_v42 }
 0xc9d   :  { %v3931_v63 = vpop.eup %3930 }
 0xc9e   :  { %v1617_v2 = vmul.f32 %v3931_v63, %v1601_v50 }
 0xc9f   :  { %v3933_v3 = vpop.eup %3932 }
 0xca0   :  { %v1625_v4 = vmul.f32 %v3355_v0, %v1617_v2  ;;  %v1618_v6 = vmul.f32 %v3933_v3, %v1602_v52 }
 0xca2   :  { %v1626_v8 = vmul.f32 %v3355_v0, %v1618_v6  ;;  %v4979_v9 = vadd.f32 %v3356_v7, %v1625_v4 }
 0xca4   :  { %v4981_v10 = vadd.f32 %v3356_v7, %v1626_v8 }
 0xca6   :  { %v1635_v12 = vpack.c.bf16 %v4981_v10, %v4979_v9 }
 0xca8   :  { %3664 = vmatmul.mubr.msk.bf16.vlgmr.msra.gmra.mrb[40].mxu0 %vm248_vm0, %v1635_v12 }
 0xca9   :  { %3669 = vmatprep.mubr.msk.bf16.mxu0 %vm4354_vm1, %v4353_v15 }
 0xd7b   :  { %v1698_v14 = vpop.f32.mrb[40].mxu0 }
 0xd7c   :  { %v1699_v16 = vadd.f32 %v3361_v13, %v1698_v14  ;;  %v3665_v17 = vpop.f32.mrb[41].mxu0 }
 0xd7d   :  { %v1701_v18 = vpop.f32.mrb[42].mxu0 }
 0xd7e   :  { %v4988_v20 = vpack.c.bf16 %v1699_v16, %v1699_v16  ;;  %v3666_v11 = vpop.f32.mrb[43].mxu0  ;;  %v1702_v21 = vadd.f32 %v3361_v13, %v1701_v18 }
 0xd80   :  { %1820 = vrot.lane.b32.xlu1 %v4988_v20, %s4355_s28  ;;  %1707 = vrot.lane.b32.xlu0 %v4988_v20, %s4356_s1  ;;  %v5002_v22 = vpack.c.bf16 %v1702_v21, %v1702_v21 }
 0xd84   :  { %1818 = vrot.lane.b32.xlu1 %v4988_v20, %s4357_s3  ;;  %1935 = vrot.lane.b32.xlu0 %v4988_v20, %s4358_s27 }
 0xd88   :  { %1937 = vrot.lane.b32.xlu1 %v4988_v20, %s4359_s11  ;;  %2052 = vrot.lane.b32.xlu0 %v4988_v20, %s4360_s24 }
 0xd8c   :  { %2054 = vrot.lane.b32.xlu1 %v4988_v20, %s4361_s7  ;;  %2284 = vrot.lane.b32.xlu0 %v5002_v22, %s4355_s28 }
 0xd90   :  { %2401 = vrot.lane.b32.xlu0 %v5002_v22, %s4359_s11  ;;  %2171 = vrot.lane.b32.xlu1 %v5002_v22, %s4356_s1  ;;  %s5359_s1 = sld [smem:[#allocation39_spill]] }
 0xd94   :  { %2518 = vrot.lane.b32.xlu0 %v5002_v22, %s4361_s7  ;;  %2282 = vrot.lane.b32.xlu1 %v5002_v22, %s4357_s3  ;;  %s4369_s3 = smov [#allocation26]  }
 0xd98   :  { %2399 = vrot.lane.b32.xlu1 %v5002_v22, %s4358_s27  ;;  %s3298_s27 = sshll.u32 %s4369_s3, 4  ;;  %s3299_s27 = int_to_ptr.vmem [resolvable:$true] %s3298_s27 }
 0xd99   :  { %p4279_p7 = scmp.lt.s32.totalorder %s3299_s27, %s3299_s27 }
 0xd9c   :  { %2516 = vrot.lane.b32.xlu1 %v5002_v22, %s4360_s24 }
 0xda0   :  { %1882 = vrot.lane.b32.xlu1 %v4988_v20, %s4362_s10 }
 0xdf2   :  { %v1708_v23 = vpop.permute.xlu0 %1707  ;;  %v1821_v25 = vpop.permute.xlu1 %1820 }
 0xdf3   :  { %v1713_v24 = vsel %vm365_vm2, %v1708_v23, 0  ;;  %v1826_v26 = vsel %vm365_vm2, %v1821_v25, 0 }
 0xdf4   :  { %3668 = vmatpush3.bf16.xpose.msra.mxu0 %v1713_v24 }
 0xdf5   :  { %3679 = vmatprep.subr.bf16.mxu0 %v4353_v15 }
 0xdf6   :  { %v1819_v19 = vpop.permute.xlu1 %1818  ;;  %v1936_v30 = vpop.permute.xlu0 %1935 }
 0xdfa   :  { %v1938_v27 = vpop.permute.xlu1 %1937  ;;  %v2053_v35 = vpop.permute.xlu0 %2052 }
 0xdfb   :  { %3670 = vmatmul.mubr.msk.bf16.vlgmr.msra.gmra.mrb[44].mxu0 %vm365_vm2, %v4988_v20  ;;  %v1943_v28 = vsel %vm365_vm2, %v1938_v27, 0 }
 0xdfc   :  { %3680 = vmatpush3.bf16.xpose.msra.mxu0 %v1826_v26  ;;  %3681 = vmatprep.mubr.msk.bf16.mxu0 %vm4354_vm1, %v4353_v15 }
 0xdfd   :  { %3691 = vmatprep.subr.bf16.mxu0 %v4353_v15 }
 0xdfe   :  { %v2055_v29 = vpop.permute.xlu1 %2054  ;;  %v2285_v37 = vpop.permute.xlu0 %2284 }
 0xdff   :  { %v2060_v33 = vsel %vm365_vm2, %v2055_v29, 0  ;;  %v2290_v38 = vsel %vm365_vm2, %v2285_v37, 0 }
 0xe02   :  { %v2172_v34 = vpop.permute.xlu1 %2171  ;;  %v2402_v41 = vpop.permute.xlu0 %2401 }
 0xe03   :  { %3682 = vmatmul.mubr.msk.bf16.vlgmr.msra.gmra.mrb[48].mxu0 %vm365_vm2, %v1819_v19  ;;  %v2177_v36 = vsel %vm365_vm2, %v2172_v34, 0  ;;  %v2407_v44 = vsel %vm365_vm2, %v2402_v41, 0 }
 0xe04   :  { %3692 = vmatpush3.bf16.xpose.msra.mxu0 %v1943_v28  ;;  %3693 = vmatprep.mubr.msk.bf16.mxu0 %vm4354_vm1, %v4353_v15 }
 0xe05   :  { %3703 = vmatprep.subr.bf16.mxu0 %v4353_v15 }
 0xe06   :  { %v2283_v43 = vpop.permute.xlu1 %2282  ;;  %v2519_v45 = vpop.permute.xlu0 %2518 }
 0xe07   :  { %v2524_v47 = vsel %vm365_vm2, %v2519_v45, 0 }
 0xe0a   :  { %v2400_v46 = vpop.permute.xlu1 %2399 }
 0xe0b   :  { %3694 = vmatmul.mubr.msk.bf16.vlgmr.msra.gmra.mrb[52].mxu0 %vm365_vm2, %v1936_v30 }
 0xe0c   :  { %3704 = vmatpush3.bf16.xpose.msra.mxu0 %v2060_v33  ;;  %3705 = vmatprep.mubr.msk.bf16.mxu0 %vm4354_vm1, %v4353_v15 }
 0xe0d   :  { %3715 = vmatprep.subr.bf16.mxu0 %v4353_v15 }
 0xe0e   :  { %v2517_v31 = vpop.permute.xlu1 %2516 }
 0xe13   :  { %3706 = vmatmul.mubr.msk.bf16.vlgmr.msra.gmra.mrb[56].mxu0 %vm365_vm2, %v2053_v35 }
 0xe14   :  { %3716 = vmatpush3.bf16.xpose.msra.mxu0 %v2177_v36  ;;  %3717 = vmatprep.mubr.msk.bf16.mxu0 %vm4354_vm1, %v4353_v15 }
 0xe15   :  { %3727 = vmatprep.subr.bf16.mxu0 %v4353_v15 }
 0xe1b   :  { %3718 = vmatmul.mubr.msk.bf16.vlgmr.msra.gmra.mrb[60].mxu0 %vm365_vm2, %v5002_v22 }
 0xe1c   :  { %3728 = vmatpush3.bf16.xpose.msra.mxu0 %v2290_v38  ;;  %3729 = vmatprep.mubr.msk.bf16.mxu0 %vm4354_vm1, %v4353_v15 }
 0xe1d   :  { %3739 = vmatprep.subr.bf16.mxu0 %v4353_v15 }
 0xe23   :  { %3730 = vmatmul.mubr.msk.bf16.vlgmr.msra.gmra.mrb[64].mxu0 %vm365_vm2, %v2283_v43 }
 0xe24   :  { %3740 = vmatpush3.bf16.xpose.msra.mxu0 %v2407_v44  ;;  %3741 = vmatprep.mubr.msk.bf16.mxu0 %vm4354_vm1, %v4353_v15 }
 0xe25   :  { %3751 = vmatprep.subr.bf16.mxu0 %v4353_v15 }
 0xe2b   :  { %3742 = vmatmul.mubr.msk.bf16.vlgmr.msra.gmra.mrb[68].mxu0 %vm365_vm2, %v2400_v46 }
 0xe2c   :  { %3752 = vmatpush3.bf16.xpose.msra.mxu0 %v2524_v47  ;;  %3753 = vmatprep.mubr.msk.bf16.mxu0 %vm4354_vm1, %v4353_v15 }
 0xe2d   :  { %3763 = vmatprep.subr.bf16.mxu0 %v4353_v15 }
 0xe33   :  { %3754 = vmatmul.mubr.msk.bf16.vlgmr.msra.gmra.mrb[72].mxu0 %vm365_vm2, %v2517_v31 }
 0xe34   :  { %3767 = vmatprep.mubr.msk.bf16.mxu0 %vm4354_vm1, %v4353_v15 }
 0xece   :  { %v1749_v32 = vpop.f32.mrb[44].mxu0 }
 0xecf   :  { %v1755_v48 = vmul.f32 0.35355338, %v1749_v32  ;;  %v3671_v49 = vpop.f32.mrb[45].mxu0 }
 0xed0   :  { %v1752_v50 = vpop.f32.mrb[46].mxu0  ;;  %v5097_v49 = vpop.permute.xlu1 %1882 }
 0xed1   :  { %v3672_v51 = vpop.f32.mrb[47].mxu0  ;;  %v5065_v52 = vadd.f32 %v1755_v48, %v4778_v5 }
 0xed3   :  { %v1757_v53 = vsel %vm365_vm2, %v5065_v52, -inf }
 0xed4   :  { %1758 = vmax.xlane.f32.xlu0 %v1757_v53 }
 0xed6   :  { %v1862_v54 = vpop.f32.mrb[48].mxu0 }
 0xed7   :  { %v1868_v39 = vmul.f32 0.35355338, %v1862_v54  ;;  %v3683_v55 = vpop.f32.mrb[49].mxu0 }
 0xed8   :  { %v1865_v56 = vpop.f32.mrb[50].mxu0 }
 0xed9   :  { %v3684_v57 = vpop.f32.mrb[51].mxu0  ;;  %v5070_v58 = vadd.f32 %v1868_v39, %v4778_v5 }
 0xedb   :  { %v1870_v59 = vsel %vm365_vm2, %v5070_v58, -inf }
 0xedc   :  { %1871 = vmax.xlane.f32.xlu1 %v1870_v59 }
 0xede   :  { %v1979_v60 = vpop.f32.mrb[52].mxu0 }
 0xedf   :  { %v3695_v61 = vpop.f32.mrb[53].mxu0  ;;  %v1985_v24 = vmul.f32 0.35355338, %v1979_v60 }
 0xee0   :  { %v1982_v62 = vpop.f32.mrb[54].mxu0 }
 0xee1   :  { %v3696_v42 = vpop.f32.mrb[55].mxu0  ;;  %v1986_v27 = vadd.f32 %v1985_v24, %v4778_v5 }
 0xee3   :  { %v1987_v35 = vsel %vm365_vm2, %v1986_v27, -inf }
 0xee6   :  { %v2096_v63 = vpop.f32.mrb[56].mxu0 }
 0xee7   :  { %v3707_v0 = vpop.f32.mrb[57].mxu0  ;;  %v2102_v26 = vmul.f32 0.35355338, %v2096_v63 }
 0xee8   :  { %v2099_v2 = vpop.f32.mrb[58].mxu0 }
 0xee9   :  { %v3708_v3 = vpop.f32.mrb[59].mxu0  ;;  %v2103_v36 = vadd.f32 %v2102_v26, %v4778_v5 }
 0xeea   :  { %1769 = vrot.lane.b32.xlu0 %v4988_v20, %s4363_s0 }
 0xeeb   :  { %v2104_v44 = vsel %vm365_vm2, %v2103_v36, -inf }
 0xeee   :  { %v2213_v4 = vpop.f32.mrb[60].mxu0 }
 0xeef   :  { %v3719_v6 = vpop.f32.mrb[61].mxu0  ;;  %v2219_v33 = vmul.f32 0.35355338, %v2213_v4 }
 0xef0   :  { %v2216_v7 = vpop.f32.mrb[62].mxu0 }
 0xef1   :  { %v3720_v8 = vpop.f32.mrb[63].mxu0  ;;  %v2220_v45 = vadd.f32 %v2219_v33, %v4792_v40 }
 0xef3   :  { %v2221_v46 = vsel %vm365_vm2, %v2220_v45, -inf }
 0xef6   :  { %v2326_v12 = vpop.f32.mrb[64].mxu0 }
 0xef7   :  { %v2332_v13 = vmul.f32 0.35355338, %v2326_v12  ;;  %v3731_v14 = vpop.f32.mrb[65].mxu0 }
 0xef8   :  { %v2329_v16 = vpop.f32.mrb[66].mxu0 }
 0xef9   :  { %v3732_v17 = vpop.f32.mrb[67].mxu0  ;;  %v5077_v18 = vadd.f32 %v2332_v13, %v4792_v40 }
 0xefb   :  { %v2334_v11 = vsel %vm365_vm2, %v5077_v18, -inf }
 0xefc   :  { %2335 = vmax.xlane.f32.xlu1 %v2334_v11 }
 0xefe   :  { %v2443_v21 = vpop.f32.mrb[68].mxu0 }
 0xeff   :  { %v3743_v23 = vpop.f32.mrb[69].mxu0  ;;  %v2449_v43 = vmul.f32 0.35355338, %v2443_v21 }
 0xf00   :  { %v2446_v25 = vpop.f32.mrb[70].mxu0 }
 0xf01   :  { %v3744_v19 = vpop.f32.mrb[71].mxu0  ;;  %v2450_v47 = vadd.f32 %v2449_v43, %v4792_v40 }
 0xf03   :  { %v2451_v5 = vsel %vm365_vm2, %v2450_v47, -inf }
 0xf06   :  { %v2560_v28 = vpop.f32.mrb[72].mxu0 }
 0xf07   :  { %v2566_v29 = vmul.f32 0.35355338, %v2560_v28  ;;  %v3755_v30 = vpop.f32.mrb[73].mxu0 }
 0xf08   :  { %v2563_v34 = vpop.f32.mrb[74].mxu0 }
 0xf09   :  { %1988 = vmax.xlane.f32.xlu0 %v1987_v35  ;;  %v3756_v37 = vpop.f32.mrb[75].mxu0  ;;  %v5085_v38 = vadd.f32 %v2566_v29, %v4792_v40 }
 0xf0b   :  { %v2568_v41 = vsel %vm365_vm2, %v5085_v38, -inf }
 0xf0c   :  { %2569 = vmax.xlane.f32.xlu1 %v2568_v41 }
 0xf0d   :  { %2105 = vmax.xlane.f32.xlu0 %v2104_v44 }
 0xf11   :  { %2222 = vmax.xlane.f32.xlu0 %v2221_v46 }
 0xf15   :  { %2452 = vmax.xlane.f32.xlu0 %v2451_v5 }
 0xf2b   :  { %1999 = vrot.lane.b32.xlu0 %v4988_v20, %s4364_s9 }
 0xf61   :  { %v1759_v31 = vpop.xlane.xlu0 %1758 }
 0xf62   :  { %v1760_v32 = vsub.f32 %v5065_v52, %v1759_v31 }
 0xf64   :  { %v1761_v48 = vmul.f32 1.442695, %v1760_v32 }
 0xf65   :  { %v1770_v50 = vpop.permute.xlu0 %1769 }
 0xf66   :  { %3934 = vpow2.f32 %v1761_v48  ;;  %v1775_v51 = vsel %vm435_vm3, %v1770_v50, 0 }
 0xf67   :  { %3674 = vmatpush3.bf16.msra.mxu1 %v1775_v51 }
 0xf68   :  { %3685 = vmatprep.subr.bf16.mxu1 %v4353_v15 }
 0xf69   :  { %v1872_v40 = vpop.xlane.xlu1 %1871 }
 0xf6a   :  { %v1873_v53 = vsub.f32 %v5070_v58, %v1872_v40 }
 0xf6c   :  { %v1874_v54 = vmul.f32 1.442695, %v1873_v53 }
 0xf6e   :  { %3936 = vpow2.f32 %v1874_v54 }
 0xf70   :  { %v3935_v39 = vpop.eup %3934 }
 0xf71   :  { %v1763_v55 = vsel %vm365_vm2, %v3935_v39, 0.0 }
 0xf72   :  { %1764 = vadd.xlane.f32.xlu0 %v1763_v55 }
 0xf78   :  { %v5103_v52 = vpop.eup %3936 }
 0xf79   :  { %v1876_v56 = vsel %vm365_vm2, %v5103_v52, 0.0 }
 0xf7a   :  { %1877 = vadd.xlane.f32.xlu1 %v1876_v56 }
 0xf89   :  { %v2336_v42 = vpop.xlane.xlu1 %2335 }
 0xf8a   :  { %v2337_v2 = vsub.f32 %v5077_v18, %v2336_v42 }
 0xf8b   :  { %2233 = vrot.lane.b32.xlu1 %v5002_v22, %s4363_s0 }
 0xf8c   :  { %v2338_v6 = vmul.f32 1.442695, %v2337_v2 }
 0xf96   :  { %v1989_v57 = vpop.xlane.xlu0 %1988 }
 0xf97   :  { %v1990_v59 = vsub.f32 %v1986_v27, %v1989_v57 }
 0xf99   :  { %v1991_v60 = vmul.f32 1.442695, %v1990_v59  ;;  %v2570_v23 = vpop.xlane.xlu1 %2569 }
 0xf9a   :  { %v2106_v61 = vpop.xlane.xlu0 %2105  ;;  %v2571_v24 = vsub.f32 %v5085_v38, %v2570_v23 }
 0xf9b   :  { %3938 = vpow2.f32 %v1991_v60  ;;  %v2107_v58 = vsub.f32 %v2103_v36, %v2106_v61  ;;  %v1888_v36 = vsel %vm435_vm3, %v5097_v49, 0 }
 0xf9c   :  { %v2572_v19 = vmul.f32 1.442695, %v2571_v24 }
 0xf9d   :  { %v2108_v62 = vmul.f32 1.442695, %v2107_v58 }
 0xf9e   :  { %v2223_v63 = vpop.xlane.xlu0 %2222 }
 0xf9f   :  { %v2224_v0 = vsub.f32 %v2220_v45, %v2223_v63  ;;  %3940 = vpow2.f32 %v2108_v62 }
 0xfa1   :  { %v2225_v3 = vmul.f32 1.442695, %v2224_v0 }
 0xfa2   :  { %v2453_v18 = vpop.xlane.xlu0 %2452 }
 0xfa3   :  { %3942 = vpow2.f32 %v2225_v3  ;;  %v2454_v11 = vsub.f32 %v2450_v47, %v2453_v18 }
 0xfa4   :  { %3944 = vpow2.f32 %v2338_v6 }
 0xfa5   :  { %v3939_v4 = vpop.eup %3938  ;;  %v2455_v21 = vmul.f32 1.442695, %v2454_v11 }
 0xfa6   :  { %v1993_v7 = vsel %vm365_vm2, %v3939_v4, 0.0  ;;  %v2000_v28 = vpop.permute.xlu0 %1999 }
 0xfa7   :  { %1994 = vadd.xlane.f32.xlu0 %v1993_v7  ;;  %3946 = vpow2.f32 %v2455_v21  ;;  %v2005_v41 = vsel %vm435_vm3, %v2000_v28, 0 }
 0xfa8   :  { %3948 = vpow2.f32 %v2572_v19 }
 0xfa9   :  { %v5111_v8 = vpop.eup %3940 }
 0xfaa   :  { %v2110_v12 = vsel %vm365_vm2, %v5111_v8, 0.0 }
 0xfad   :  { %v5115_v13 = vpop.eup %3942 }
 0xfae   :  { %v2227_v14 = vsel %vm365_vm2, %v5115_v13, 0.0  ;;  %v5119_v16 = vpop.eup %3944 }
 0xfaf   :  { %2111 = vadd.xlane.f32.xlu1 %v2110_v12  ;;  %v2340_v17 = vsel %vm365_vm2, %v5119_v16, 0.0 }
 0xfb1   :  { %v5128_v25 = vpop.eup %3946 }
 0xfb2   :  { %v2457_v26 = vsel %vm365_vm2, %v5128_v25, 0.0  ;;  %v5132_v27 = vpop.eup %3948 }
 0xfb3   :  { %2228 = vadd.xlane.f32.xlu1 %v2227_v14 }
 0xfb7   :  { %2341 = vadd.xlane.f32.xlu1 %v2340_v17 }
 0xfbd   :  { %2116 = vrot.lane.b32.xlu0 %v4988_v20, %s4365_s4  ;;  %v2574_v20 = vsel %vm365_vm2, %v5132_v27, 0.0 }
 0xfc8   :  { %2346 = vrot.lane.b32.xlu1 %v5002_v22, %s4362_s10 }
 0xfdc   :  { %2458 = vadd.xlane.f32.xlu0 %v2457_v26 }
 0xfec   :  { %2575 = vadd.xlane.f32.xlu1 %v2574_v20 }
 0xff2   :  { %2463 = vrot.lane.b32.xlu0 %v5002_v22, %s4364_s9 }
 0xffd   :  { %2580 = vrot.lane.b32.xlu1 %v5002_v22, %s4365_s4 }
 0xfff   :  { %v1765_v29 = vpop.xlane.xlu0 %1764 }
0x1000   :  { %3950 = vrcp.f32 %v1765_v29 }
0x1007   :  { %v1878_v30 = vpop.xlane.xlu1 %1877 }
0x1008   :  { %3952 = vrcp.f32 %v1878_v30 }
0x100a   :  { %v3951_v33 = vpop.eup %3950 }
0x100b   :  { %v1767_v34 = vmul.f32 %v3951_v33, %v3935_v39  ;;  %v2234_v44 = vpop.permute.xlu1 %2233 }
0x100c   :  { %v2239_v54 = vsel %vm435_vm3, %v2234_v44, 0 }
0x100d   :  { %v1768_v35 = vpack.c.bf16 %v1767_v34, %v1767_v34 }
0x100f   :  { %3676 = vmatmul.mubr.msk.bf16.vlgmr.msra.gmra.mrb[40].mxu1 %vm365_vm2, %v1768_v35 }
0x1010   :  { %3686 = vmatpush3.bf16.msra.mxu1 %v1888_v36  ;;  %3687 = vmatprep.mubr.msk.bf16.mxu1 %vm4354_vm1, %v4353_v15 }
0x1011   :  { %3697 = vmatprep.subr.bf16.mxu1 %v4353_v15 }
0x1012   :  { %v3953_v37 = vpop.eup %3952 }
0x1013   :  { %v1880_v22 = vmul.f32 %v3953_v37, %v5103_v52 }
0x1015   :  { %v1881_v38 = vpack.c.bf16 %v1880_v22, %v1880_v22 }
0x1017   :  { %3688 = vmatmul.mubr.msk.bf16.vlgmr.msra.gmra.mrb[44].mxu1 %vm365_vm2, %v1881_v38 }
0x1018   :  { %3698 = vmatpush3.bf16.msra.mxu1 %v2005_v41  ;;  %3699 = vmatprep.mubr.msk.bf16.mxu1 %vm4354_vm1, %v4353_v15 }
0x1019   :  { %3709 = vmatprep.subr.bf16.mxu1 %v4353_v15 }
0x1034   :  { %v1995_v43 = vpop.xlane.xlu0 %1994 }
0x1035   :  { %3954 = vrcp.f32 %v1995_v43 }
0x1038   :  { %v2117_v31 = vpop.permute.xlu0 %2116 }
0x1039   :  { %v2122_v48 = vsel %vm435_vm3, %v2117_v31, 0 }
0x103c   :  { %v2112_v45 = vpop.xlane.xlu1 %2111 }
0x103d   :  { %3956 = vrcp.f32 %v2112_v45  ;;  %v3878_v45 = vld [vmem:[%s5317_s8 + $0x10] sm:$0xff]  }
0x103e   :  { %3764 = vmatpush3.bf16.msra.mxu0 %v3878_v45 }
0x103f   :  { %v3955_v46 = vpop.eup %3954  ;;  %3765 = vmatprep.subr.bf16.mxu0 %v4353_v15 }
0x1040   :  { %v1997_v47 = vmul.f32 %v3955_v46, %v3939_v4  ;;  %v2229_v5 = vpop.xlane.xlu1 %2228  ;;  %v3879_v46 = vld [vmem:[%s5317_s8 + $0x18] sm:$0xff]   ;;  %s4274_s8 = scalar_lea.vmem %s3299_s27, 32 }
0x1041   :  { %3958 = vrcp.f32 %v2229_v5  ;;  %p4275_p6 = scmp.ne.s32.totalorder %s3299_s27, %s4274_s8  ;;  %p4280_p8 = scmp.lt.s32.totalorder %s4274_s8, %s4274_s8 }
0x1042   :  { %v1998_v32 = vpack.c.bf16 %v1997_v47, %v1997_v47  ;;  %3766 = vmatpush3.bf16.msra.mxu0 %v3879_v46 }
0x1043   :  { %3779 = vmatprep.subr.bf16.mxu0 %v4353_v15  ;;  %p4281_p9 = por %p4280_p8, %p4279_p7 }
0x1044   :  { %3700 = vmatmul.mubr.msk.bf16.vlgmr.msra.gmra.mrb[48].mxu1 %vm365_vm2, %v1998_v32  ;;  %v2342_v49 = vpop.xlane.xlu1 %2341 }
0x1045   :  { %3710 = vmatpush3.bf16.msra.mxu1 %v2122_v48  ;;  %3711 = vmatprep.mubr.msk.bf16.mxu1 %vm4354_vm1, %v4353_v15  ;;  %3960 = vrcp.f32 %v2342_v49  ;;  %p4282_p10 = pnand %p4281_p9, %p4275_p6 }
0x1046   :  { %3721 = vmatprep.subr.bf16.mxu1 %v4353_v15 }
0x1047   :  { %v3957_v50 = vpop.eup %3956 }
0x1048   :  { %v2114_v51 = vmul.f32 %v3957_v50, %v5111_v8  ;;  %v2347_v55 = vpop.permute.xlu1 %2346 }
0x1049   :  { %v2352_v57 = vsel %vm435_vm3, %v2347_v55, 0 }
0x104a   :  { %v2115_v40 = vpack.c.bf16 %v2114_v51, %v2114_v51 }
0x104b   :  { %v3959_v53 = vpop.eup %3958 }
0x104c   :  { %3712 = vmatmul.mubr.msk.bf16.vlgmr.msra.gmra.mrb[52].mxu1 %vm365_vm2, %v2115_v40  ;;  %v2231_v39 = vmul.f32 %v3959_v53, %v5115_v13 }
0x104d   :  { %3722 = vmatpush3.bf16.msra.mxu1 %v2239_v54  ;;  %3723 = vmatprep.mubr.msk.bf16.mxu1 %vm4354_vm1, %v4353_v15 }
0x104e   :  { %3733 = vmatprep.subr.bf16.mxu1 %v4353_v15  ;;  %v2232_v52 = vpack.c.bf16 %v2231_v39, %v2231_v39 }
0x104f   :  { %v3961_v56 = vpop.eup %3960 }
0x1050   :  { %v2344_v59 = vmul.f32 %v3961_v56, %v5119_v16 }
0x1052   :  { %v2345_v60 = vpack.c.bf16 %v2344_v59, %v2344_v59 }
0x1054   :  { %3724 = vmatmul.mubr.msk.bf16.vlgmr.msra.gmra.mrb[56].mxu1 %vm365_vm2, %v2232_v52  ;;  %v3385_v52 = vld [vmem:[#allocation15 + $0x1] ss:$0 sm:$0xff] }
0x1055   :  { %3734 = vmatpush3.bf16.msra.mxu1 %v2352_v57  ;;  %3735 = vmatprep.mubr.msk.bf16.mxu1 %vm4354_vm1, %v4353_v15 }
0x1056   :  { %3745 = vmatprep.subr.bf16.mxu1 %v4353_v15 }
0x105c   :  { %3736 = vmatmul.mubr.msk.bf16.vlgmr.msra.gmra.mrb[60].mxu1 %vm365_vm2, %v2345_v60 }
0x105d   :  { %3747 = vmatprep.mubr.msk.bf16.mxu1 %vm4354_vm1, %v4353_v15 }
0x1069   :  { %v2459_v61 = vpop.xlane.xlu0 %2458 }
0x106a   :  { %3962 = vrcp.f32 %v2459_v61 }
0x106d   :  { %v2464_v58 = vpop.permute.xlu0 %2463 }
0x106e   :  { %v2469_v62 = vsel %vm435_vm3, %v2464_v58, 0 }
0x106f   :  { %3746 = vmatpush3.bf16.msra.mxu1 %v2469_v62 }
0x1070   :  { %3757 = vmatprep.subr.bf16.mxu1 %v4353_v15 }
0x1074   :  { %v3963_v42 = vpop.eup %3962 }
0x1075   :  { %v2461_v63 = vmul.f32 %v3963_v42, %v5128_v25 }
0x1077   :  { %v2462_v0 = vpack.c.bf16 %v2461_v63, %v2461_v63 }
0x1079   :  { %3748 = vmatmul.mubr.msk.bf16.vlgmr.msra.gmra.mrb[64].mxu1 %vm365_vm2, %v2462_v0  ;;  %v2576_v2 = vpop.xlane.xlu1 %2575 }
0x107a   :  { %3964 = vrcp.f32 %v2576_v2  ;;  %3759 = vmatprep.mubr.msk.bf16.mxu1 %vm4354_vm1, %v4353_v15 }
0x107d   :  { %v2581_v3 = vpop.permute.xlu1 %2580 }
0x107e   :  { %v2586_v4 = vsel %vm435_vm3, %v2581_v3, 0 }
0x107f   :  { %3758 = vmatpush3.bf16.msra.mxu1 %v2586_v4 }
0x1080   :  { %3771 = vmatprep.subr.bf16.mxu1 %v4353_v15 }
0x1084   :  { %v3965_v6 = vpop.eup %3964 }
0x1085   :  { %v2578_v7 = vmul.f32 %v3965_v6, %v5132_v27 }
0x1087   :  { %v2579_v8 = vpack.c.bf16 %v2578_v7, %v2578_v7 }
0x1089   :  { %3760 = vmatmul.mubr.msk.bf16.vlgmr.msra.gmra.mrb[68].mxu1 %vm365_vm2, %v2579_v8 }
0x108a   :  { %3775 = vmatprep.mubr.msk.bf16.mxu1 %vm4354_vm1, %v4353_v15 }
0x10e2   :  { %v1811_v12 = vpop.f32.mrb[40].mxu1 }
0x10e3   :  { %1817 = vst.msk [vmem:[#allocation2] sm:$0xff] %vm365_vm2, %v1811_v12  ;;  %v3677_v13 = vpop.f32.mrb[41].mxu1 }
0x10e4   :  { %v1814_v14 = vpop.f32.mrb[42].mxu1 }
0x10e5   :  { %v3678_v16 = vpop.f32.mrb[43].mxu1 }
0x10e6   :  { %v3881_v16 = vld [vmem:[%s5321_s12 + $0x18] sm:$0xff]  }
0x10ea   :  { %v1924_v17 = vpop.f32.mrb[44].mxu1 }
0x10eb   :  { %1931 = vrot.lane.b32.xlu0 %v1924_v17, %s4346_s29  ;;  %v3689_v18 = vpop.f32.mrb[45].mxu1 }
0x10ec   :  { %v1927_v11 = vpop.f32.mrb[46].mxu1 }
0x10ed   :  { %v3690_v21 = vpop.f32.mrb[47].mxu1 }
0x1117   :  { %v2041_v23 = vpop.f32.mrb[48].mxu1 }
0x1118   :  { %2048 = vrot.lane.b32.xlu0 %v2041_v23, %s4339_s25  ;;  %v3701_v24 = vpop.f32.mrb[49].mxu1 }
0x1119   :  { %v2044_v25 = vpop.f32.mrb[50].mxu1 }
0x111a   :  { %v3702_v19 = vpop.f32.mrb[51].mxu1 }
0x111f   :  { %v2158_v26 = vpop.f32.mrb[52].mxu1 }
0x1120   :  { %2165 = vrot.lane.b32.xlu0 %v2158_v26, %s4366_s30  ;;  %v3713_v27 = vpop.f32.mrb[53].mxu1  ;;  %v3389_v26 = vld [vmem:[#allocation16 + $0x1] ss:$0 sm:$0xff] }
0x1121   :  { %v2161_v20 = vpop.f32.mrb[54].mxu1 }
0x1122   :  { %v3714_v28 = vpop.f32.mrb[55].mxu1 }
0x1127   :  { %v2275_v29 = vpop.f32.mrb[56].mxu1 }
0x1128   :  { %2281 = vst.msk [vmem:[#allocation2 + $0x8] sm:$0xff] %vm365_vm2, %v2275_v29  ;;  %v3725_v30 = vpop.f32.mrb[57].mxu1  ;;  %v3390_v29 = vld [vmem:[#allocation18 + $0x1] ss:$0 sm:$0xff] }
0x1129   :  { %v2278_v33 = vpop.f32.mrb[58].mxu1 }
0x112a   :  { %v3726_v34 = vpop.f32.mrb[59].mxu1 }
0x112f   :  { %v2388_v35 = vpop.f32.mrb[60].mxu1 }
0x1130   :  { %2395 = vrot.lane.b32.xlu1 %v2388_v35, %s4346_s29  ;;  %v3737_v36 = vpop.f32.mrb[61].mxu1 }
0x1131   :  { %v2391_v37 = vpop.f32.mrb[62].mxu1  ;;  %v3882_v36 = vld [vmem:[%s5323_s14 + $0x20] sm:$0xff]  }
0x1132   :  { %v3738_v22 = vpop.f32.mrb[63].mxu1  ;;  %v3883_v37 = vld [vmem:[%s5323_s14 + $0x28] sm:$0xff]  }
0x1133   :  { %v3884_v22 = vld [vmem:[%s5323_s14 + $0x30] sm:$0xff]  }
0x114c   :  { %v2505_v38 = vpop.f32.mrb[64].mxu1 }
0x114d   :  { %2512 = vrot.lane.b32.xlu1 %v2505_v38, %s4339_s25  ;;  %v3749_v41 = vpop.f32.mrb[65].mxu1  ;;  %v3885_v38 = vld [vmem:[%s5323_s14 + $0x38] sm:$0xff]  }
0x114e   :  { %v2508_v43 = vpop.f32.mrb[66].mxu1  ;;  %v3395_v41 = vld [vmem:[#allocation19 + $0x1] ss:$0 sm:$0xff] }
0x114f   :  { %v3750_v44 = vpop.f32.mrb[67].mxu1 }
0x115c   :  { %v2622_v47 = vpop.f32.mrb[68].mxu1 }
0x115d   :  { %v1932_v5 = vpop.permute.xlu0 %1931  ;;  %2629 = vrot.lane.b32.xlu1 %v2622_v47, %s4366_s30  ;;  %v3761_v31 = vpop.f32.mrb[69].mxu1 }
0x115e   :  { %1934 = vst.msk [vmem:[#allocation2] sm:$0xff] %vm596_vm4, %v1932_v5  ;;  %v2625_v32 = vpop.f32.mrb[70].mxu1 }
0x115f   :  { %v3762_v48 = vpop.f32.mrb[71].mxu1 }
0x118a   :  { %v2049_v49 = vpop.permute.xlu0 %2048 }
0x118b   :  { %2051 = vst.msk [vmem:[#allocation2] sm:$0xff] %vm714_vm5, %v2049_v49 }
0x1192   :  { %v2166_v50 = vpop.permute.xlu0 %2165 }
0x1193   :  { %2168 = vst.msk [vmem:[#allocation2] sm:$0xff] %vm832_vm6, %v2166_v50 }
0x119a   :  { %v2633_v54 = vld [vmem:[#allocation2] sm:$0xff] }
0x11a2   :  { %v2396_v51 = vpop.permute.xlu1 %2395 }
0x11a3   :  { %2398 = vst.msk [vmem:[#allocation2 + $0x8] sm:$0xff] %vm596_vm4, %v2396_v51 }
0x11bf   :  { %v2513_v40 = vpop.permute.xlu1 %2512 }
0x11c0   :  { %2515 = vst.msk [vmem:[#allocation2 + $0x8] sm:$0xff] %vm714_vm5, %v2513_v40 }
0x11cf   :  { %v2630_v53 = vpop.permute.xlu1 %2629 }
0x11d0   :  { %2632 = vst.msk [vmem:[#allocation2 + $0x8] sm:$0xff] %vm832_vm6, %v2630_v53 }
0x11d7   :  { %v2634_v39 = vld [vmem:[#allocation2 + $0x8] sm:$0xff] }
0x11d8   :  { %v2635_v55 = vpack.c.bf16 %v2634_v39, %v2633_v54 }
0x11da   :  { %3768 = vmatmul.mubr.msk.bf16.vlgmr.msra.gmra.mrb[76].mxu0 %vm248_vm0, %v2635_v55 }
0x11db   :  { %3787 = vmatprep.mubr.msk.bf16.mxu0 %vm4354_vm1, %v4353_v15  ;;  %3780 = vmatpush3.bf16.msra.mxu0 %v3882_v36 }
0x11dc   :  { %3781 = vmatprep.subr.bf16.mxu0 %v4353_v15 }
0x11df   :  { %3782 = vmatpush3.bf16.msra.mxu0 %v3883_v37 }
0x11e0   :  { %3783 = vmatprep.subr.bf16.mxu0 %v4353_v15 }
0x11e3   :  { %3784 = vmatpush3.bf16.msra.mxu0 %v3884_v22 }
0x11e4   :  { %3785 = vmatprep.subr.bf16.mxu0 %v4353_v15 }
0x11e7   :  { %3786 = vmatpush3.bf16.msra.mxu0 %v3885_v38  ;;  %v3414_v38 = vld [vmem:[#allocation22 + $0x1] ss:$0 sm:$0xff] }
0x12ad   :  { %v2698_v56 = vpop.f32.mrb[76].mxu0 }
0x12ae   :  { %v2699_v57 = vadd.f32 %v3385_v52, %v2698_v56  ;;  %v3769_v59 = vpop.f32.mrb[77].mxu0 }
0x12af   :  { %v2701_v60 = vpop.f32.mrb[78].mxu0 }
0x12b0   :  { %v2705_v61 = vadd.f32 %v2699_v57, %v4979_v9  ;;  %v2702_v58 = vadd.f32 %v3385_v52, %v2701_v60  ;;  %v3770_v62 = vpop.f32.mrb[79].mxu0 }
0x12b2   :  { %v2706_v42 = vadd.f32 %v2702_v58, %v4981_v10  ;;  %v2711_v63 = vsel %vm248_vm0, %v2705_v61, 0.0  ;;  %v3880_v10 = vld [vmem:[%s5321_s12 + $0x10] sm:$0xff]  }
0x12b3   :  { %2712 = vadd.xlane.f32.xlu0 %v2711_v63  ;;  %3772 = vmatpush3.bf16.msra.mxu1 %v3880_v10 }
0x12b4   :  { %v2714_v0 = vsel %vm248_vm0, %v2706_v42, 0.0  ;;  %3773 = vmatprep.subr.bf16.mxu1 %v4353_v15 }
0x12b5   :  { %2715 = vadd.xlane.f32.xlu1 %v2714_v0 }
0x12b7   :  { %3774 = vmatpush3.bf16.msra.mxu1 %v3881_v16 }
0x1340   :  { %v2713_v2 = vpop.xlane.xlu0 %2712 }
0x1341   :  { %v2717_v3 = vmul.f32 0.03125, %v2713_v2 }
0x1342   :  { %v2716_v4 = vpop.xlane.xlu1 %2715 }
0x1343   :  { %v2719_v6 = vsub.f32 %v2705_v61, %v2717_v3  ;;  %v2718_v7 = vmul.f32 0.03125, %v2716_v4 }
0x1345   :  { %v2720_v8 = vsub.f32 %v2706_v42, %v2718_v7  ;;  %v2721_v12 = vmul.f32 %v2719_v6, %v2719_v6  ;;  %v3407_v42 = vld [vmem:[#allocation21 + $0x1] ss:$0 sm:$0xff] }
0x1347   :  { %v2723_v13 = vsel %vm248_vm0, %v2721_v12, 0.0  ;;  %v2722_v9 = vmul.f32 %v2720_v8, %v2720_v8 }
0x1348   :  { %2724 = vadd.xlane.f32.xlu0 %v2723_v13 }
0x1349   :  { %v2726_v14 = vsel %vm248_vm0, %v2722_v9, 0.0 }
0x134c   :  { %2727 = vadd.xlane.f32.xlu0 %v2726_v14 }
0x13d5   :  { %v2725_v17 = vpop.xlane.xlu0 %2724 }
0x13d6   :  { %v2729_v18 = vmul.f32 0.03125, %v2725_v17 }
0x13d8   :  { %v2731_v11 = vadd.f32 1e-12, %v2729_v18 }
0x13d9   :  { %v2728_v21 = vpop.xlane.xlu0 %2727 }
0x13da   :  { %3966 = vrsqrt.f32 %v2731_v11  ;;  %v2730_v23 = vmul.f32 0.03125, %v2728_v21 }
0x13dc   :  { %v2732_v24 = vadd.f32 1e-12, %v2730_v23 }
0x13de   :  { %3968 = vrsqrt.f32 %v2732_v24 }
0x13e4   :  { %v3967_v25 = vpop.eup %3966 }
0x13e5   :  { %v2735_v19 = vmul.f32 %v3967_v25, %v2719_v6  ;;  %v2979_v25 = vld [vmem:[%s5327_s18] sm:$0xff] }
0x13e7   :  { %v2743_v20 = vmul.f32 %v3389_v26, %v2735_v19  ;;  %v2980_v19 = vld [vmem:[%s5327_s18 + $0x8] sm:$0xff] }
0x13e8   :  { %v3969_v27 = vpop.eup %3968 }
0x13e9   :  { %v2736_v28 = vmul.f32 %v3969_v27, %v2720_v8  ;;  %v2751_v33 = vadd.f32 %v3390_v29, %v2743_v20  ;;  %v2981_v27 = vld [vmem:[%s5327_s18 + $0x10] sm:$0xff]  ;;  %v2982_v20 = vld [vmem:[%s5327_s18 + $0x18] sm:$0xff] }
0x13eb   :  { %v2744_v30 = vmul.f32 %v3389_v26, %v2736_v28  ;;  %v3819_v26 = vpack.c.bf16 %v2980_v19, %v2979_v25  ;;  %v4367_v28 = vmov 0.0|0.0  }
0x13ec   :  { %3818 = vmatprep.subr.bf16.mxu1 %v4367_v28 }
0x13ed   :  { %v2752_v34 = vadd.f32 %v3390_v29, %v2744_v30  ;;  %v3822_v29 = vpack.c.bf16 %v2982_v20, %v2981_v27 }
0x13ef   :  { %v2753_v35 = vpack.c.bf16 %v2752_v34, %v2751_v33 }
0x13f1   :  { %3776 = vmatmul.mubr.msk.bf16.vlgmr.msra.gmra.mrb[72].mxu1 %vm248_vm0, %v2753_v35 }
0x13f2   :  { %3799 = vmatprep.mubr.msk.f32.mxu1 %vm4354_vm1, %v4353_v15  ;;  %3820 = vmatpush3.bf16.msra.mxu1 %v3819_v26 }
0x13f3   :  { %3821 = vmatprep.subr.bf16.mxu1 %v4367_v28 }
0x13f6   :  { %3823 = vmatpush3.bf16.msra.mxu1 %v3822_v29 }
0x13f7   :  { %3824 = vmatprep.subr.bf16.mxu1 %v4367_v28 }
0x14c4   :  { %v2816_v43 = vpop.f32.mrb[72].mxu1 }
0x14c5   :  { %v2817_v44 = vadd.f32 %v3395_v41, %v2816_v43  ;;  %v3777_v45 = vpop.f32.mrb[73].mxu1 }
0x14c6   :  { %v2819_v46 = vpop.f32.mrb[74].mxu1 }
0x14c7   :  { %v2825_v47 = vmul.f32 0.044715, %v2817_v44  ;;  %v2820_v5 = vadd.f32 %v3395_v41, %v2819_v46  ;;  %v3778_v31 = vpop.f32.mrb[75].mxu1  ;;  %v2823_v57 = vmul.f32 0.5, %v2817_v44 }
0x14c9   :  { %v2827_v32 = vmul.f32 %v2825_v47, %v2817_v44  ;;  %v2826_v48 = vmul.f32 0.044715, %v2820_v5  ;;  %v2824_v59 = vmul.f32 0.5, %v2820_v5 }
0x14cb   :  { %v2829_v49 = vmul.f32 %v2827_v32, %v2817_v44  ;;  %v2828_v50 = vmul.f32 %v2826_v48, %v2820_v5  ;;  %v3064_v48 = vld [vmem:[#allocation24] sm:$0xff] }
0x14cd   :  { %v2831_v51 = vadd.f32 %v2829_v49, %v2817_v44  ;;  %v2830_v40 = vmul.f32 %v2828_v50, %v2820_v5  ;;  %v3415_v44 = vld [vmem:[%s5326_s17 + $0x1] ss:$0 sm:$0xff]  ;;  %v3065_v49 = vld [vmem:[#allocation24 + $0x8] sm:$0xff]  ;;  %v3066_v50 = vld [vmem:[#allocation24 + $0x10] sm:$0xff] }
0x14cf   :  { %v2833_v53 = vmul.f32 0.7978846, %v2831_v51  ;;  %v2832_v54 = vadd.f32 %v2830_v40, %v2820_v5  ;;  %v3825_v51 = vpack.c.bf16 %v3065_v49, %v3064_v48  ;;  %v3067_v40 = vld [vmem:[#allocation24 + $0x18] sm:$0xff] }
0x14d1   :  { %3970 = vtanh.f32 %v2833_v53  ;;  %v2834_v39 = vmul.f32 0.7978846, %v2832_v54  ;;  %v3828_v53 = vpack.c.bf16 %v3067_v40, %v3066_v50  ;;  %v3416_v54 = vld [vmem:[%s5328_s19] ss:$0 sm:$0xff] }
0x14d3   :  { %3972 = vtanh.f32 %v2834_v39 }
0x14db   :  { %v3971_v55 = vpop.eup %3970 }
0x14dc   :  { %v2837_v52 = vadd.f32 1.0, %v3971_v55 }
0x14dd   :  { %v3973_v56 = vpop.eup %3972 }
0x14de   :  { %v2838_v60 = vadd.f32 1.0, %v3973_v56  ;;  %v2839_v61 = vmul.f32 %v2837_v52, %v2823_v57  ;;  %v3148_v57 = vld [vmem:[#allocation9] sm:$0x3f] }
0x14e0   :  { %v2840_v58 = vmul.f32 %v2838_v60, %v2824_v59  ;;  %v3157_v59 = vmul.f32 %v3148_v57, %v3148_v57 }
0x14e2   :  { %v2841_v62 = vpack.c.bf16 %v2840_v58, %v2839_v61  ;;  %v3159_v60 = vsel %vm3158_vm9, %v3157_v59, 0.0  ;;  %v3418_v61 = vld [vmem:[%s5330_s21] ss:$0 sm:$0xff] }
0x14e4   :  { %3788 = vmatmul.mubr.msk.bf16.vlgmr.msra.gmra.mrb[80].mxu0 %vm1544_vm7, %v2841_v62 }
0x15b7   :  { %v2920_v63 = vpop.f32.mrb[80].mxu0 }
0x15b8   :  { %v2921_v0 = vadd.f32 %v3407_v42, %v2920_v63  ;;  %v3789_v2 = vpop.f32.mrb[81].mxu0 }
0x15b9   :  { %v2923_v3 = vpop.f32.mrb[82].mxu0 }
0x15ba   :  { %v2927_v4 = vadd.f32 %v2921_v0, %v2751_v33  ;;  %v2924_v6 = vadd.f32 %v3407_v42, %v2923_v3  ;;  %v3790_v7 = vpop.f32.mrb[83].mxu0 }
0x15bc   :  { %v2928_v8 = vadd.f32 %v2924_v6, %v2752_v34  ;;  %v2933_v12 = vsel %vm248_vm0, %v2927_v4, 0.0 }
0x15bd   :  { %2934 = vadd.xlane.f32.xlu0 %v2933_v12 }
0x15be   :  { %v2936_v13 = vsel %vm248_vm0, %v2928_v8, 0.0 }
0x15bf   :  { %2937 = vadd.xlane.f32.xlu1 %v2936_v13 }
0x164a   :  { %v2935_v9 = vpop.xlane.xlu0 %2934 }
0x164b   :  { %v2939_v14 = vmul.f32 0.03125, %v2935_v9  ;;  %v4368_v9 = vmov 0  }
0x164c   :  { %v2938_v10 = vpop.xlane.xlu1 %2937  ;;  %3865 = vset.pattern.permute.xlu0 %v4368_v9 }
0x164d   :  { %v2941_v16 = vsub.f32 %v2927_v4, %v2939_v14  ;;  %v2940_v17 = vmul.f32 0.03125, %v2938_v10 }
0x164f   :  { %v2942_v18 = vsub.f32 %v2928_v8, %v2940_v17  ;;  %v2943_v11 = vmul.f32 %v2941_v16, %v2941_v16 }
0x1651   :  { %v2945_v21 = vsel %vm248_vm0, %v2943_v11, 0.0  ;;  %v2944_v23 = vmul.f32 %v2942_v18, %v2942_v18 }
0x1652   :  { %2946 = vadd.xlane.f32.xlu0 %v2945_v21 }
0x1653   :  { %v2948_v24 = vsel %vm248_vm0, %v2944_v23, 0.0 }
0x1654   :  { %2949 = vadd.xlane.f32.xlu1 %v2948_v24  ;;  %v3257_v24 = vand.u32 127, %v413_v1 }
0x1656   :  { %3160 = vadd.xlane.f32.xlu0 %v3159_v60 }
0x16df   :  { %v2947_v30 = vpop.xlane.xlu0 %2946 }
0x16e0   :  { %v2951_v33 = vmul.f32 0.03125, %v2947_v30 }
0x16e1   :  { %v2950_v34 = vpop.xlane.xlu1 %2949 }
0x16e2   :  { %v2953_v35 = vadd.f32 1e-12, %v2951_v33  ;;  %v2952_v36 = vmul.f32 0.03125, %v2950_v34 }
0x16e3   :  { %v3161_v2 = vpop.xlane.xlu0 %3160 }
0x16e4   :  { %3974 = vrsqrt.f32 %v2953_v35  ;;  %v2954_v37 = vadd.f32 1e-12, %v2952_v36  ;;  %v3162_v3 = vadd.f32 1e-12, %v3161_v2 }
0x16e6   :  { %3976 = vrsqrt.f32 %v2954_v37 }
0x16ee   :  { %v3975_v22 = vpop.eup %3974 }
0x16ef   :  { %v2957_v41 = vmul.f32 %v3975_v22, %v2941_v16 }
0x16f0   :  { %v3977_v43 = vpop.eup %3976 }
0x16f1   :  { %v2965_v45 = vmul.f32 %v3414_v38, %v2957_v41  ;;  %v2958_v46 = vmul.f32 %v3977_v43, %v2942_v18  ;;  %v3255_v18 = vld [vmem:[%s5359_s1] sm:$0x3] }
0x16f3   :  { %v2973_v47 = vadd.f32 %v3415_v44, %v2965_v45  ;;  %v2966_v5 = vmul.f32 %v3414_v38, %v2958_v46 }
0x16f5   :  { %2976 = vst.msk [vmem:[#allocation3] sm:$0x1] %vm2975_vm8, %v2973_v47  ;;  %v2974_v31 = vadd.f32 %v3415_v44, %v2966_v5 }
0x16f7   :  { %2977 = vst.msk [vmem:[#allocation3 + $0x1] sm:$0x1] %vm2975_vm8, %v2974_v31 }
0x16fe   :  { %v2978_v32 = vld [vmem:[#allocation3] sm:$0x3] }
0x16ff   :  { %3800 = vmatmul.mubr.msk.f32.vlgmr.msra.gmra.mrb[76].mxu1 %vm248_vm0, %v2978_v32 }
0x1700   :  { %3810 = vmatprep.mubr.msk.f32.mxu1 %vm4354_vm1, %v4353_v15  ;;  %3826 = vmatpush3.bf16.msra.mxu1 %v3825_v51 }
0x1701   :  { %3827 = vmatprep.subr.bf16.mxu1 %v4367_v28 }
0x1704   :  { %3829 = vmatpush3.bf16.msra.mxu1 %v3828_v53 }
0x1705   :  { %3813 = vmatprep.subr.mxu1 %v4353_v15 }
0x17d2   :  { %v3059_v39 = vpop.f32.mrb[76].mxu1 }
0x17d3   :  { %v3060_v55 = vadd.f32 %v3416_v54, %v3059_v39  ;;  %v3801_v52 = vpop.f32.mrb[77].mxu1 }
0x17d5   :  { %3978 = vtanh.f32 %v3060_v55 }
0x17d6   :  { %3980 = vrsqrt.f32 %v3162_v3 }
0x17df   :  { %v3979_v56 = vpop.eup %3978 }
0x17e0   :  { %3811 = vmatmul.mubr.msk.f32.vlgmr.msra.gmra.mrb[78].mxu1 %vm248_vm0, %v3979_v56  ;;  %v3981_v4 = vpop.eup %3980 }
0x17e1   :  { %3815 = vmatprep.mubr.msk.f32.mxu1 %vm4354_vm1, %v4353_v15  ;;  %v3164_v6 = vmul.f32 %v3981_v4, %v3148_v57 }
0x17e3   :  { %3814 = vmatpush3.xpose.msk.msra.mxu1 %vm248_vm0, %v3164_v6 }
0x18b3   :  { %v3144_v58 = vpop.f32.mrb[78].mxu1 }
0x18b4   :  { %v3145_v62 = vadd.f32 %v3418_v61, %v3144_v58  ;;  %v3812_v42 = vpop.f32.mrb[79].mxu1 }
0x18b6   :  { %v3149_v63 = vmul.f32 %v3145_v62, %v3145_v62 }
0x18b8   :  { %v3151_v0 = vsel %vm3150_vm10, %v3149_v63, 0.0 }
0x18b9   :  { %3152 = vadd.xlane.f32.xlu1 %v3151_v0 }
0x1946   :  { %v3153_v7 = vpop.xlane.xlu1 %3152 }
0x1947   :  { %v3154_v8 = vadd.f32 1e-12, %v3153_v7 }
0x1949   :  { %3982 = vrsqrt.f32 %v3154_v8 }
0x1953   :  { %v3983_v12 = vpop.eup %3982 }
0x1954   :  { %v3156_v13 = vmul.f32 %v3983_v12, %v3145_v62 }
0x1956   :  { %3816 = vmatmul.mubr.msk.f32.vlgmr.msra.gmra.mrb[80].mxu1 %vm248_vm0, %v3156_v13 }
0x1a29   :  { %v3237_v14 = vpop.f32.mrb[80].mxu1 }
0x1a2a   :  { %v3241_v10 = vmul.f32 10.0, %v3237_v14  ;;  %v3817_v16 = vpop.f32.mrb[81].mxu1 }
0x1a2c   :  { %v3243_v17 = vsel %vm3242_vm11, %v3241_v10, -inf  ;;  %3281 = vst.msk [vmem:[#allocation26] sm:$0x3] %vm3242_vm11, %v3241_v10 }
0x1a2d   :  { %3244 = vmax.xlane.f32.xlu0 %v3243_v17 }
0x1a43   :  { %3259 = vperm.xlu0 %3865, %v3255_v18  }
0x1aba   :  { %v3245_v11 = vpop.xlane.xlu0 %3244 }
0x1abb   :  { %v3246_v21 = vsub.f32 %v3241_v10, %v3245_v11 }
0x1abd   :  { %v3247_v23 = vmul.f32 1.442695, %v3246_v21 }
0x1abf   :  { %3984 = vpow2.f32 %v3247_v23 }
0x1ac2   :  { %v3260_v25 = vpop.permute.xlu0 %3259 }
0x1ac3   :  { %vm3261_vm12 = vcmp.eq.s32.totalorder %v3257_v24, %v3260_v25 }
0x1ac4   :  { %v3422_v19 = vsel %vm3261_vm12, 1.0, %v4353_v15 }
0x1ac5   :  { %v3264_v27 = vmul.f32 %v3422_v19, %v3241_v10 }
0x1ac7   :  { %v3265_v28 = vsel %vm3242_vm11, %v3264_v27, 0.0 }
0x1ac9   :  { %v3985_v26 = vpop.eup %3984 }
0x1aca   :  { %v3249_v20 = vsel %vm3242_vm11, %v3985_v26, 0.0 }
0x1acb   :  { %3250 = vadd.xlane.f32.xlu1 %v3249_v20 }
0x1acf   :  { %3266 = vadd.xlane.f32.xlu1 %v3265_v28 }
0x1ad0   :  { %4285 = shalt.err (!%p4282_p10)
}
0x1ad1   :  { %s5360_s11 = sld [smem:[#allocation46_spill]] }
0x1ad7   :  { %s4286_s12 = scalar_lea.hbm %s5360_s11, 32 }
0x1ad8   :  { %p4287_p11 = scmp.ne.s32.totalorder %s5360_s11, %s4286_s12  ;;  %p4290_p12 = scmp.lt.u32.totalorder %s4286_s12, %s5360_s11 }
0x1ada   :  { %p4292_p13 = pnand %p4290_p12, %p4287_p11 }
0x1adc   :  { %4295 = shalt.err (!%p4292_p13)
}
0x1add   :  { %3301 = dma.vmem_to_hbm [thread:$0]  %s3299_s27, 32, %s5360_s11, [#allocation27]   ;;  %vm3269_vm13 = vcmask 1041408   ;;  %vm3279_vm14 = vcmask 0  }
0x1ade   :  { %s4370_s30 = smov [#allocation25]  }
0x1adf   :  { %s3288_s14 = sshll.u32 %s4370_s30, 4  ;;  %s3289_s14 = int_to_ptr.vmem [resolvable:$true] %s3288_s14 }
0x1ae0   :  { %s4296_s15 = scalar_lea.vmem %s3289_s14, 16  ;;  %s4300_s5 = scalar_lea.vmem %s3289_s14, 32 }
0x1ae1   :  { %p4297_p0 = scmp.ne.s32.totalorder %s3289_s14, %s4296_s15  ;;  %p4301_p1 = scmp.lt.s32.totalorder %s3289_s14, %s3289_s14 }
0x1ae2   :  { %p4302_p2 = scmp.lt.s32.totalorder %s4300_s5, %s4296_s15 }
0x1ae4   :  { %p4303_p3 = por %p4302_p2, %p4301_p1 }
0x1ae6   :  { %p4304_p4 = pnand %p4303_p3, %p4297_p0 }
0x1b58   :  { %v3251_v15 = vpop.xlane.xlu1 %3250 }
0x1b59   :  { %3986 = vlog2.f32 %v3251_v15 }
0x1b5c   :  { %v3267_v33 = vpop.xlane.xlu1 %3266 }
0x1b63   :  { %v3987_v1 = vpop.eup %3986 }
0x1b64   :  { %v3253_v29 = vmul.f32 0.6931472, %v3987_v1 }
0x1b66   :  { %v3254_v30 = vadd.f32 %v3253_v29, %v3245_v11 }
0x1b68   :  { %v3268_v34 = vsub.f32 %v3254_v30, %v3267_v33 }
0x1b6a   :  { %v3270_v35 = vsel %vm3269_vm13, %v3268_v34, 0.0 }
0x1b6b   :  { %v3271_v36 = vrot.slane %v3270_v35, 4 }
0x1b6d   :  { %v3272_v37 = vadd.f32 %v3271_v36, %v3270_v35 }
0x1b6f   :  { %v3273_v22 = vrot.slane %v3272_v37, 2 }
0x1b71   :  { %v3274_v38 = vadd.f32 %v3273_v22, %v3272_v37 }
0x1b73   :  { %v3275_v41 = vrot.slane %v3274_v38, 1 }
0x1b75   :  { %v3276_v43 = vadd.f32 %v3275_v41, %v3274_v38 }
0x1b77   :  { %v3278_v44 = vmul.f32 0.5, %v3276_v43 }
0x1b79   :  { %3280 = vst.msk [vmem:[#allocation25] sm:$0x1] %vm3279_vm14, %v3278_v44 }
0x1b7a   :  { %4307 = shalt.err (!%p4304_p4)
}
0x1b7b   :  { %s5361_s2 = sld [smem:[#allocation45_spill]] }
0x1b81   :  { %s4308_s13 = scalar_lea.hbm %s5361_s2, 16 }
0x1b82   :  { %p4309_p5 = scmp.ne.s32.totalorder %s5361_s2, %s4308_s13  ;;  %p4312_p6 = scmp.lt.u32.totalorder %s4308_s13, %s5361_s2 }
0x1b84   :  { %p4314_p7 = pnand %p4312_p6, %p4309_p5 }
0x1b86   :  { %4317 = shalt.err (!%p4314_p7)
}
0x1b87   :  { %3291 = dma.vmem_to_hbm [thread:$0]  %s3289_s14, 16, %s5361_s2, [#allocation6]  }
0x1b88   :  { %4332 = dma.done.wait [#allocation6], 16  }
0x1b89   :  { %4333 = vsyncadd [#allocation6], 4294967280 }
0x1b8a   :  { %4334 = dma.done.wait [#allocation27], 32  }
0x1b8b   :  { %4335 = vsyncadd [#allocation27], 4294967264 }
0x1b8c   :  { %3308 = vsyncpa [#allocation5], 1 }
0x1b8d   :  { %3309 = vsyncpa [#allocation8], 1 }
0x1b8e   :  { %3310 = vsyncpa [#allocation11], 1 }
0x1b8f   :  { %3311 = vsyncpa [#allocation14], 1 }
0x1b90   :  { %3312 = vsyncpa [#allocation17], 1 }
0x1b91   :  { %3313 = vsyncpa [#allocation20], 1 }
0x1b92   :  { %3314 = vsyncpa [#allocation23], 1 }
0x1b93   :  { %3315 = vsyncpa [#allocation6], 1 }
0x1b94   :  { %3316 = vsyncpa [#allocation27], 1 }

</bundles_post_ra>
